<compile_context>
chip_gen: v6e
topology: v6e:2x2x1
jax: 0.10.0
libtpu: 0.0.40
codegen_flags: <defaults>
</compile_context>

<pallas_src>
import jax
import jax.numpy as jnp
from jax.experimental import pallas as pl
from jax.experimental.pallas import tpu as pltpu

B, N = 2, 1024        # batch, points per batch  (M = B*N = 2048 rows)
D = 3                 # point dimensionality
F_DIM = 32            # conditioning feature dim
PROJ_DIM = 32         # projection output dim
HID = 32              # MLP hidden size
TM = 512              # rows per grid step (B*N must be divisible by TM)


def coupling_kernel(y_ref, f_ref, mask_ref, w1f_ref, wp_ref, b1_ref,
                    w2_ref, b2_ref, out_ref):
    y = y_ref[...]                       # (TM, D)   f32
    mask = mask_ref[...]                 # (1, D)    f32, broadcasts over rows
    y1 = y * mask

    # Fused first layer (projection folded in; s/t branches concatenated along
    # the hidden axis):  h = F @ W1f_comb + y1 @ (Wp @ W1p_comb) + b1_comb
    h = (jnp.dot(f_ref[...], w1f_ref[...], preferred_element_type=jnp.float32)
         + jnp.dot(y1.astype(jnp.bfloat16), wp_ref[...],
                   preferred_element_type=jnp.float32)
         + b1_ref[...])                  # (TM, 2*HID)
    h = jnp.maximum(h, 0.0)

    # Fused second layer with block-diagonal [w2_s ; w2_t]  ->  st = [s | t]
    st = (jnp.dot(h.astype(jnp.bfloat16), w2_ref[...],
                  preferred_element_type=jnp.float32)
          + b2_ref[...])                 # (TM, 2*D)
    s = st[:, 0:D]
    t = st[:, D:2 * D]

    # x = y1 + (1 - mask) * ((y - t) * exp(-s));   ldj = sum(-s, -1)
    x = y1 + (1.0 - mask) * ((y - t) * jnp.exp(-s))
    ldj = -jnp.sum(s, axis=-1, keepdims=True)

    # single lane-contiguous output slab [x | ldj]
    out_ref[:, 0:D] = x
    out_ref[:, D:D + 1] = ldj


def pack_params(params):
    """Fold the projection Linear into the first MLP layer and fuse s/t."""
    (mask, wp, bp,
     w1f_s, w1p_s, b1_s, w2_s, b2_s,
     w1f_t, w1p_t, b1_t, w2_t, b2_t) = params
    w1p = jnp.concatenate([w1p_s, w1p_t], axis=1)              # (PROJ, 2H)
    w1f = jnp.concatenate([w1f_s, w1f_t], axis=1)              # (F, 2H)
    wp_fold = wp @ w1p                                         # (D, 2H)
    b1 = jnp.concatenate([b1_s, b1_t], axis=1) + bp @ w1p      # (1, 2H)
    z = jnp.zeros((HID, D), jnp.float32)
    w2 = jnp.concatenate(
        [jnp.concatenate([w2_s, z], axis=1),
         jnp.concatenate([z, w2_t], axis=1)], axis=0)          # (2H, 2D)
    b2 = jnp.concatenate([b2_s, b2_t], axis=1)                 # (1, 2D)
    return (mask,
            w1f.astype(jnp.bfloat16),
            wp_fold.astype(jnp.bfloat16),
            b1,
            w2.astype(jnp.bfloat16),
            b2)


def coupling_forward(F_feat, y, packed):
    Bb, Nn, Df = F_feat.shape
    _, _, Dy = y.shape
    M = Bb * Nn
    assert M % TM == 0          # (keep M//TM even so v7x megacore splits evenly)
    f2 = F_feat.reshape(M, Df).astype(jnp.bfloat16)   # bf16 MXU operand, halves DMA bytes
    y2 = y.reshape(M, Dy)                             # f32 (needed for exact tail math)

    in_specs = ([pl.BlockSpec((TM, Dy), lambda i: (i, 0)),
                 pl.BlockSpec((TM, Df), lambda i: (i, 0))]
                + [pl.BlockSpec(p.shape, lambda i: (0, 0)) for p in packed])
    out_specs = pl.BlockSpec((TM, Dy + 1), lambda i: (i, 0))
    out_shape = jax.ShapeDtypeStruct((M, Dy + 1), jnp.float32)

    slab = pl.pallas_call(
        coupling_kernel,
        grid=(M // TM,),
        in_specs=in_specs,
        out_specs=out_specs,
        out_shape=out_shape,
        compiler_params=pltpu.CompilerParams(
            dimension_semantics=("parallel",)),
    )(y2, f2, *packed)

    x = slab[:, :Dy].reshape(Bb, Nn, Dy)
    ldj = slab[:, Dy].reshape(Bb, Nn)
    return x, ldj


def reference_forward(F_feat, y, params):
    """Full-f32 reference matching the PyTorch module exactly."""
    (mask, wp, bp,
     w1f_s, w1p_s, b1_s, w2_s, b2_s,
     w1f_t, w1p_t, b1_t, w2_t, b2_t) = params
    m = mask.reshape(-1)
    y1 = y * m
    proj = y1 @ wp + bp.reshape(-1)
    F_y1 = jnp.concatenate([F_feat, proj], axis=-1)
    w1s = jnp.concatenate([w1f_s, w1p_s], axis=0)
    s = jnp.maximum(F_y1 @ w1s + b1_s.reshape(-1), 0.0) @ w2_s + b2_s.reshape(-1)
    w1t = jnp.concatenate([w1f_t, w1p_t], axis=0)
    t = jnp.maximum(F_y1 @ w1t + b1_t.reshape(-1), 0.0) @ w2_t + b2_t.reshape(-1)
    x = y1 + (1.0 - m) * ((y - t) * jnp.exp(-s))
    ldj = (-s).sum(-1)
    return x, ldj


def reference_forward_matched(F_feat, y, packed):
    """Pure-JAX emulation of the kernel's exact numerics (bf16 MXU operands)."""
    mask, w1f, wp_fold, b1, w2, b2 = packed
    m = mask.reshape(-1)
    Bb, Nn, _ = y.shape
    yf = y.reshape(Bb * Nn, -1)
    ff = F_feat.reshape(Bb * Nn, -1).astype(jnp.bfloat16)
    y1 = yf * m
    h = (jnp.dot(ff, w1f, preferred_element_type=jnp.float32)
         + jnp.dot(y1.astype(jnp.bfloat16), wp_fold,
                   preferred_element_type=jnp.float32)
         + b1)
    h = jnp.maximum(h, 0.0)
    st = jnp.dot(h.astype(jnp.bfloat16), w2,
                 preferred_element_type=jnp.float32) + b2
    s, t = st[:, :D], st[:, D:2 * D]
    x = y1 + (1.0 - m) * ((yf - t) * jnp.exp(-s))
    ldj = (-s).sum(-1)
    return x.reshape(Bb, Nn, D), ldj.reshape(Bb, Nn)


def make_params(key):
    ks = jax.random.split(key, 12)
    scale = 0.1
    mask = jnp.array([[1.0, 0.0, 0.0]], dtype=jnp.float32)          # (1, D)
    wp = scale * jax.random.normal(ks[0], (D, PROJ_DIM), jnp.float32)
    bp = scale * jax.random.normal(ks[1], (1, PROJ_DIM), jnp.float32)
    w1f_s = scale * jax.random.normal(ks[2], (F_DIM, HID), jnp.float32)
    w1p_s = scale * jax.random.normal(ks[3], (PROJ_DIM, HID), jnp.float32)
    b1_s = scale * jax.random.normal(ks[4], (1, HID), jnp.float32)
    w2_s = scale * jax.random.normal(ks[5], (HID, D), jnp.float32)
    b2_s = scale * jax.random.normal(ks[6], (1, D), jnp.float32)
    w1f_t = scale * jax.random.normal(ks[7], (F_DIM, HID), jnp.float32)
    w1p_t = scale * jax.random.normal(ks[8], (PROJ_DIM, HID), jnp.float32)
    b1_t = scale * jax.random.normal(ks[9], (1, HID), jnp.float32)
    w2_t = scale * jax.random.normal(ks[10], (HID, D), jnp.float32)
    b2_t = scale * jax.random.normal(ks[11], (1, D), jnp.float32)
    return (mask, wp, bp,
            w1f_s, w1p_s, b1_s, w2_s, b2_s,
            w1f_t, w1p_t, b1_t, w2_t, b2_t)


if __name__ == "__main__":
    key = jax.random.PRNGKey(0)
    kF, ky, kp = jax.random.split(key, 3)
    F_feat = jax.random.normal(kF, (B, N, F_DIM), jnp.float32)
    y = jax.random.normal(ky, (B, N, D), jnp.float32)
    params = make_params(kp)
    packed = pack_params(params)

    x, ldj = coupling_forward(F_feat, y, packed)
    jax.block_until_ready((x, ldj))
    assert x.shape == (B, N, D) and ldj.shape == (B, N)

    # (1) exact-numerics check vs. a reference that uses the same bf16 MXU
    #     operands as the kernel.
    x_m, ldj_m = reference_forward_matched(F_feat, y, packed)
    assert jnp.allclose(x, x_m, atol=2e-3, rtol=2e-3)
    assert jnp.allclose(ldj, ldj_m, atol=2e-3, rtol=2e-3)

    # (2) semantic check vs. the full-f32 PyTorch-equivalent reference
    #     (relaxed tolerance due to bf16 matmul operands).
    x_ref, ldj_ref = reference_forward(F_feat, y, params)
    assert jnp.allclose(x, x_ref, atol=5e-2, rtol=5e-2)
    assert jnp.allclose(ldj, ldj_ref, atol=5e-2, rtol=5e-2)

    print("KERNEL_OK")
</pallas_src>

<mosaic_0001>
module attributes {stable_mosaic.version = 11 : i64} {
  func.func @coupling_kernel(%arg0: i32, %arg1: memref<512x3xf32, #tpu.memory_space<vmem>>, %arg2: memref<512x32xbf16, #tpu.memory_space<vmem>>, %arg3: memref<1x3xf32, #tpu.memory_space<vmem>>, %arg4: memref<32x64xbf16, #tpu.memory_space<vmem>>, %arg5: memref<3x64xbf16, #tpu.memory_space<vmem>>, %arg6: memref<1x64xf32, #tpu.memory_space<vmem>>, %arg7: memref<64x6xbf16, #tpu.memory_space<vmem>>, %arg8: memref<1x6xf32, #tpu.memory_space<vmem>>, %arg9: memref<512x4xf32, #tpu.memory_space<vmem>>) attributes {dimension_semantics = [#tpu.dimension_semantics<parallel>], iteration_bounds = array<i64: 4>, scalar_prefetch = 0 : i64, scratch_operands = 0 : i64, tpu.core_type = #tpu.core_type<tc>, window_params = [{transform_indices = @transform_0, window_bounds = array<i64: 512, 3>}, {transform_indices = @transform_1, window_bounds = array<i64: 512, 32>}, {pipeline_mode = #tpu.pipeline_mode<synchronous>, transform_indices = @transform_2, window_bounds = array<i64: 1, 3>}, {pipeline_mode = #tpu.pipeline_mode<synchronous>, transform_indices = @transform_3, window_bounds = array<i64: 32, 64>}, {pipeline_mode = #tpu.pipeline_mode<synchronous>, transform_indices = @transform_4, window_bounds = array<i64: 3, 64>}, {pipeline_mode = #tpu.pipeline_mode<synchronous>, transform_indices = @transform_5, window_bounds = array<i64: 1, 64>}, {pipeline_mode = #tpu.pipeline_mode<synchronous>, transform_indices = @transform_6, window_bounds = array<i64: 64, 6>}, {pipeline_mode = #tpu.pipeline_mode<synchronous>, transform_indices = @transform_7, window_bounds = array<i64: 1, 6>}, {transform_indices = @transform_8, window_bounds = array<i64: 512, 4>}]} {
    %c0 = arith.constant 0 : index
    %c0_0 = arith.constant 0 : index
    %0 = vector.load %arg1[%c0, %c0_0] : memref<512x3xf32, #tpu.memory_space<vmem>>, vector<512x3xf32>
    %c0_1 = arith.constant 0 : index
    %c0_2 = arith.constant 0 : index
    %1 = vector.load %arg3[%c0_1, %c0_2] : memref<1x3xf32, #tpu.memory_space<vmem>>, vector<1x3xf32>
    %2 = vector.broadcast %1 : vector<1x3xf32> to vector<512x3xf32>
    %3 = arith.mulf %0, %2 : vector<512x3xf32>
    %c0_3 = arith.constant 0 : index
    %c0_4 = arith.constant 0 : index
    %4 = vector.load %arg2[%c0_3, %c0_4] : memref<512x32xbf16, #tpu.memory_space<vmem>>, vector<512x32xbf16>
    %c0_5 = arith.constant 0 : index
    %c0_6 = arith.constant 0 : index
    %5 = vector.load %arg4[%c0_5, %c0_6] : memref<32x64xbf16, #tpu.memory_space<vmem>>, vector<32x64xbf16>
    %cst = arith.constant dense<0.000000e+00> : vector<512x64xf32>
    %6 = tpu.matmul %4, %5, %cst {dimension_numbers = #tpu.dot_dimension_numbers<[1], [0], [0], [1], [0, 0, 1, 1], [], []>} : vector<512x32xbf16>, vector<32x64xbf16>, vector<512x64xf32> -> vector<512x64xf32>
    %7 = arith.truncf %3 : vector<512x3xf32> to vector<512x3xbf16>
    %c0_7 = arith.constant 0 : index
    %c0_8 = arith.constant 0 : index
    %8 = vector.load %arg5[%c0_7, %c0_8] : memref<3x64xbf16, #tpu.memory_space<vmem>>, vector<3x64xbf16>
    %cst_9 = arith.constant dense<0.000000e+00> : vector<512x64xf32>
    %9 = tpu.matmul %7, %8, %cst_9 {dimension_numbers = #tpu.dot_dimension_numbers<[1], [0], [0], [1], [0, 0, 1, 1], [], []>} : vector<512x3xbf16>, vector<3x64xbf16>, vector<512x64xf32> -> vector<512x64xf32>
    %10 = arith.addf %6, %9 : vector<512x64xf32>
    %c0_10 = arith.constant 0 : index
    %c0_11 = arith.constant 0 : index
    %11 = vector.load %arg6[%c0_10, %c0_11] : memref<1x64xf32, #tpu.memory_space<vmem>>, vector<1x64xf32>
    %12 = vector.broadcast %11 : vector<1x64xf32> to vector<512x64xf32>
    %13 = arith.addf %10, %12 : vector<512x64xf32>
    %cst_12 = arith.constant 0.000000e+00 : f32
    %14 = vector.broadcast %cst_12 : f32 to vector<512x64xf32>
    %15 = arith.maximumf %13, %14 : vector<512x64xf32>
    %16 = arith.truncf %15 : vector<512x64xf32> to vector<512x64xbf16>
    %c0_13 = arith.constant 0 : index
    %c0_14 = arith.constant 0 : index
    %17 = vector.load %arg7[%c0_13, %c0_14] : memref<64x6xbf16, #tpu.memory_space<vmem>>, vector<64x6xbf16>
    %cst_15 = arith.constant dense<0.000000e+00> : vector<512x6xf32>
    %18 = tpu.matmul %16, %17, %cst_15 {dimension_numbers = #tpu.dot_dimension_numbers<[1], [0], [0], [1], [0, 0, 1, 1], [], []>} : vector<512x64xbf16>, vector<64x6xbf16>, vector<512x6xf32> -> vector<512x6xf32>
    %c0_16 = arith.constant 0 : index
    %c0_17 = arith.constant 0 : index
    %19 = vector.load %arg8[%c0_16, %c0_17] : memref<1x6xf32, #tpu.memory_space<vmem>>, vector<1x6xf32>
    %20 = vector.broadcast %19 : vector<1x6xf32> to vector<512x6xf32>
    %21 = arith.addf %18, %20 : vector<512x6xf32>
    %22 = vector.extract_strided_slice %21 {offsets = [0, 0], sizes = [512, 3], strides = [1, 1]} : vector<512x6xf32> to vector<512x3xf32>
    %23 = vector.extract_strided_slice %21 {offsets = [0, 3], sizes = [512, 3], strides = [1, 1]} : vector<512x6xf32> to vector<512x3xf32>
    %cst_18 = arith.constant 1.000000e+00 : f32
    %24 = vector.broadcast %cst_18 : f32 to vector<1x3xf32>
    %25 = arith.subf %24, %1 : vector<1x3xf32>
    %26 = arith.subf %0, %23 : vector<512x3xf32>
    %cst_19 = arith.constant 0.000000e+00 : f32
    %27 = vector.broadcast %cst_19 : f32 to vector<512x3xf32>
    %28 = arith.subf %27, %22 : vector<512x3xf32>
    %29 = math.exp %28 : vector<512x3xf32>
    %30 = arith.mulf %26, %29 : vector<512x3xf32>
    %31 = vector.broadcast %25 : vector<1x3xf32> to vector<512x3xf32>
    %32 = arith.mulf %31, %30 : vector<512x3xf32>
    %33 = arith.addf %3, %32 : vector<512x3xf32>
    %cst_20 = arith.constant dense<0.000000e+00> : vector<512xf32>
    %34 = vector.multi_reduction <add>, %22, %cst_20 [1] : vector<512x3xf32> to vector<512xf32>
    %35 = vector.shape_cast %34 : vector<512xf32> to vector<512x1xf32>
    %cst_21 = arith.constant 0.000000e+00 : f32
    %36 = vector.broadcast %cst_21 : f32 to vector<512x1xf32>
    %37 = arith.subf %36, %35 : vector<512x1xf32>
    %c0_22 = arith.constant 0 : index
    %c0_23 = arith.constant 0 : index
    %38 = vector.load %arg9[%c0_22, %c0_23] : memref<512x4xf32, #tpu.memory_space<vmem>>, vector<512x3xf32>
    tpu.vector_store %arg9[%c0_22, %c0_23], %33 {strides = array<i32>} : memref<512x4xf32, #tpu.memory_space<vmem>>, vector<512x3xf32>,
    %c0_24 = arith.constant 0 : index
    %c3 = arith.constant 3 : index
    %39 = vector.load %arg9[%c0_24, %c3] : memref<512x4xf32, #tpu.memory_space<vmem>>, vector<512x1xf32>
    tpu.vector_store %arg9[%c0_24, %c3], %37 {strides = array<i32>} : memref<512x4xf32, #tpu.memory_space<vmem>>, vector<512x1xf32>,
    return
  }
  func.func @transform_0(%arg0: i32) -> (i32, i32) {
    %c0_i32 = arith.constant 0 : i32
    %c0_i32_0 = arith.constant 0 : i32
    return %arg0, %c0_i32 : i32, i32
  }
  func.func @transform_1(%arg0: i32) -> (i32, i32) {
    %c0_i32 = arith.constant 0 : i32
    %c0_i32_0 = arith.constant 0 : i32
    return %arg0, %c0_i32 : i32, i32
  }
  func.func @transform_2(%arg0: i32) -> (i32, i32) {
    %c0_i32 = arith.constant 0 : i32
    %c0_i32_0 = arith.constant 0 : i32
    %c0_i32_1 = arith.constant 0 : i32
    return %c0_i32, %c0_i32_0 : i32, i32
  }
  func.func @transform_3(%arg0: i32) -> (i32, i32) {
    %c0_i32 = arith.constant 0 : i32
    %c0_i32_0 = arith.constant 0 : i32
    %c0_i32_1 = arith.constant 0 : i32
    return %c0_i32, %c0_i32_0 : i32, i32
  }
  func.func @transform_4(%arg0: i32) -> (i32, i32) {
    %c0_i32 = arith.constant 0 : i32
    %c0_i32_0 = arith.constant 0 : i32
    %c0_i32_1 = arith.constant 0 : i32
    return %c0_i32, %c0_i32_0 : i32, i32
  }
  func.func @transform_5(%arg0: i32) -> (i32, i32) {
    %c0_i32 = arith.constant 0 : i32
    %c0_i32_0 = arith.constant 0 : i32
    %c0_i32_1 = arith.constant 0 : i32
    return %c0_i32, %c0_i32_0 : i32, i32
  }
  func.func @transform_6(%arg0: i32) -> (i32, i32) {
    %c0_i32 = arith.constant 0 : i32
    %c0_i32_0 = arith.constant 0 : i32
    %c0_i32_1 = arith.constant 0 : i32
    return %c0_i32, %c0_i32_0 : i32, i32
  }
  func.func @transform_7(%arg0: i32) -> (i32, i32) {
    %c0_i32 = arith.constant 0 : i32
    %c0_i32_0 = arith.constant 0 : i32
    %c0_i32_1 = arith.constant 0 : i32
    return %c0_i32, %c0_i32_0 : i32, i32
  }
  func.func @transform_8(%arg0: i32) -> (i32, i32) {
    %c0_i32 = arith.constant 0 : i32
    %c0_i32_0 = arith.constant 0 : i32
    return %arg0, %c0_i32 : i32, i32
  }
}

</mosaic_0001>

<bundles_post_ra>
// kernel: tpu_custom_call.1
= control target key start
LH: loop header
LB: loop body
LE: loop exit
PB: predicated region body
PF: predicated region fallthrough
CT: control target
= control target key end

     0   :  { %s4033_s27 = smov 0   ;;  %s5724_s0 = inlined_call_operand.vmem [shape: f32[2048,3], index: 0, kind: input, shape index: {}]   ;;  %s5725_s1 = inlined_call_operand.vmem [shape: bf16[2048,32], index: 1, kind: input, shape index: {}]   ;;  %s5726_s2 = inlined_call_operand.vmem [shape: f32[1,3], index: 2, kind: input, shape index: {}]   ;;  %s5727_s3 = inlined_call_operand.vmem [shape: bf16[32,64], index: 3, kind: input, shape index: {}]   ;;  %s5728_s4 = inlined_call_operand.vmem [shape: bf16[3,64], index: 4, kind: input, shape index: {}]   ;;  %s5729_s5 = inlined_call_operand.vmem [shape: f32[1,64], index: 5, kind: input, shape index: {}]   ;;  %s5730_s6 = inlined_call_operand.vmem [shape: bf16[64,6], index: 6, kind: input, shape index: {}]   ;;  %s5731_s7 = inlined_call_operand.vmem [shape: f32[1,6], index: 7, kind: input, shape index: {}]   ;;  %s5732_s8 = inlined_call_operand.vmem [shape: f32[2048,4], index: 8, kind: output, shape index: {}]  }
   0x1 LB: > { %s3275_s28 = sadd.s32 4294967295, %s3984_s27   ;;  %p3279_p0 = scmp.ge.s32.totalorder %s3984_s27, 1  ;;  %s3984_s27 = sphi %s4033_s27, %s18_s27  }
   0x2   : > { %p274_p1 = scmp.lt.s32.totalorder %s3984_s27, 5 }
   0x4   : > { %p275_p2 = pnand %p3279_p0, %p274_p1 }
   0x6   : > { %278 = sbr.rel (%p275_p2) target bundleno = 1608 (0x648), region = 52 }
   0xb   : > { %v567_v0 = vld [vmem:[%s5728_s4] sm:$0x3]  ;;  %vm665_vm0 = vcmask 1040384   ;;  %vm666_vm1 = vcmask 1041408   ;;  %s3280_s9 = sshll.u32 %s3275_s28, 6  ;;  %v398_v1 = vlaneseq  ;;  %v3986_v2 = vmov 65535  }
   0xc   : > { %v667_v3 = vsel %vm665_vm0, 4294967295, %v3986_v2  ;;  %p314_p3 = scmp.lt.s32.totalorder %s3280_s9, 255  ;;  %v4047_v5 = vld [vmem:[%s5726_s2] ss:$0 sm:$0xff]  ;;  %v3745_v8 = vld [vmem:[%s5727_s3 + $0x8] sm:$0xff]   ;;  %vm568_vm2 = vcmask 23552  }
   0xd   : > { %v668_v4 = vsel %vm666_vm1, %v667_v3, 0  ;;  %v4049_v6 = vshrl.u32 %v398_v1, 7  ;;  %v3746_v29 = vld [vmem:[%s5727_s3] sm:$0xff]   ;;  %vm1133_vm3 = vcmask 261120   ;;  %vm1725_vm4 = vcmask 523264   ;;  %s3987_s18 = smov 125  }
   0xe   : > { %v670_v7 = vand.u32 %v668_v4, %v567_v0  ;;  %s5940_s9 = smov (!%p314_p3, %s3280_s9), 255  ;;  %vm3142_vm5 = vcmask 31768  }
   0xf   : > { %5798 = vst [vmem:[#allocation2_spill] sm:$0xff] %v4049_v6  ;;  %s3281_s14 = sshll.u32 %s5940_s9, 3  ;;  %s3283_s20 = sshll.u32 %s5940_s9, 2 }
  0x10   : > { %3733 = vmatprep.subr.bf16.mxu1 %v670_v7  ;;  %3527 = vmatprep.subr.bf16.mxu0 %v670_v7  ;;  %s4063_s17 = scalar_lea.vmem %s5724_s0, %s3281_s14  ;;  %s4132_s23 = scalar_lea.vmem %s5725_s1, %s3283_s20 }
  0x11   : > { %3734 = vmatpush3.bf16.msra.mxu1 %v670_v7  ;;  %3528 = vmatpush3.bf16.msra.mxu0 %v670_v7  ;;  %v364_v10 = vld [vmem:[%s4063_s17 + $0x100] sm:$0xff]  ;;  %v365_v11 = vld [vmem:[%s4063_s17 + $0x108] sm:$0xff]  ;;  %v366_v12 = vld [vmem:[%s4063_s17 + $0x110] sm:$0xff] }
  0x12   : > { %3593 = vmatprep.subr.bf16.mxu1 %v3745_v8  ;;  %v4069_v13 = vmul.f32 %v4047_v5, %v364_v10  ;;  %v4072_v14 = vmul.f32 %v4047_v5, %v365_v11  ;;  %v367_v15 = vld [vmem:[%s4063_s17 + $0x118] sm:$0xff]  ;;  %v4076_v16 = vmul.f32 %v4047_v5, %v366_v12  ;;  %v368_v17 = vld [vmem:[%s4063_s17 + $0x120] sm:$0xff]  ;;  %v369_v18 = vld [vmem:[%s4063_s17 + $0x128] sm:$0xff] }
  0x13   : > { %v4081_v19 = vmul.f32 %v4047_v5, %v367_v15  ;;  %v4084_v20 = vmul.f32 %v4047_v5, %v368_v17  ;;  %v4087_v21 = vmul.f32 %v4047_v5, %v369_v18  ;;  %v370_v23 = vld [vmem:[%s4063_s17 + $0x130] sm:$0xff]  ;;  %v371_v24 = vld [vmem:[%s4063_s17 + $0x138] sm:$0xff]  ;;  %v372_v27 = vld [vmem:[%s4063_s17 + $0x140] sm:$0xff] }
  0x14   : > { %5799 = vst [vmem:[#allocation3_spill] sm:$0xff] %v4069_v13  ;;  %5800 = vst [vmem:[#allocation4_spill] sm:$0xff] %v4072_v14  ;;  %v551_v22 = vpack.c.bf16 %v4072_v14, %v4069_v13  ;;  %v373_v28 = vld [vmem:[%s4063_s17 + $0x148] sm:$0xff]  ;;  %v4105_v30 = vmul.f32 %v4047_v5, %v370_v23  ;;  %v4108_v31 = vmul.f32 %v4047_v5, %v371_v24  ;;  %v374_v34 = vld [vmem:[%s4063_s17 + $0x150] sm:$0xff] }
  0x15   : > { %5801 = vst [vmem:[#allocation5_spill] sm:$0xff] %v4076_v16  ;;  %5802 = vst [vmem:[#allocation6_spill] sm:$0xff] %v4081_v19  ;;  %v552_v25 = vpack.c.bf16 %v4081_v19, %v4076_v16  ;;  %v553_v26 = vpack.c.bf16 %v4087_v21, %v4084_v20  ;;  %v4112_v32 = vmul.f32 %v4047_v5, %v372_v27  ;;  %v375_v36 = vld [vmem:[%s4063_s17 + $0x158] sm:$0xff]  ;;  %v376_v37 = vld [vmem:[%s4063_s17 + $0x160] sm:$0xff] }
  0x16   : > { %5803 = vst [vmem:[#allocation7_spill] sm:$0xff] %v4084_v20  ;;  %5804 = vst [vmem:[#allocation8_spill] sm:$0xff] %v4087_v21  ;;  %3561 = vmatprep.mubr.msk.bf16.mxu1 %vm568_vm2, %v551_v22  ;;  %v4115_v33 = vmul.f32 %v4047_v5, %v373_v28  ;;  %v554_v35 = vpack.c.bf16 %v4108_v31, %v4105_v30  ;;  %v332_v38 = vld [vmem:[%s4063_s17] sm:$0xff]  ;;  %v333_v40 = vld [vmem:[%s4063_s17 + $0x8] sm:$0xff]  ;;  %v4146_v47 = vmul.f32 %v4047_v5, %v374_v34 }
  0x17   : > { %3562 = vmatmul.mubr.msk.bf16.vlgmr.msra.gmra.mxu1 %vm568_vm2, %v552_v25  ;;  %5805 = vst [vmem:[#allocation9_spill] sm:$0xff] %v4105_v30  ;;  %5806 = vst [vmem:[#allocation10_spill] sm:$0xff] %v4108_v31  ;;  %v334_v41 = vld [vmem:[%s4063_s17 + $0x10] sm:$0xff]  ;;  %v335_v42 = vld [vmem:[%s4063_s17 + $0x18] sm:$0xff]  ;;  %v4136_v44 = vmul.f32 %v4047_v5, %v332_v38  ;;  %v4139_v45 = vmul.f32 %v4047_v5, %v333_v40  ;;  %v4149_v48 = vmul.f32 %v4047_v5, %v375_v36 }
  0x18   : > { %3594 = vmatpush3.bf16.msra.mxu1 %v3745_v8  ;;  %3565 = vmatprep.mubr.msk.bf16.mxu1 %vm568_vm2, %v553_v26  ;;  %5807 = vst [vmem:[#allocation11_spill] sm:$0xff] %v4112_v32  ;;  %5808 = vst [vmem:[#allocation12_spill] sm:$0xff] %v4115_v33  ;;  %v555_v39 = vpack.c.bf16 %v4115_v33, %v4112_v32  ;;  %v377_v43 = vld [vmem:[%s4063_s17 + $0x168] sm:$0xff]  ;;  %v4142_v46 = vmul.f32 %v4047_v5, %v334_v41  ;;  %v336_v51 = vld [vmem:[%s4063_s17 + $0x20] sm:$0xff] }
  0x19   : > { %3595 = vmatprep.subr.bf16.mxu1 %v3746_v29  ;;  %5809 = vst [vmem:[#allocation13_spill] sm:$0xff] %v4136_v44  ;;  %5810 = vst [vmem:[#allocation14_spill] sm:$0xff] %v4139_v45  ;;  %v4152_v49 = vmul.f32 %v4047_v5, %v376_v37  ;;  %v4155_v50 = vmul.f32 %v4047_v5, %v335_v42  ;;  %v337_v52 = vld [vmem:[%s4063_s17 + $0x28] sm:$0xff]  ;;  %v4161_v53 = vmul.f32 %v4047_v5, %v377_v43  ;;  %v338_v57 = vld [vmem:[%s4063_s17 + $0x30] sm:$0xff] }
  0x1a   : > { %5811 = vst [vmem:[#allocation15_spill] sm:$0xff] %v4142_v46  ;;  %5812 = vst [vmem:[#allocation16_spill] sm:$0xff] %v4146_v47  ;;  %v535_v54 = vpack.c.bf16 %v4139_v45, %v4136_v44  ;;  %v4166_v55 = vmul.f32 %v4047_v5, %v336_v51  ;;  %v4169_v56 = vmul.f32 %v4047_v5, %v337_v52  ;;  %v339_v59 = vld [vmem:[%s4063_s17 + $0x38] sm:$0xff]  ;;  %v340_v61 = vld [vmem:[%s4063_s17 + $0x40] sm:$0xff] }
  0x1b   : > { %5813 = vst [vmem:[#allocation17_spill] sm:$0xff] %v4149_v48  ;;  %5814 = vst [vmem:[#allocation18_spill] sm:$0xff] %v4152_v49  ;;  %v536_v58 = vpack.c.bf16 %v4155_v50, %v4142_v46  ;;  %v341_v62 = vld [vmem:[%s4063_s17 + $0x48] sm:$0xff]  ;;  %v556_v63 = vpack.c.bf16 %v4149_v48, %v4146_v47  ;;  %v4184_v0 = vmul.f32 %v4047_v5, %v338_v57  ;;  %v378_v3 = vld [vmem:[%s4063_s17 + $0x170] sm:$0xff] }
  0x1c   : > { %3596 = vmatpush3.bf16.msra.mxu1 %v3746_v29  ;;  %5815 = vst [vmem:[#allocation19_spill] sm:$0xff] %v4155_v50  ;;  %5816 = vst [vmem:[#allocation20_spill] sm:$0xff] %v4161_v53  ;;  %3529 = vmatprep.mubr.msk.bf16.mxu0 %vm568_vm2, %v535_v54  ;;  %v537_v60 = vpack.c.bf16 %v4169_v56, %v4166_v55  ;;  %v4187_v1 = vmul.f32 %v4047_v5, %v339_v59  ;;  %v379_v4 = vld [vmem:[%s4063_s17 + $0x178] sm:$0xff]  ;;  %v380_v10 = vld [vmem:[%s4063_s17 + $0x180] sm:$0xff] }
  0x1d   : > { %5817 = vst [vmem:[#allocation21_spill] sm:$0xff] %v4166_v55  ;;  %5818 = vst [vmem:[#allocation22_spill] sm:$0xff] %v4169_v56  ;;  %3530 = vmatmul.mubr.msk.bf16.vlgmr.msra.gmra.mxu0 %vm568_vm2, %v536_v58  ;;  %v557_v2 = vpack.c.bf16 %v4161_v53, %v4152_v49  ;;  %v4195_v7 = vmul.f32 %v4047_v5, %v340_v61  ;;  %v4198_v8 = vmul.f32 %v4047_v5, %v341_v62  ;;  %v381_v11 = vld [vmem:[%s4063_s17 + $0x188] sm:$0xff]  ;;  %v342_v18 = vld [vmem:[%s4063_s17 + $0x50] sm:$0xff] }
  0x1e   : > { %5819 = vst [vmem:[#allocation23_spill] sm:$0xff] %v4184_v0  ;;  %5820 = vst [vmem:[#allocation24_spill] sm:$0xff] %v4187_v1  ;;  %3533 = vmatprep.mubr.msk.bf16.mxu0 %vm568_vm2, %v537_v60  ;;  %v4204_v12 = vmul.f32 %v4047_v5, %v378_v3  ;;  %v4207_v15 = vmul.f32 %v4047_v5, %v379_v4  ;;  %v538_v17 = vpack.c.bf16 %v4187_v1, %v4184_v0  ;;  %v343_v25 = vld [vmem:[%s4063_s17 + $0x58] sm:$0xff]  ;;  %v344_v26 = vld [vmem:[%s4063_s17 + $0x60] sm:$0xff] }
  0x1f   : > { %3566 = vmatmul.mubr.msk.bf16.gmra.mxu1 %vm568_vm2, %v554_v35  ;;  %5821 = vst [vmem:[#allocation25_spill] sm:$0xff] %v4195_v7  ;;  %5822 = vst [vmem:[#allocation26_spill] sm:$0xff] %v4198_v8  ;;  %v4214_v22 = vmul.f32 %v4047_v5, %v380_v10  ;;  %v4217_v23 = vmul.f32 %v4047_v5, %v381_v11  ;;  %v539_v24 = vpack.c.bf16 %v4198_v8, %v4195_v7  ;;  %v345_v27 = vld [vmem:[%s4063_s17 + $0x68] sm:$0xff]  ;;  %v382_v36 = vld [vmem:[%s4063_s17 + $0x190] sm:$0xff] }
  0x20   : > { %3569 = vmatprep.mubr.msk.bf16.mxu1 %vm568_vm2, %v555_v39  ;;  %5823 = vst [vmem:[#allocation27_spill] sm:$0xff] %v4204_v12  ;;  %5824 = vst [vmem:[#allocation28_spill] sm:$0xff] %v4207_v15  ;;  %v558_v28 = vpack.c.bf16 %v4207_v15, %v4204_v12  ;;  %v4228_v29 = vmul.f32 %v4047_v5, %v342_v18  ;;  %v4231_v34 = vmul.f32 %v4047_v5, %v343_v25  ;;  %v383_v37 = vld [vmem:[%s4063_s17 + $0x198] sm:$0xff]  ;;  %v384_v38 = vld [vmem:[%s4063_s17 + $0x1a0] sm:$0xff] }
  0x21   : > { %5825 = vst [vmem:[#allocation29_spill] sm:$0xff] %v4214_v22  ;;  %5826 = vst [vmem:[#allocation30_spill] sm:$0xff] %v4217_v23  ;;  %v559_v35 = vpack.c.bf16 %v4217_v23, %v4214_v22  ;;  %v4240_v39 = vmul.f32 %v4047_v5, %v344_v26  ;;  %v4243_v40 = vmul.f32 %v4047_v5, %v345_v27  ;;  %v385_v41 = vld [vmem:[%s4063_s17 + $0x1a8] sm:$0xff]  ;;  %v346_v52 = vld [vmem:[%s4063_s17 + $0x70] sm:$0xff] }
  0x22   : > { %5827 = vst [vmem:[#allocation31_spill] sm:$0xff] %v4228_v29  ;;  %5828 = vst [vmem:[#allocation32_spill] sm:$0xff] %v4231_v34  ;;  %v4248_v42 = vmul.f32 %v4047_v5, %v382_v36  ;;  %v4251_v43 = vmul.f32 %v4047_v5, %v383_v37  ;;  %v540_v51 = vpack.c.bf16 %v4231_v34, %v4228_v29  ;;  %v347_v59 = vld [vmem:[%s4063_s17 + $0x78] sm:$0xff]  ;;  %v348_v60 = vld [vmem:[%s4063_s17 + $0x80] sm:$0xff] }
  0x23   : > { %5829 = vst [vmem:[#allocation33_spill] sm:$0xff] %v4240_v39  ;;  %5830 = vst [vmem:[#allocation34_spill] sm:$0xff] %v4243_v40  ;;  %v4258_v54 = vmul.f32 %v4047_v5, %v384_v38  ;;  %v4261_v57 = vmul.f32 %v4047_v5, %v385_v41  ;;  %v541_v58 = vpack.c.bf16 %v4243_v40, %v4240_v39  ;;  %v349_v61 = vld [vmem:[%s4063_s17 + $0x88] sm:$0xff]  ;;  %v387_v10 = vld [vmem:[%s4063_s17 + $0x1b8] sm:$0xff] }
  0x24   : > { %5831 = vst [vmem:[#allocation35_spill] sm:$0xff] %v4248_v42  ;;  %5832 = vst [vmem:[#allocation36_spill] sm:$0xff] %v4251_v43  ;;  %v560_v62 = vpack.c.bf16 %v4251_v43, %v4248_v42  ;;  %v4276_v3 = vmul.f32 %v4047_v5, %v347_v59  ;;  %v388_v11 = vld [vmem:[%s4063_s17 + $0x1c0] sm:$0xff]  ;;  %v4287_v18 = vmul.f32 %v4047_v5, %v349_v61  ;;  %v350_v25 = vld [vmem:[%s4063_s17 + $0x90] sm:$0xff] }
  0x25   : > { %3534 = vmatmul.mubr.msk.bf16.gmra.mxu0 %vm568_vm2, %v538_v17  ;;  %5833 = vst [vmem:[#allocation37_spill] sm:$0xff] %v4258_v54  ;;  %5834 = vst [vmem:[#allocation38_spill] sm:$0xff] %v4261_v57  ;;  %v561_v4 = vpack.c.bf16 %v4261_v57, %v4258_v54  ;;  %v4284_v17 = vmul.f32 %v4047_v5, %v348_v60  ;;  %v4296_v27 = vmul.f32 %v4047_v5, %v387_v10  ;;  %v352_v41 = vld [vmem:[%s4063_s17 + $0xa0] sm:$0xff]  ;;  %v391_v59 = vld [vmem:[%s4063_s17 + $0x1d8] sm:$0xff] }
  0x26   : > { %3537 = vmatprep.mubr.msk.bf16.mxu0 %vm568_vm2, %v539_v24  ;;  %5836 = vst [vmem:[#allocation40_spill] sm:$0xff] %v4276_v3  ;;  %5838 = vst [vmem:[#allocation42_spill] sm:$0xff] %v4287_v18  ;;  %v389_v24 = vld [vmem:[%s4063_s17 + $0x1c8] sm:$0xff]  ;;  %v4303_v36 = vmul.f32 %v4047_v5, %v388_v11  ;;  %v4318_v60 = vmul.f32 %v4047_v5, %v350_v25  ;;  %v4589_v55 = vld [vmem:[%s5729_s5] ss:$0 sm:$0xff] }
  0x27   : > { %3570 = vmatmul.mubr.msk.bf16.gmra.mxu1 %vm568_vm2, %v556_v63  ;;  %v386_v63 = vld [vmem:[%s4063_s17 + $0x1b0] sm:$0xff]  ;;  %5837 = vst [vmem:[#allocation41_spill] sm:$0xff] %v4284_v17  ;;  %5840 = vst [vmem:[#allocation44_spill] sm:$0xff] %v4296_v27  ;;  %v4306_v37 = vmul.f32 %v4047_v5, %v389_v24  ;;  %v543_v38 = vpack.c.bf16 %v4287_v18, %v4284_v17  ;;  %v393_v11 = vld [vmem:[%s4063_s17 + $0x1e8] sm:$0xff] }
  0x28   : > { %3573 = vmatprep.mubr.msk.bf16.mxu1 %vm568_vm2, %v557_v2  ;;  %v4273_v2 = vmul.f32 %v4047_v5, %v346_v52  ;;  %v4293_v26 = vmul.f32 %v4047_v5, %v386_v63  ;;  %5841 = vst [vmem:[#allocation45_spill] sm:$0xff] %v4303_v36  ;;  %v390_v52 = vld [vmem:[%s4063_s17 + $0x1d0] sm:$0xff]  ;;  %5843 = vst [vmem:[#allocation47_spill] sm:$0xff] %v4318_v60  ;;  %v392_v63 = vld [vmem:[%s4063_s17 + $0x1e0] sm:$0xff] }
  0x29   : > { %5842 = vst [vmem:[#allocation46_spill] sm:$0xff] %v4306_v37  ;;  %v354_v24 = vld [vmem:[%s4063_s17 + $0xb0] sm:$0xff]  ;;  %v4337_v25 = vmul.f32 %v4047_v5, %v390_v52  ;;  %v357_v9 = vld [vmem:[%s4063_s17 + $0xc8] sm:$0xff] }
  0x2a   : > { %5835 = vst [vmem:[#allocation39_spill] sm:$0xff] %v4273_v2  ;;  %5839 = vst [vmem:[#allocation43_spill] sm:$0xff] %v4293_v26 }
  0x2b   : > { %5847 = vst [vmem:[#allocation51_spill] sm:$0xff] %v4337_v25 }
  0x2d   : > { %3538 = vmatmul.mubr.msk.bf16.gmra.mxu0 %vm568_vm2, %v540_v51  ;;  %v353_v51 = vld [vmem:[%s4063_s17 + $0xa8] sm:$0xff] }
  0x2e   : > { %3541 = vmatprep.mubr.msk.bf16.mxu0 %vm568_vm2, %v541_v58  ;;  %v562_v58 = vpack.c.bf16 %v4296_v27, %v4293_v26  ;;  %v4331_v10 = vmul.f32 %v4047_v5, %v353_v51  ;;  %v4350_v51 = vmul.f32 %v4047_v5, %v393_v11 }
  0x2f   : > { %3574 = vmatmul.mubr.msk.bf16.gmra.mxu1 %vm568_vm2, %v558_v28  ;;  %v542_v28 = vpack.c.bf16 %v4276_v3, %v4273_v2 }
  0x30   : > { %3577 = vmatprep.mubr.msk.bf16.mxu1 %vm568_vm2, %v559_v35  ;;  %v351_v35 = vld [vmem:[%s4063_s17 + $0x98] sm:$0xff]  ;;  %5846 = vst [vmem:[#allocation50_spill] sm:$0xff] %v4331_v10  ;;  %5850 = vst [vmem:[#allocation54_spill] sm:$0xff] %v4350_v51 }
  0x31   : > { %v4321_v61 = vmul.f32 %v4047_v5, %v351_v35 }
  0x33   : > { %5844 = vst [vmem:[#allocation48_spill] sm:$0xff] %v4321_v61  ;;  %v544_v35 = vpack.c.bf16 %v4321_v61, %v4318_v60 }
  0x35   : > { %3542 = vmatmul.mubr.msk.bf16.gmra.mxu0 %vm568_vm2, %v542_v28  ;;  %v4340_v28 = vmul.f32 %v4047_v5, %v391_v59 }
  0x36   : > { %3545 = vmatprep.mubr.msk.bf16.mxu0 %vm568_vm2, %v543_v38  ;;  %v355_v38 = vld [vmem:[%s4063_s17 + $0xb8] sm:$0xff] }
  0x37   : > { %3578 = vmatmul.mubr.msk.bf16.gmra.mxu1 %vm568_vm2, %v560_v62  ;;  %v563_v62 = vpack.c.bf16 %v4306_v37, %v4303_v36  ;;  %5848 = vst [vmem:[#allocation52_spill] sm:$0xff] %v4340_v28  ;;  %v564_v59 = vpack.c.bf16 %v4340_v28, %v4337_v25  ;;  %v394_v36 = vld [vmem:[%s4063_s17 + $0x1f0] sm:$0xff]  ;;  %v395_v37 = vld [vmem:[%s4063_s17 + $0x1f8] sm:$0xff]  ;;  %v3747_v28 = vld [vmem:[%s4132_s23] sm:$0xff]  }
  0x38   : > { %3581 = vmatprep.mubr.msk.bf16.mxu1 %vm568_vm2, %v561_v4  ;;  %v4328_v4 = vmul.f32 %v4047_v5, %v352_v41  ;;  %v4347_v41 = vmul.f32 %v4047_v5, %v392_v63  ;;  %v4364_v63 = vmul.f32 %v4047_v5, %v355_v38  ;;  %v4381_v38 = vmul.f32 %v4047_v5, %v395_v37 }
  0x3a   : > { %5845 = vst [vmem:[#allocation49_spill] sm:$0xff] %v4328_v4  ;;  %5849 = vst [vmem:[#allocation53_spill] sm:$0xff] %v4347_v41  ;;  %v545_v52 = vpack.c.bf16 %v4331_v10, %v4328_v4  ;;  %v565_v11 = vpack.c.bf16 %v4350_v51, %v4347_v41  ;;  %v359_v51 = vld [vmem:[%s4063_s17 + $0xd8] sm:$0xff] }
  0x3b   : > { %5852 = vst [vmem:[#allocation56_spill] sm:$0xff] %v4364_v63  ;;  %5856 = vst [vmem:[#allocation60_spill] sm:$0xff] %v4381_v38 }
  0x3d   : > { %3546 = vmatmul.mubr.msk.bf16.gmra.mxu0 %vm568_vm2, %v544_v35  ;;  %v4374_v35 = vmul.f32 %v4047_v5, %v357_v9  ;;  %v360_v9 = vld [vmem:[%s4063_s17 + $0xe0] sm:$0xff] }
  0x3e   : > { %3549 = vmatprep.mubr.msk.bf16.mxu0 %vm568_vm2, %v545_v52  ;;  %v4404_v54 = vmul.f32 %v4047_v5, %v360_v9  ;;  %v3748_v9 = vld [vmem:[%s4132_s23 + $0x8] sm:$0xff]  }
  0x3f   : > { %3582 = vmatmul.mubr.msk.bf16.gmra.mxu1 %vm568_vm2, %v562_v58  ;;  %v356_v58 = vld [vmem:[%s4063_s17 + $0xc0] sm:$0xff]  ;;  %5854 = vst [vmem:[#allocation58_spill] sm:$0xff] %v4374_v35 }
  0x40   : > { %3585 = vmatprep.mubr.msk.bf16.mxu1 %vm568_vm2, %v563_v62  ;;  %v4361_v62 = vmul.f32 %v4047_v5, %v354_v24  ;;  %v4371_v25 = vmul.f32 %v4047_v5, %v356_v58  ;;  %v4378_v24 = vmul.f32 %v4047_v5, %v394_v36  ;;  %v358_v58 = vld [vmem:[%s4063_s17 + $0xd0] sm:$0xff]  ;;  %5859 = vst [vmem:[#allocation63_spill] sm:$0xff] %v4404_v54 }
  0x41   : > { %v4396_v37 = vmul.f32 %v4047_v5, %v358_v58  ;;  %v363_v58 = vld [vmem:[%s4063_s17 + $0xf8] sm:$0xff] }
  0x42   : > { %5851 = vst [vmem:[#allocation55_spill] sm:$0xff] %v4361_v62  ;;  %5853 = vst [vmem:[#allocation57_spill] sm:$0xff] %v4371_v25  ;;  %v546_v41 = vpack.c.bf16 %v4364_v63, %v4361_v62  ;;  %v547_v52 = vpack.c.bf16 %v4374_v35, %v4371_v25  ;;  %v566_v36 = vpack.c.bf16 %v4381_v38, %v4378_v24  ;;  %v3750_v38 = vld [vmem:[%s4132_s23 + $0x18] sm:$0xff]  }
  0x43   : > { %5855 = vst [vmem:[#allocation59_spill] sm:$0xff] %v4378_v24  ;;  %5857 = vst [vmem:[#allocation61_spill] sm:$0xff] %v4396_v37  ;;  %v3749_v24 = vld [vmem:[%s4132_s23 + $0x10] sm:$0xff]  }
  0x45   : > { %3550 = vmatmul.mubr.msk.bf16.gmra.mxu0 %vm568_vm2, %v546_v41 }
  0x46   : > { %3553 = vmatprep.mubr.msk.bf16.mxu0 %vm568_vm2, %v547_v52  ;;  %v362_v52 = vld [vmem:[%s4063_s17 + $0xf0] sm:$0xff] }
  0x47   : > { %3586 = vmatmul.mubr.msk.bf16.gmra.mxu1 %vm568_vm2, %v564_v59  ;;  %v361_v59 = vld [vmem:[%s4063_s17 + $0xe8] sm:$0xff] }
  0x48   : > { %3589 = vmatprep.mubr.msk.bf16.mxu1 %vm568_vm2, %v565_v11  ;;  %v4399_v11 = vmul.f32 %v4047_v5, %v359_v51  ;;  %v4407_v26 = vmul.f32 %v4047_v5, %v361_v59  ;;  %v4420_v59 = vmul.f32 %v4047_v5, %v362_v52  ;;  %v3779_v52 = vld [vmem:[%s5730_s6 + $0x18] sm:$0xff]  }
  0x49   : > { %3661 = vmatprep.subr.bf16.mxu0 %v3779_v52 }
  0x4a   : > { %5858 = vst [vmem:[#allocation62_spill] sm:$0xff] %v4399_v11  ;;  %5860 = vst [vmem:[#allocation64_spill] sm:$0xff] %v4407_v26  ;;  %v548_v41 = vpack.c.bf16 %v4399_v11, %v4396_v37  ;;  %v549_v51 = vpack.c.bf16 %v4407_v26, %v4404_v54  ;;  %3662 = vmatpush3.bf16.msra.mxu0 %v3779_v52  ;;  %v3761_v52 = vld [vmem:[%s4132_s23 + $0x70] sm:$0xff]  }
  0x4b   : > { %5861 = vst [vmem:[#allocation65_spill] sm:$0xff] %v4420_v59 }
  0x4d   : > { %3554 = vmatmul.mubr.msk.bf16.gmra.mxu0 %vm568_vm2, %v548_v41  ;;  %v3751_v41 = vld [vmem:[%s4132_s23 + $0x20] sm:$0xff]  }
  0x4e   : > { %3557 = vmatprep.mubr.msk.bf16.mxu0 %vm568_vm2, %v549_v51  ;;  %v3753_v51 = vld [vmem:[%s4132_s23 + $0x30] sm:$0xff]  }
  0x4f   : > { %3590 = vmatmul.mubr.msk.bf16.gmra.mxu1 %vm568_vm2, %v566_v36  ;;  %v4423_v36 = vmul.f32 %v4047_v5, %v363_v58  ;;  %v3752_v5 = vld [vmem:[%s4132_s23 + $0x28] sm:$0xff]  }
  0x50   : > { %3597 = vmatprep.mubr.msk.bf16.mxu1 %vm1133_vm3, %v3747_v28  ;;  %v3756_v58 = vld [vmem:[%s4132_s23 + $0x48] sm:$0xff]  }
  0x51   : > { %5862 = vst [vmem:[#allocation66_spill] sm:$0xff] %v4423_v36  ;;  %v550_v28 = vpack.c.bf16 %v4423_v36, %v4420_v59 }
  0x55   : > { %3558 = vmatmul.mubr.msk.bf16.gmra.mxu0 %vm568_vm2, %v550_v28  ;;  %v3780_v28 = vld [vmem:[%s5730_s6 + $0x10] sm:$0xff]  }
  0x56   : > { %3663 = vmatprep.subr.bf16.mxu0 %v3780_v28 }
  0x57   : > { %3598 = vmatmul.mubr.msk.bf16.vlgmr.msra.gmra.mxu1 %vm1133_vm3, %v3748_v9  ;;  %v3757_v9 = vld [vmem:[%s4132_s23 + $0x50] sm:$0xff]   ;;  %3664 = vmatpush3.bf16.msra.mxu0 %v3780_v28 }
  0x58   : > { %3601 = vmatprep.mubr.msk.bf16.mxu1 %vm1133_vm3, %v3749_v24  ;;  %v3754_v24 = vld [vmem:[%s4132_s23 + $0x38] sm:$0xff]   ;;  %v3765_v28 = vld [vmem:[%s4132_s23 + $0x90] sm:$0xff]  }
  0x5f   : > { %3602 = vmatmul.mubr.msk.bf16.gmra.mxu1 %vm1133_vm3, %v3750_v38  ;;  %v3755_v38 = vld [vmem:[%s4132_s23 + $0x40] sm:$0xff]  }
  0x60   : > { %3605 = vmatprep.mubr.msk.bf16.mxu1 %vm1133_vm3, %v3751_v41  ;;  %v3758_v41 = vld [vmem:[%s4132_s23 + $0x58] sm:$0xff]  }
  0x67   : > { %3606 = vmatmul.mubr.msk.bf16.gmra.mxu1 %vm1133_vm3, %v3752_v5  ;;  %v3759_v5 = vld [vmem:[%s4132_s23 + $0x60] sm:$0xff]  }
  0x68   : > { %3609 = vmatprep.mubr.msk.bf16.mxu1 %vm1133_vm3, %v3753_v51  ;;  %v3760_v51 = vld [vmem:[%s4132_s23 + $0x68] sm:$0xff]  }
  0x6f   : > { %3610 = vmatmul.mubr.msk.bf16.gmra.mxu1 %vm1133_vm3, %v3754_v24  ;;  %v3781_v24 = vld [vmem:[%s5730_s6 + $0x8] sm:$0xff]  }
  0x70   : > { %3613 = vmatprep.mubr.msk.bf16.mxu1 %vm1133_vm3, %v3755_v38  ;;  %3665 = vmatprep.subr.bf16.mxu0 %v3781_v24  ;;  %v3762_v38 = vld [vmem:[%s4132_s23 + $0x78] sm:$0xff]  }
  0x71   : > { %3666 = vmatpush3.bf16.msra.mxu0 %v3781_v24  ;;  %v3769_v24 = vld [vmem:[%s4132_s23 + $0xb0] sm:$0xff]  }
  0x77   : > { %3614 = vmatmul.mubr.msk.bf16.gmra.mxu1 %vm1133_vm3, %v3756_v58  ;;  %v3763_v58 = vld [vmem:[%s4132_s23 + $0x80] sm:$0xff]  }
  0x78   : > { %3617 = vmatprep.mubr.msk.bf16.mxu1 %vm1133_vm3, %v3757_v9  ;;  %v3764_v9 = vld [vmem:[%s4132_s23 + $0x88] sm:$0xff]  }
  0x7f   : > { %3618 = vmatmul.mubr.msk.bf16.gmra.mxu1 %vm1133_vm3, %v3758_v41  ;;  %v3782_v41 = vld [vmem:[%s5730_s6] sm:$0xff]  }
  0x80   : > { %3621 = vmatprep.mubr.msk.bf16.mxu1 %vm1133_vm3, %v3759_v5  ;;  %3667 = vmatprep.subr.bf16.mxu0 %v3782_v41  ;;  %v3766_v5 = vld [vmem:[%s4132_s23 + $0x98] sm:$0xff]  }
  0x81   : > { %3668 = vmatpush3.bf16.msra.mxu0 %v3782_v41  ;;  %v3774_v41 = vld [vmem:[%s4132_s23 + $0xd8] sm:$0xff]  }
  0x87   : > { %3622 = vmatmul.mubr.msk.bf16.gmra.mxu1 %vm1133_vm3, %v3760_v51  ;;  %v3767_v51 = vld [vmem:[%s4132_s23 + $0xa0] sm:$0xff]  }
  0x88   : > { %3625 = vmatprep.mubr.msk.bf16.mxu1 %vm1133_vm3, %v3761_v52  ;;  %v3768_v52 = vld [vmem:[%s4132_s23 + $0xa8] sm:$0xff]  }
  0x8f   : > { %3626 = vmatmul.mubr.msk.bf16.gmra.mxu1 %vm1133_vm3, %v3762_v38  ;;  %v3770_v38 = vld [vmem:[%s4132_s23 + $0xb8] sm:$0xff]  }
  0x90   : > { %3629 = vmatprep.mubr.msk.bf16.mxu1 %vm1133_vm3, %v3763_v58  ;;  %v3771_v58 = vld [vmem:[%s4132_s23 + $0xc0] sm:$0xff]  }
  0x97   : > { %3630 = vmatmul.mubr.msk.bf16.gmra.mxu1 %vm1133_vm3, %v3764_v9  ;;  %v3772_v9 = vld [vmem:[%s4132_s23 + $0xc8] sm:$0xff]  }
  0x98   : > { %3633 = vmatprep.mubr.msk.bf16.mxu1 %vm1133_vm3, %v3765_v28  ;;  %v3773_v28 = vld [vmem:[%s4132_s23 + $0xd0] sm:$0xff]  }
  0x9f   : > { %3634 = vmatmul.mubr.msk.bf16.gmra.mxu1 %vm1133_vm3, %v3766_v5  ;;  %v3775_v5 = vld [vmem:[%s4132_s23 + $0xe0] sm:$0xff]  }
  0xa0   : > { %3637 = vmatprep.mubr.msk.bf16.mxu1 %vm1133_vm3, %v3767_v51  ;;  %v3776_v51 = vld [vmem:[%s4132_s23 + $0xe8] sm:$0xff]  }
  0xa7   : > { %3638 = vmatmul.mubr.msk.bf16.gmra.mxu1 %vm1133_vm3, %v3768_v52  ;;  %v3777_v52 = vld [vmem:[%s4132_s23 + $0xf0] sm:$0xff]  }
  0xa8   : > { %3641 = vmatprep.mubr.msk.bf16.mxu1 %vm1133_vm3, %v3769_v24  ;;  %v3778_v24 = vld [vmem:[%s4132_s23 + $0xf8] sm:$0xff]   ;;  %s4814_s23 = scalar_lea.vmem %s5732_s8, %s3281_s14 }
  0xaf   : > { %3642 = vmatmul.mubr.msk.bf16.gmra.mxu1 %vm1133_vm3, %v3770_v38 }
  0xb0   : > { %3645 = vmatprep.mubr.msk.bf16.mxu1 %vm1133_vm3, %v3771_v58 }
  0xb7   : > { %3646 = vmatmul.mubr.msk.bf16.gmra.mxu1 %vm1133_vm3, %v3772_v9 }
  0xb8   : > { %3649 = vmatprep.mubr.msk.bf16.mxu1 %vm1133_vm3, %v3773_v28 }
  0xbf   : > { %3650 = vmatmul.mubr.msk.bf16.gmra.mxu1 %vm1133_vm3, %v3774_v41 }
  0xc0   : > { %3653 = vmatprep.mubr.msk.bf16.mxu1 %vm1133_vm3, %v3775_v5 }
  0xc7   : > { %3654 = vmatmul.mubr.msk.bf16.gmra.mxu1 %vm1133_vm3, %v3776_v51 }
  0xc8   : > { %3657 = vmatprep.mubr.msk.bf16.mxu1 %vm1133_vm3, %v3777_v52 }
  0xcf   : > { %3658 = vmatmul.mubr.msk.bf16.gmra.mxu1 %vm1133_vm3, %v3778_v24 }
  0xd7   : > { %v4502_v38 = vpop.f32.mrf.mxu1 }
  0xd9   : > { %v4504_v58 = vpop.f32.mrf.mxu1 }
  0xdb   : > { %v4506_v9 = vpop.f32.mrf.mxu1 }
  0xdd   : > { %v4508_v28 = vpop.f32.mrf.mxu1  ;;  %v3531_v51 = vpop.f32.mrf.mxu0 }
  0xdf   : > { %v4510_v41 = vpop.f32.mrf.mxu1  ;;  %v706_v52 = vpop.f32.mrf.mxu0 }
  0xe1   : > { %v4512_v5 = vpop.f32.mrf.mxu1  ;;  %v3532_v24 = vpop.f32.mrf.mxu0 }
  0xe3   : > { %v4514_v57 = vpop.f32.mrf.mxu1  ;;  %v709_v23 = vpop.f32.mrf.mxu0 }
  0xe5   : > { %v4516_v27 = vpop.f32.mrf.mxu1  ;;  %v3535_v49 = vpop.f32.mrf.mxu0 }
  0xe7   : > { %v4518_v22 = vpop.f32.mrf.mxu1  ;;  %v722_v53 = vpop.f32.mrf.mxu0 }
  0xe9   : > { %v4520_v42 = vpop.f32.mrf.mxu1  ;;  %v3536_v32 = vpop.f32.mrf.mxu0 }
  0xeb   : > { %v4522_v43 = vpop.f32.mrf.mxu1  ;;  %v725_v48 = vpop.f32.mrf.mxu0 }
  0xed   : > { %v4524_v12 = vpop.f32.mrf.mxu1  ;;  %v4536_v21 = vpop.f32.mrf.mxu0 }
  0xef   : > { %v4526_v15 = vpop.f32.mrf.mxu1  ;;  %v4542_v16 = vpop.f32.mrf.mxu0 }
  0xf1   : > { %v4528_v47 = vpop.f32.mrf.mxu1  ;;  %v4548_v54 = vpop.f32.mrf.mxu0 }
  0xf3   : > { %v4530_v33 = vpop.f32.mrf.mxu1  ;;  %v4554_v36 = vpop.f32.mrf.mxu0 }
  0xf5   : > { %v4532_v20 = vpop.f32.mrf.mxu1  ;;  %v4560_v35 = vpop.f32.mrf.mxu0 }
  0xf7   : > { %v4534_v30 = vpop.f32.mrf.mxu1  ;;  %v4566_v62 = vpop.f32.mrf.mxu0 }
  0xf9   : > { %v4538_v31 = vpop.f32.mrf.mxu1  ;;  %v4572_v17 = vpop.f32.mrf.mxu0 }
  0xfb   : > { %v4540_v13 = vpop.f32.mrf.mxu1  ;;  %v4578_v61 = vpop.f32.mrf.mxu0 }
  0xfd   : > { %v4544_v14 = vpop.f32.mrf.mxu1  ;;  %v4582_v40 = vpop.f32.mrf.mxu0 }
  0xff   : > { %v4546_v19 = vpop.f32.mrf.mxu1  ;;  %v4584_v34 = vpop.f32.mrf.mxu0 }
 0x101   : > { %v4550_v59 = vpop.f32.mrf.mxu1 }
 0x103   : > { %v4552_v26 = vpop.f32.mrf.mxu1 }
 0x105   : > { %v4556_v25 = vpop.f32.mrf.mxu1 }
 0x107   : > { %v4558_v37 = vpop.f32.mrf.mxu1 }
 0x109   : > { %v4562_v11 = vpop.f32.mrf.mxu1 }
 0x10b   : > { %v4564_v4 = vpop.f32.mrf.mxu1 }
 0x10d   : > { %v4568_v10 = vpop.f32.mrf.mxu1 }
 0x10e   : > { %5863 = vst [vmem:[#allocation67_spill] sm:$0xff] %v4568_v10 }
 0x10f   : > { %v4570_v63 = vpop.f32.mrf.mxu1 }
 0x110   : > { %5864 = vst [vmem:[#allocation68_spill] sm:$0xff] %v4570_v63 }
 0x111   : > { %v4574_v60 = vpop.f32.mrf.mxu1 }
 0x112   : > { %5865 = vst [vmem:[#allocation69_spill] sm:$0xff] %v4574_v60 }
 0x113   : > { %v4576_v18 = vpop.f32.mrf.mxu1 }
 0x114   : > { %5866 = vst [vmem:[#allocation70_spill] sm:$0xff] %v4576_v18 }
 0x115   : > { %v4580_v39 = vpop.f32.mrf.mxu1 }
 0x116   : > { %5867 = vst [vmem:[#allocation71_spill] sm:$0xff] %v4580_v39 }
 0x117   : > { %v3599_v2 = vpop.f32.mrf.mxu1 }
 0x118   : > { %v1273_v29 = vadd.f32 %v3599_v2, %v3531_v51 }
 0x119   : > { %v1264_v3 = vpop.f32.mrf.mxu1 }
 0x11a   : > { %v1265_v7 = vadd.f32 %v1264_v3, %v706_v52  ;;  %v1528_v50 = vadd.f32 %v4589_v55, %v1273_v29  ;;  %v4594_v3 = vpop.f32.mrf.mxu0 }
 0x11b   : > { %v3600_v8 = vpop.f32.mrf.mxu1 }
 0x11c   : > { %v1276_v0 = vadd.f32 %v3600_v8, %v3532_v24  ;;  %v1526_v56 = vadd.f32 %v4589_v55, %v1265_v7  ;;  %v1592_v8 = vmax.f32 %v1528_v50, 0.0 }
 0x11d   : > { %v1267_v45 = vpop.f32.mrf.mxu1 }
 0x11e   : > { %v1529_v1 = vadd.f32 %v4589_v55, %v1276_v0  ;;  %v1268_v44 = vadd.f32 %v1267_v45, %v709_v23  ;;  %v1590_v39 = vmax.f32 %v1526_v56, 0.0  ;;  %v4598_v0 = vpop.f32.mrf.mxu0 }
 0x11f   : > { %v3603_v46 = vpop.f32.mrf.mxu1 }
 0x120   : > { %v1527_v2 = vadd.f32 %v4589_v55, %v1268_v44  ;;  %v1289_v51 = vadd.f32 %v3603_v46, %v3535_v49  ;;  %v1593_v52 = vmax.f32 %v1529_v1, 0.0  ;;  %v4604_v50 = vpop.f32.mrf.mxu0 }
 0x121   : > { %v1280_v6 = vpop.f32.mrf.mxu1 }
 0x122   : > { %v1591_v18 = vmax.f32 %v1527_v2, 0.0  ;;  %v1281_v63 = vadd.f32 %v1280_v6, %v722_v53  ;;  %v1532_v24 = vadd.f32 %v4589_v55, %v1289_v51  ;;  %v1655_v60 = vpack.c.bf16 %v1593_v52, %v1592_v8  ;;  %v786_v51 = vpop.f32.mrf.mxu0 }
 0x123   : > { %v3604_v7 = vpop.f32.mrf.mxu1 }
 0x124   : > { %v1654_v45 = vpack.c.bf16 %v1591_v18, %v1590_v39  ;;  %v1530_v23 = vadd.f32 %v4589_v55, %v1281_v63  ;;  %v1292_v29 = vadd.f32 %v3604_v7, %v3536_v32  ;;  %v1596_v49 = vmax.f32 %v1532_v24, 0.0 }
 0x125   : > { %v1283_v10 = vpop.f32.mrf.mxu1 }
 0x126   : > { %v1533_v44 = vadd.f32 %v4589_v55, %v1292_v29  ;;  %v1284_v46 = vadd.f32 %v1283_v10, %v725_v48  ;;  %3669 = vmatprep.mubr.msk.bf16.mxu0 %vm1725_vm4, %v1654_v45  ;;  %v1594_v53 = vmax.f32 %v1530_v23, 0.0 }
 0x127   : > { %v3607_v6 = vpop.f32.mrf.mxu1  ;;  %3670 = vmatmul.mubr.msk.bf16.vlgmr.msra.gmra.mxu0 %vm1725_vm4, %v1655_v60 }
 0x128   : > { %v1597_v56 = vmax.f32 %v1533_v44, 0.0  ;;  %v1531_v1 = vadd.f32 %v4589_v55, %v1284_v46  ;;  %v1305_v39 = vadd.f32 %v3607_v6, %v4536_v21 }
 0x129   : > { %v1296_v32 = vpop.f32.mrf.mxu1 }
 0x12a   : > { %v1595_v18 = vmax.f32 %v1531_v1, 0.0  ;;  %v1297_v63 = vadd.f32 %v1296_v32, %v4542_v16  ;;  %v1657_v2 = vpack.c.bf16 %v1597_v56, %v1596_v49  ;;  %v1536_v48 = vadd.f32 %v4589_v55, %v1305_v39  ;;  %v3552_v16 = vpop.f32.mrf.mxu0 }
 0x12b   : > { %v3608_v10 = vpop.f32.mrf.mxu1 }
 0x12c   : > { %v1656_v52 = vpack.c.bf16 %v1595_v18, %v1594_v53  ;;  %v1534_v60 = vadd.f32 %v4589_v55, %v1297_v63  ;;  %v1308_v8 = vadd.f32 %v3608_v10, %v4548_v54  ;;  %v1600_v21 = vmax.f32 %v1536_v48, 0.0  ;;  %v789_v39 = vpop.f32.mrf.mxu0 }
 0x12d   : > { %v1299_v24 = vpop.f32.mrf.mxu1 }
 0x12e   : > { %v1537_v7 = vadd.f32 %v4589_v55, %v1308_v8  ;;  %v1300_v45 = vadd.f32 %v1299_v24, %v4554_v36  ;;  %3673 = vmatprep.mubr.msk.bf16.mxu0 %vm1725_vm4, %v1656_v52  ;;  %v1598_v29 = vmax.f32 %v1534_v60, 0.0 }
 0x12f   : > { %v3611_v23 = vpop.f32.mrf.mxu1  ;;  %3674 = vmatmul.mubr.msk.bf16.gmra.mxu0 %vm1725_vm4, %v1657_v2 }
 0x130   : > { %v1601_v44 = vmax.f32 %v1537_v7, 0.0  ;;  %v1535_v46 = vadd.f32 %v4589_v55, %v1300_v45  ;;  %v1321_v49 = vadd.f32 %v3611_v23, %v4560_v35 }
 0x131   : > { %v1312_v6 = vpop.f32.mrf.mxu1 }
 0x132   : > { %v1599_v54 = vmax.f32 %v1535_v46, 0.0  ;;  %v1313_v53 = vadd.f32 %v1312_v6, %v4566_v62  ;;  %v1659_v56 = vpack.c.bf16 %v1601_v44, %v1600_v21  ;;  %v1540_v36 = vadd.f32 %v4589_v55, %v1321_v49  ;;  %v3555_v62 = vpop.f32.mrf.mxu0 }
 0x133   : > { %v3612_v1 = vpop.f32.mrf.mxu1 }
 0x134   : > { %v1658_v32 = vpack.c.bf16 %v1599_v54, %v1598_v29  ;;  %v1538_v18 = vadd.f32 %v4589_v55, %v1313_v53  ;;  %v1324_v63 = vadd.f32 %v3612_v1, %v4572_v17  ;;  %v1604_v35 = vmax.f32 %v1540_v36, 0.0  ;;  %v802_v44 = vpop.f32.mrf.mxu0 }
 0x135   : > { %v1315_v2 = vpop.f32.mrf.mxu1 }
 0x136   : > { %v1541_v48 = vadd.f32 %v4589_v55, %v1324_v63  ;;  %v1316_v10 = vadd.f32 %v1315_v2, %v4578_v61  ;;  %3677 = vmatprep.mubr.msk.bf16.mxu0 %vm1725_vm4, %v1658_v32  ;;  %v1602_v60 = vmax.f32 %v1538_v18, 0.0 }
 0x137   : > { %v3615_v52 = vpop.f32.mrf.mxu1  ;;  %3678 = vmatmul.mubr.msk.bf16.gmra.mxu0 %vm1725_vm4, %v1659_v56 }
 0x138   : > { %v1605_v8 = vmax.f32 %v1541_v48, 0.0  ;;  %v1539_v24 = vadd.f32 %v4589_v55, %v1316_v10  ;;  %v1337_v7 = vadd.f32 %v3615_v52, %v4582_v40 }
 0x139   : > { %v1328_v45 = vpop.f32.mrf.mxu1 }
 0x13a   : > { %v1603_v17 = vmax.f32 %v1539_v24, 0.0  ;;  %v1329_v21 = vadd.f32 %v1328_v45, %v4584_v34  ;;  %v1661_v23 = vpack.c.bf16 %v1605_v8, %v1604_v35  ;;  %v1544_v61 = vadd.f32 %v4589_v55, %v1337_v7  ;;  %v3556_v34 = vpop.f32.mrf.mxu0 }
 0x13b   : > { %v3616_v29 = vpop.f32.mrf.mxu1 }
 0x13c   : > { %v1660_v46 = vpack.c.bf16 %v1603_v17, %v1602_v60  ;;  %v1542_v49 = vadd.f32 %v4589_v55, %v1329_v21  ;;  %v1340_v6 = vadd.f32 %v3616_v29, %v4594_v3  ;;  %v1608_v40 = vmax.f32 %v1544_v61, 0.0  ;;  %v805_v52 = vpop.f32.mrf.mxu0 }
 0x13d   : > { %v1331_v54 = vpop.f32.mrf.mxu1 }
 0x13e   : > { %v1545_v53 = vadd.f32 %v4589_v55, %v1340_v6  ;;  %v1332_v56 = vadd.f32 %v1331_v54, %v4598_v0  ;;  %3681 = vmatprep.mubr.msk.bf16.mxu0 %vm1725_vm4, %v1660_v46  ;;  %v1606_v1 = vmax.f32 %v1542_v49, 0.0 }
 0x13f   : > { %v3619_v36 = vpop.f32.mrf.mxu1  ;;  %3682 = vmatmul.mubr.msk.bf16.gmra.mxu0 %vm1725_vm4, %v1661_v23 }
 0x140   : > { %v1609_v32 = vmax.f32 %v1545_v53, 0.0  ;;  %v1543_v18 = vadd.f32 %v4589_v55, %v1332_v56  ;;  %v1353_v63 = vadd.f32 %v3619_v36, %v4604_v50 }
 0x141   : > { %v1344_v2 = vpop.f32.mrf.mxu1 }
 0x142   : > { %v1607_v3 = vmax.f32 %v1543_v18, 0.0  ;;  %v1345_v48 = vadd.f32 %v1344_v2, %v786_v51  ;;  %v1663_v10 = vpack.c.bf16 %v1609_v32, %v1608_v40  ;;  %v1548_v35 = vadd.f32 %v4589_v55, %v1353_v63  ;;  %v3559_v51 = vpop.f32.mrf.mxu0 }
 0x143   : > { %v3620_v0 = vpop.f32.mrf.mxu1 }
 0x144   : > { %v1662_v60 = vpack.c.bf16 %v1607_v3, %v1606_v1  ;;  %v1546_v8 = vadd.f32 %v4589_v55, %v1345_v48  ;;  %v1356_v24 = vadd.f32 %v3620_v0, %v3552_v16  ;;  %v1612_v21 = vmax.f32 %v1548_v35, 0.0 }
 0x145   : > { %v1347_v7 = vpop.f32.mrf.mxu1 }
 0x146   : > { %v1549_v45 = vadd.f32 %v4589_v55, %v1356_v24  ;;  %v1348_v17 = vadd.f32 %v1347_v7, %v789_v39  ;;  %3685 = vmatprep.mubr.msk.bf16.mxu0 %vm1725_vm4, %v1662_v60  ;;  %v1610_v23 = vmax.f32 %v1546_v8, 0.0  ;;  %v818_v39 = vpop.f32.mrf.mxu0 }
 0x147   : > { %v3623_v50 = vpop.f32.mrf.mxu1  ;;  %3686 = vmatmul.mubr.msk.bf16.gmra.mxu0 %vm1725_vm4, %v1663_v10 }
 0x148   : > { %v1613_v61 = vmax.f32 %v1549_v45, 0.0  ;;  %v1547_v29 = vadd.f32 %v4589_v55, %v1348_v17  ;;  %v1369_v46 = vadd.f32 %v3623_v50, %v3555_v62 }
 0x149   : > { %v1360_v49 = vpop.f32.mrf.mxu1 }
 0x14a   : > { %v1611_v6 = vmax.f32 %v1547_v29, 0.0  ;;  %v1361_v54 = vadd.f32 %v1360_v49, %v802_v44  ;;  %v1665_v16 = vpack.c.bf16 %v1613_v61, %v1612_v21  ;;  %v1552_v53 = vadd.f32 %v4589_v55, %v1369_v46  ;;  %v3560_v44 = vpop.f32.mrf.mxu0 }
 0x14b   : > { %v3624_v56 = vpop.f32.mrf.mxu1 }
 0x14c   : > { %v1664_v40 = vpack.c.bf16 %v1611_v6, %v1610_v23  ;;  %v1550_v36 = vadd.f32 %v4589_v55, %v1361_v54  ;;  %v1372_v1 = vadd.f32 %v3624_v56, %v3556_v34  ;;  %v1616_v2 = vmax.f32 %v1552_v53, 0.0 }
 0x14d   : > { %v1363_v32 = vpop.f32.mrf.mxu1 }
 0x14e   : > { %v1553_v18 = vadd.f32 %v4589_v55, %v1372_v1  ;;  %v1364_v63 = vadd.f32 %v1363_v32, %v805_v52  ;;  %3689 = vmatprep.mubr.msk.bf16.mxu0 %vm1725_vm4, %v1664_v40  ;;  %v1614_v3 = vmax.f32 %v1550_v36, 0.0  ;;  %v821_v52 = vpop.f32.mrf.mxu0 }
 0x14f   : > { %v3627_v62 = vpop.f32.mrf.mxu1  ;;  %3690 = vmatmul.mubr.msk.bf16.gmra.mxu0 %vm1725_vm4, %v1665_v16 }
 0x150   : > { %v1617_v48 = vmax.f32 %v1553_v18, 0.0  ;;  %v1551_v10 = vadd.f32 %v4589_v55, %v1364_v63  ;;  %v1385_v35 = vadd.f32 %v3627_v62, %v3559_v51 }
 0x151   : > { %v1376_v0 = vpop.f32.mrf.mxu1 }
 0x152   : > { %v1615_v60 = vmax.f32 %v1551_v10, 0.0  ;;  %v1377_v8 = vadd.f32 %v1376_v0, %v818_v39  ;;  %v1667_v34 = vpack.c.bf16 %v1617_v48, %v1616_v2  ;;  %v1556_v24 = vadd.f32 %v4589_v55, %v1385_v35 }
 0x153   : > { %v3628_v7 = vpop.f32.mrf.mxu1 }
 0x154   : > { %v1666_v45 = vpack.c.bf16 %v1615_v60, %v1614_v3  ;;  %v1554_v17 = vadd.f32 %v4589_v55, %v1377_v8  ;;  %v1388_v21 = vadd.f32 %v3628_v7, %v3560_v44  ;;  %v1620_v29 = vmax.f32 %v1556_v24, 0.0 }
 0x155   : > { %v1379_v50 = vpop.f32.mrf.mxu1 }
 0x156   : > { %v1557_v23 = vadd.f32 %v4589_v55, %v1388_v21  ;;  %v1380_v61 = vadd.f32 %v1379_v50, %v821_v52  ;;  %3693 = vmatprep.mubr.msk.bf16.mxu0 %vm1725_vm4, %v1666_v45  ;;  %v1618_v46 = vmax.f32 %v1554_v17, 0.0 }
 0x157   : > { %v3631_v51 = vpop.f32.mrf.mxu1  ;;  %3694 = vmatmul.mubr.msk.bf16.gmra.mxu0 %vm1725_vm4, %v1667_v34 }
 0x158   : > { %v1621_v49 = vmax.f32 %v1557_v23, 0.0  ;;  %v1555_v6 = vadd.f32 %v4589_v55, %v1380_v61  ;;  %v1401_v39 = vadd.f32 %v3631_v51, %v4502_v38 }
 0x159   : > { %v1392_v54 = vpop.f32.mrf.mxu1 }
 0x15a   : > { %v1619_v16 = vmax.f32 %v1555_v6, 0.0  ;;  %v1393_v53 = vadd.f32 %v1392_v54, %v4504_v58  ;;  %v1669_v56 = vpack.c.bf16 %v1621_v49, %v1620_v29  ;;  %v1560_v62 = vadd.f32 %v4589_v55, %v1401_v39 }
 0x15b   : > { %v3632_v40 = vpop.f32.mrf.mxu1 }
 0x15c   : > { %v1668_v36 = vpack.c.bf16 %v1619_v16, %v1618_v46  ;;  %v1404_v1 = vadd.f32 %v3632_v40, %v4506_v9  ;;  %v1558_v18 = vadd.f32 %v4589_v55, %v1393_v53  ;;  %v1624_v35 = vmax.f32 %v1560_v62, 0.0 }
 0x15d   : > { %v1395_v32 = vpop.f32.mrf.mxu1 }
 0x15e   : > { %v1561_v63 = vadd.f32 %v4589_v55, %v1404_v1  ;;  %v1396_v2 = vadd.f32 %v1395_v32, %v4508_v28  ;;  %3697 = vmatprep.mubr.msk.bf16.mxu0 %vm1725_vm4, %v1668_v36  ;;  %v1622_v48 = vmax.f32 %v1558_v18, 0.0 }
 0x15f   : > { %v3635_v44 = vpop.f32.mrf.mxu1  ;;  %3698 = vmatmul.mubr.msk.bf16.gmra.mxu0 %vm1725_vm4, %v1669_v56 }
 0x160   : > { %v1559_v38 = vadd.f32 %v4589_v55, %v1396_v2  ;;  %v1625_v58 = vmax.f32 %v1561_v63, 0.0  ;;  %v1417_v0 = vadd.f32 %v3635_v44, %v4510_v41 }
 0x161   : > { %v1408_v3 = vpop.f32.mrf.mxu1 }
 0x162   : > { %v1623_v9 = vmax.f32 %v1559_v38, 0.0  ;;  %v1409_v10 = vadd.f32 %v1408_v3, %v4512_v5  ;;  %v1671_v34 = vpack.c.bf16 %v1625_v58, %v1624_v35  ;;  %v1564_v17 = vadd.f32 %v4589_v55, %v1417_v0 }
 0x163   : > { %v3636_v60 = vpop.f32.mrf.mxu1 }
 0x164   : > { %v1670_v28 = vpack.c.bf16 %v1623_v9, %v1622_v48  ;;  %v1420_v8 = vadd.f32 %v3636_v60, %v4514_v57  ;;  %v1562_v7 = vadd.f32 %v4589_v55, %v1409_v10  ;;  %v1628_v29 = vmax.f32 %v1564_v17, 0.0 }
 0x165   : > { %v1411_v24 = vpop.f32.mrf.mxu1 }
 0x166   : > { %v1565_v52 = vadd.f32 %v4589_v55, %v1420_v8  ;;  %v1412_v45 = vadd.f32 %v1411_v24, %v4516_v27  ;;  %3701 = vmatprep.mubr.msk.bf16.mxu0 %vm1725_vm4, %v1670_v28  ;;  %v1626_v57 = vmax.f32 %v1562_v7, 0.0 }
 0x167   : > { %v3639_v5 = vpop.f32.mrf.mxu1  ;;  %3702 = vmatmul.mubr.msk.bf16.gmra.mxu0 %vm1725_vm4, %v1671_v34 }
 0x168   : > { %v1563_v41 = vadd.f32 %v4589_v55, %v1412_v45  ;;  %v1629_v21 = vmax.f32 %v1565_v52, 0.0  ;;  %v1433_v51 = vadd.f32 %v3639_v5, %v4518_v22 }
 0x169   : > { %v1424_v50 = vpop.f32.mrf.mxu1 }
 0x16a   : > { %v1627_v23 = vmax.f32 %v1563_v41, 0.0  ;;  %v1425_v61 = vadd.f32 %v1424_v50, %v4520_v42  ;;  %v1673_v6 = vpack.c.bf16 %v1629_v21, %v1628_v29  ;;  %v1568_v39 = vadd.f32 %v4589_v55, %v1433_v51 }
 0x16b   : > { %v3640_v46 = vpop.f32.mrf.mxu1 }
 0x16c   : > { %v1672_v27 = vpack.c.bf16 %v1627_v23, %v1626_v57  ;;  %v1436_v49 = vadd.f32 %v3640_v46, %v4522_v43  ;;  %v1566_v16 = vadd.f32 %v4589_v55, %v1425_v61  ;;  %v1632_v18 = vmax.f32 %v1568_v39, 0.0 }
 0x16d   : > { %v1427_v54 = vpop.f32.mrf.mxu1 }
 0x16e   : > { %v1569_v53 = vadd.f32 %v4589_v55, %v1436_v49  ;;  %v1428_v56 = vadd.f32 %v1427_v54, %v4524_v12  ;;  %3705 = vmatprep.mubr.msk.bf16.mxu0 %vm1725_vm4, %v1672_v27  ;;  %v1630_v43 = vmax.f32 %v1566_v16, 0.0 }
 0x16f   : > { %v3643_v42 = vpop.f32.mrf.mxu1  ;;  %3706 = vmatmul.mubr.msk.bf16.gmra.mxu0 %vm1725_vm4, %v1673_v6 }
 0x170   : > { %v1567_v22 = vadd.f32 %v4589_v55, %v1428_v56  ;;  %v1633_v40 = vmax.f32 %v1569_v53, 0.0  ;;  %v1449_v63 = vadd.f32 %v3643_v42, %v4526_v15 }
 0x171   : > { %v1440_v36 = vpop.f32.mrf.mxu1 }
 0x172   : > { %v1631_v1 = vmax.f32 %v1567_v22, 0.0  ;;  %v1441_v32 = vadd.f32 %v1440_v36, %v4528_v47  ;;  %v1675_v44 = vpack.c.bf16 %v1633_v40, %v1632_v18  ;;  %v1572_v9 = vadd.f32 %v4589_v55, %v1449_v63 }
 0x173   : > { %v3644_v2 = vpop.f32.mrf.mxu1 }
 0x174   : > { %v1674_v12 = vpack.c.bf16 %v1631_v1, %v1630_v43  ;;  %v1452_v62 = vadd.f32 %v3644_v2, %v4530_v33  ;;  %v1570_v58 = vadd.f32 %v4589_v55, %v1441_v32  ;;  %v1636_v28 = vmax.f32 %v1572_v9, 0.0 }
 0x175   : > { %v1443_v38 = vpop.f32.mrf.mxu1 }
 0x176   : > { %v1573_v3 = vadd.f32 %v4589_v55, %v1452_v62  ;;  %v1444_v48 = vadd.f32 %v1443_v38, %v4532_v20  ;;  %3709 = vmatprep.mubr.msk.bf16.mxu0 %vm1725_vm4, %v1674_v12  ;;  %v1634_v33 = vmax.f32 %v1570_v58, 0.0  ;;  %v5868_v12 = vld [vmem:[#allocation67_spill] sm:$0xff] }
 0x177   : > { %v3647_v47 = vpop.f32.mrf.mxu1  ;;  %3710 = vmatmul.mubr.msk.bf16.gmra.mxu0 %vm1725_vm4, %v1675_v44 }
 0x178   : > { %v1571_v15 = vadd.f32 %v4589_v55, %v1444_v48  ;;  %v1637_v10 = vmax.f32 %v1573_v3, 0.0  ;;  %v1465_v8 = vadd.f32 %v3647_v47, %v4534_v30  ;;  %v5869_v48 = vld [vmem:[#allocation69_spill] sm:$0xff] }
 0x179   : > { %v1456_v35 = vpop.f32.mrf.mxu1 }
 0x17a   : > { %v1635_v0 = vmax.f32 %v1571_v15, 0.0  ;;  %v1457_v60 = vadd.f32 %v1456_v35, %v4538_v31  ;;  %v1677_v7 = vpack.c.bf16 %v1637_v10, %v1636_v28  ;;  %v1576_v41 = vadd.f32 %v4589_v55, %v1465_v8  ;;  %v5870_v15 = vld [vmem:[#allocation68_spill] sm:$0xff] }
 0x17b   : > { %v3648_v34 = vpop.f32.mrf.mxu1 }
 0x17c   : > { %v1676_v20 = vpack.c.bf16 %v1635_v0, %v1634_v33  ;;  %v1468_v24 = vadd.f32 %v3648_v34, %v4540_v13  ;;  %v1574_v45 = vadd.f32 %v4589_v55, %v1457_v60  ;;  %v1640_v61 = vmax.f32 %v1576_v41, 0.0  ;;  %v5871_v0 = vld [vmem:[#allocation70_spill] sm:$0xff] }
 0x17d   : > { %v1459_v52 = vpop.f32.mrf.mxu1 }
 0x17e   : > { %v1577_v17 = vadd.f32 %v4589_v55, %v1468_v24  ;;  %v1460_v5 = vadd.f32 %v1459_v52, %v4544_v14  ;;  %3713 = vmatprep.mubr.msk.bf16.mxu0 %vm1725_vm4, %v1676_v20  ;;  %v1638_v13 = vmax.f32 %v1574_v45, 0.0  ;;  %v5872_v24 = vld [vmem:[#allocation71_spill] sm:$0xff] }
 0x17f   : > { %v3651_v31 = vpop.f32.mrf.mxu1  ;;  %3714 = vmatmul.mubr.msk.bf16.gmra.mxu0 %vm1725_vm4, %v1677_v7 }
 0x180   : > { %v1575_v30 = vadd.f32 %v4589_v55, %v1460_v5  ;;  %v1641_v21 = vmax.f32 %v1577_v17, 0.0  ;;  %v1481_v29 = vadd.f32 %v3651_v31, %v4546_v19 }
 0x181   : > { %v1472_v50 = vpop.f32.mrf.mxu1 }
 0x182   : > { %v1639_v57 = vmax.f32 %v1575_v30, 0.0  ;;  %v1473_v23 = vadd.f32 %v1472_v50, %v4550_v59  ;;  %v1679_v27 = vpack.c.bf16 %v1641_v21, %v1640_v61  ;;  %v1580_v53 = vadd.f32 %v4589_v55, %v1481_v29  ;;  %v4741_v50 = vld [vmem:[%s5731_s7] ss:$0 sm:$0xff] }
 0x183   : > { %v3652_v51 = vpop.f32.mrf.mxu1 }
 0x184   : > { %v1678_v14 = vpack.c.bf16 %v1639_v57, %v1638_v13  ;;  %v1484_v46 = vadd.f32 %v3652_v51, %v4552_v26  ;;  %v1578_v6 = vadd.f32 %v4589_v55, %v1473_v23  ;;  %v1644_v40 = vmax.f32 %v1580_v53, 0.0 }
 0x185   : > { %v1475_v49 = vpop.f32.mrf.mxu1 }
 0x186   : > { %v1581_v54 = vadd.f32 %v4589_v55, %v1484_v46  ;;  %v1476_v16 = vadd.f32 %v1475_v49, %v4556_v25  ;;  %3717 = vmatprep.mubr.msk.bf16.mxu0 %vm1725_vm4, %v1678_v14  ;;  %v1642_v26 = vmax.f32 %v1578_v6, 0.0 }
 0x187   : > { %v3655_v59 = vpop.f32.mrf.mxu1  ;;  %3718 = vmatmul.mubr.msk.bf16.gmra.mxu0 %vm1725_vm4, %v1679_v27 }
 0x188   : > { %v1579_v19 = vadd.f32 %v4589_v55, %v1476_v16  ;;  %v1645_v56 = vmax.f32 %v1581_v54, 0.0  ;;  %v1497_v36 = vadd.f32 %v3655_v59, %v4558_v37 }
 0x189   : > { %v1488_v39 = vpop.f32.mrf.mxu1 }
 0x18a   : > { %v1643_v42 = vmax.f32 %v1579_v19, 0.0  ;;  %v1489_v22 = vadd.f32 %v1488_v39, %v4562_v11  ;;  %v1681_v32 = vpack.c.bf16 %v1645_v56, %v1644_v40  ;;  %v1584_v44 = vadd.f32 %v4589_v55, %v1497_v36 }
 0x18b   : > { %v3656_v43 = vpop.f32.mrf.mxu1 }
 0x18c   : > { %v1680_v25 = vpack.c.bf16 %v1643_v42, %v1642_v26  ;;  %v1500_v1 = vadd.f32 %v3656_v43, %v4564_v4  ;;  %v1582_v63 = vadd.f32 %v4589_v55, %v1489_v22  ;;  %v1648_v47 = vmax.f32 %v1584_v44, 0.0 }
 0x18d   : > { %v1491_v18 = vpop.f32.mrf.mxu1 }
 0x18e   : > { %v1585_v2 = vadd.f32 %v4589_v55, %v1500_v1  ;;  %v1492_v62 = vadd.f32 %v1491_v18, %v5868_v12  ;;  %3721 = vmatprep.mubr.msk.bf16.mxu0 %vm1725_vm4, %v1680_v25  ;;  %v1646_v4 = vmax.f32 %v1582_v63, 0.0 }
 0x18f   : > { %v3659_v11 = vpop.f32.mrf.mxu1  ;;  %3722 = vmatmul.mubr.msk.bf16.gmra.mxu0 %vm1725_vm4, %v1681_v32 }
 0x190   : > { %v1583_v37 = vadd.f32 %v4589_v55, %v1492_v62  ;;  %v1649_v38 = vmax.f32 %v1585_v2, 0.0  ;;  %v1513_v10 = vadd.f32 %v3659_v11, %v5870_v15  ;;  %v3911_v62 = vld [vmem:[%s5726_s2] sm:$0x1] }
 0x191   : > { %v1504_v58 = vpop.f32.mrf.mxu1  ;;  %v2111_v44 = vsub.f32 1.0, %v3911_v62 }
 0x192   : > { %v1647_v3 = vmax.f32 %v1583_v37, 0.0  ;;  %v1505_v9 = vadd.f32 %v1504_v58, %v5869_v48  ;;  %v1683_v28 = vpack.c.bf16 %v1649_v38, %v1648_v47  ;;  %v1588_v52 = vadd.f32 %v4589_v55, %v1513_v10  ;;  %v5873_v37 = vld [vmem:[#allocation2_spill] sm:$0xff] }
 0x193   : > { %v3660_v35 = vpop.f32.mrf.mxu1  ;;  %v5874_v38 = vsub.s32 0, %v5873_v37 }
 0x194   : > { %v1682_v33 = vpack.c.bf16 %v1647_v3, %v1646_v4  ;;  %v1516_v60 = vadd.f32 %v3660_v35, %v5871_v0  ;;  %v1586_v34 = vadd.f32 %v4589_v55, %v1505_v9  ;;  %v1652_v31 = vmax.f32 %v1588_v52, 0.0  ;;  %v3912_v4 = vld [vmem:[%s4063_s17 + $0x10] sm:$0xff]  ;;  %v3913_v35 = vld [vmem:[%s4063_s17 + $0x18] sm:$0xff] }
 0x195   : > { %v1507_v8 = vpop.f32.mrf.mxu1  ;;  %v4802_v58 = vrot.slane %v2111_v44, %v5874_v38  ;;  %v3915_v38 = vld [vmem:[%s4063_s17 + $0x38] sm:$0xff] }
 0x196   : > { %v1589_v20 = vadd.f32 %v4589_v55, %v1516_v60  ;;  %v1508_v7 = vadd.f32 %v1507_v8, %v5872_v24  ;;  %3725 = vmatprep.mubr.msk.bf16.mxu0 %vm1725_vm4, %v1682_v33  ;;  %v1650_v5 = vmax.f32 %v1586_v34, 0.0  ;;  %v5875_v60 = vld [vmem:[#allocation15_spill] sm:$0xff] }
 0x197   : > { %3726 = vmatmul.mubr.msk.bf16.gmra.mxu0 %vm1725_vm4, %v1683_v28 }
 0x198   : > { %v1587_v45 = vadd.f32 %v4589_v55, %v1508_v7  ;;  %v1653_v17 = vmax.f32 %v1589_v20, 0.0 }
 0x19a   : > { %v1651_v41 = vmax.f32 %v1587_v45, 0.0  ;;  %v1685_v21 = vpack.c.bf16 %v1653_v17, %v1652_v31  ;;  %v5876_v45 = vld [vmem:[#allocation19_spill] sm:$0xff] }
 0x19c   : > { %v1684_v30 = vpack.c.bf16 %v1651_v41, %v1650_v5 }
 0x19e   : > { %3729 = vmatprep.mubr.msk.bf16.mxu0 %vm1725_vm4, %v1684_v30 }
 0x19f   : > { %3730 = vmatmul.mubr.msk.bf16.gmra.mxu0 %vm1725_vm4, %v1685_v21 }
 0x1e7   : > { %v3671_v13 = vpop.f32.mrf.mxu0 }
 0x1e8   : > { %v1865_v57 = vadd.f32 %v3671_v13, %v4741_v50 }
 0x1e9   : > { %v1856_v23 = vpop.f32.mrf.mxu0 }
 0x1ea   : > { %2180 = vrot.lane.b32.xlu1 %v1865_v57, %s3987_s18  ;;  %v2828_v55 = vsel %vm568_vm2, %v1865_v57, 0.0  ;;  %v4749_v51 = vadd.f32 %v4741_v50, %v1856_v23  ;;  %v2434_v40 = vsub.f32 0.0, %v1865_v57  ;;  %v3914_v57 = vld [vmem:[%s4063_s17] sm:$0xff] }
 0x1eb   : > { %2829 = vadd.xlane.f32.xlu0 %v2828_v55  ;;  %v3672_v61 = vpop.f32.mrf.mxu0 }
 0x1ec   : > { %v1868_v29 = vadd.f32 %v3672_v61, %v4741_v50  ;;  %v2822_v19 = vsel %vm568_vm2, %v4749_v51, 0.0  ;;  %v2500_v25 = vmul.f32 1.442695, %v2434_v40  ;;  %v2432_v20 = vsub.f32 0.0, %v4749_v51 }
 0x1ed   : > { %v1859_v14 = vpop.f32.mrf.mxu0 }
 0x1ee   : > { %2182 = vrot.lane.b32.xlu1 %v1868_v29, %s3987_s18  ;;  %v4754_v46 = vadd.f32 %v4741_v50, %v1859_v14  ;;  %v2831_v56 = vsel %vm568_vm2, %v1868_v29, 0.0  ;;  %v2435_v1 = vsub.f32 0.0, %v1868_v29  ;;  %3783 = vpow2.f32 %v2500_v25 }
 0x1ef   : > { %v3675_v27 = vpop.f32.mrf.mxu0  ;;  %v2496_v5 = vmul.f32 1.442695, %v2432_v20 }
 0x1f0   : > { %v4757_v49 = vadd.f32 %v3675_v27, %v4741_v50  ;;  %v2825_v6 = vsel %vm568_vm2, %v4754_v46, 0.0  ;;  %v2502_v2 = vmul.f32 1.442695, %v2435_v1  ;;  %v2433_v1 = vsub.f32 0.0, %v4754_v46 }
 0x1f1   : > { %v1872_v54 = vpop.f32.mrf.mxu0 }
 0x1f2   : > { %v4762_v16 = vadd.f32 %v4741_v50, %v1872_v54  ;;  %v2840_v53 = vsel %vm568_vm2, %v4757_v49, 0.0  ;;  %3785 = vpow2.f32 %v2502_v2 }
 0x1f3   : > { %v3676_v39 = vpop.f32.mrf.mxu0  ;;  %3787 = vpow2.f32 %v2496_v5  ;;  %v3917_v5 = vld [vmem:[%s4063_s17 + $0x8] sm:$0xff] }
 0x1f4   : > { %v2834_v59 = vsel %vm568_vm2, %v4762_v16, 0.0  ;;  %v4772_v26 = vadd.f32 %v3676_v39, %v4741_v50  ;;  %v2436_v44 = vsub.f32 0.0, %v4762_v16 }
 0x1f5   : > { %v1875_v42 = vpop.f32.mrf.mxu0 }
 0x1f6   : > { %v4777_v22 = vadd.f32 %v4741_v50, %v1875_v42  ;;  %v2843_v15 = vsel %vm568_vm2, %v4772_v26, 0.0 }
 0x1f7   : > { %v3679_v36 = vpop.f32.mrf.mxu0 }
 0x1f8   : > { %v4788_v43 = vadd.f32 %v3679_v36, %v4741_v50  ;;  %v2837_v34 = vsel %vm568_vm2, %v4777_v22, 0.0  ;;  %v2437_v42 = vsub.f32 0.0, %v4777_v22 }
 0x1f9   : > { %v1888_v32 = vpop.f32.mrf.mxu0 }
 0x1fa   : > { %v4791_v18 = vadd.f32 %v4741_v50, %v1888_v32  ;;  %v2852_v63 = vsel %vm568_vm2, %v4788_v43, 0.0  ;;  %v2506_v36 = vmul.f32 1.442695, %v2437_v42  ;;  %v5881_v42 = vld [vmem:[#allocation23_spill] sm:$0xff] }
 0x1fb   : > { %v3784_v48 = vpop.eup %3783  ;;  %v3680_v24 = vpop.f32.mrf.mxu0 }
 0x1fc   : > { %v2846_v12 = vsel %vm568_vm2, %v4791_v18, 0.0  ;;  %v4824_v52 = vadd.f32 %v3680_v24, %v4741_v50 }
 0x1fd   : > { %v1891_v41 = vpop.f32.mrf.mxu0 }
 0x1fe   : > { %v4832_v31 = vadd.f32 %v4741_v50, %v1891_v41  ;;  %v2855_v25 = vsel %vm568_vm2, %v4824_v52, 0.0 }
 0x1ff   : > { %v3786_v0 = vpop.eup %3785  ;;  %v3683_v27 = vpop.f32.mrf.mxu0 }
 0x200   : > { %v3788_v55 = vpop.eup %3787 }
 0x201   : > { %2176 = vrot.lane.b32.xlu0 %v4749_v51, %s3987_s18  ;;  %v5877_v51 = vld [vmem:[#allocation13_spill] sm:$0xff]  ;;  %v1904_v54 = vpop.f32.mrf.mxu0 }
 0x203   : > { %v3684_v2 = vpop.f32.mrf.mxu0 }
 0x212   : > { %2826 = vadd.xlane.f32.xlu1 %v2825_v6  ;;  %v4848_v6 = vadd.f32 %v3683_v27, %v4741_v50 }
 0x216   : > { %2841 = vadd.xlane.f32.xlu1 %v2840_v53  ;;  %v4851_v53 = vadd.f32 %v4741_v50, %v1904_v54 }
 0x21a   : > { %2835 = vadd.xlane.f32.xlu1 %v2834_v59  ;;  %v2864_v59 = vsel %vm568_vm2, %v4848_v6, 0.0 }
 0x220   : > { %2823 = vadd.xlane.f32.xlu0 %v2822_v19  ;;  %v2858_v19 = vsel %vm568_vm2, %v4851_v53, 0.0 }
 0x224   : > { %2832 = vadd.xlane.f32.xlu0 %v2831_v56  ;;  %v2439_v56 = vsub.f32 0.0, %v4772_v26 }
 0x226   : > { %v2510_v39 = vmul.f32 1.442695, %v2439_v56 }
 0x228   : > { %3789 = vpow2.f32 %v2510_v39 }
 0x229   : > { %3791 = vpow2.f32 %v2506_v36 }
 0x22b   : > { %2190 = vrot.lane.b32.xlu1 %v4772_v26, %s3987_s18  ;;  %v2849_v26 = vsel %vm568_vm2, %v4832_v31, 0.0 }
 0x22f   : > { %2186 = vrot.lane.b32.xlu1 %v4777_v22, %s3987_s18  ;;  %v2438_v22 = vsub.f32 0.0, %v4757_v49 }
 0x23a   : > { %2178 = vrot.lane.b32.xlu0 %v4754_v46, %s3987_s18  ;;  %v2508_v46 = vmul.f32 1.442695, %v2438_v22 }
 0x23e   : > { %2188 = vrot.lane.b32.xlu0 %v4757_v49, %s3987_s18 }
 0x242   : > { %2184 = vrot.lane.b32.xlu0 %v4762_v16, %s3987_s18 }
 0x253   : > { %2853 = vadd.xlane.f32.xlu1 %v2852_v63  ;;  %v2498_v63 = vmul.f32 1.442695, %v2433_v1 }
 0x255   : > { %3793 = vpow2.f32 %v2498_v63 }
 0x256   : > { %3795 = vpow2.f32 %v2508_v46 }
 0x257   : > { %2847 = vadd.xlane.f32.xlu1 %v2846_v12  ;;  %v4870_v12 = vadd.f32 %v3684_v2, %v4741_v50 }
 0x25c   : > { %v2181_v11 = vpop.permute.xlu1 %2180 }
 0x25d   : > { %v2370_v3 = vsub.f32 %v3912_v4, %v2181_v11  ;;  %v1907_v11 = vpop.f32.mrf.mxu0 }
 0x25e   : > { %v4878_v37 = vadd.f32 %v4741_v50, %v1907_v11 }
 0x25f   : > { %v2626_v9 = vmul.f32 %v3784_v48, %v2370_v3  ;;  %v3790_v3 = vpop.eup %3789  ;;  %v3687_v2 = vpop.f32.mrf.mxu0 }
 0x260   : > { %v2183_v47 = vpop.permute.xlu1 %2182  ;;  %v4925_v46 = vadd.f32 %v3687_v2, %v4741_v50 }
 0x261   : > { %v2696_v10 = vmul.f32 %v4802_v58, %v2626_v9  ;;  %v2371_v33 = vsub.f32 %v3913_v35, %v2183_v47  ;;  %2844 = vadd.xlane.f32.xlu0 %v2843_v15  ;;  %v2504_v9 = vmul.f32 1.442695, %v2436_v44  ;;  %v3916_v35 = vld [vmem:[%s4063_s17 + $0x28] sm:$0xff]  ;;  %v1920_v44 = vpop.f32.mrf.mxu0 }
 0x262   : > { %v2876_v11 = vsel %vm568_vm2, %v4925_v46, 0.0 }
 0x263   : > { %v2760_v28 = vadd.f32 %v2696_v10, %v5875_v60  ;;  %v2627_v8 = vmul.f32 %v3786_v0, %v2371_v33  ;;  %v3792_v0 = vpop.eup %3791  ;;  %3797 = vpow2.f32 %v2504_v9 }
 0x265   : > { %3080 = vst.msk [vmem:[%s4814_s23 + $0x10] sm:$0xff] %vm568_vm2, %v2760_v28  ;;  %v2697_v7 = vmul.f32 %v4802_v58, %v2627_v8  ;;  %2838 = vadd.xlane.f32.xlu0 %v2837_v34  ;;  %v5878_v28 = vld [vmem:[#allocation24_spill] sm:$0xff] }
 0x267   : > { %v2761_v17 = vadd.f32 %v2697_v7, %v5876_v45  ;;  %v5879_v45 = vld [vmem:[#allocation22_spill] sm:$0xff] }
 0x268   : > { %2198 = vrot.lane.b32.xlu1 %v4824_v52, %s3987_s18 }
 0x269   : > { %3081 = vst.msk [vmem:[%s4814_s23 + $0x18] sm:$0xff] %vm568_vm2, %v2761_v17 }
 0x26c   : > { %2194 = vrot.lane.b32.xlu1 %v4832_v31, %s3987_s18 }
 0x274   : > { %v2830_v30 = vpop.xlane.xlu0 %2829 }
 0x275   : > { %v3016_v21 = vsub.f32 0.0, %v2830_v30  ;;  %v3794_v30 = vpop.eup %3793 }
 0x277   : > { %3145 = vst.msk [vmem:[%s4814_s23 + $0x10] sm:$0xff] %vm3142_vm5, %v3016_v21 }
 0x278   : > { %v2177_v13 = vpop.permute.xlu0 %2176 }
 0x279   : > { %v2368_v23 = vsub.f32 %v3914_v57, %v2177_v13 }
 0x27b   : > { %v2624_v61 = vmul.f32 %v3788_v55, %v2368_v23  ;;  %2196 = vrot.lane.b32.xlu0 %v4788_v43, %s3987_s18  ;;  %v3918_v23 = vld [vmem:[%s4063_s17 + $0x30] sm:$0xff] }
 0x27d   : > { %v2694_v29 = vmul.f32 %v4802_v58, %v2624_v61  ;;  %v3796_v61 = vpop.eup %3795 }
 0x27e   : > { %v3798_v39 = vpop.eup %3797 }
 0x27f   : > { %v2758_v14 = vadd.f32 %v2694_v29, %v5877_v51  ;;  %2192 = vrot.lane.b32.xlu0 %v4791_v18, %s3987_s18  ;;  %v5880_v29 = vld [vmem:[#allocation14_spill] sm:$0xff] }
 0x281   : > { %3078 = vst.msk [vmem:[%s4814_s23] sm:$0xff] %vm568_vm2, %v2758_v14 }
 0x290   : > { %2865 = vadd.xlane.f32.xlu1 %v2864_v59 }
 0x294   : > { %2859 = vadd.xlane.f32.xlu1 %v2858_v19  ;;  %v3919_v19 = vld [vmem:[%s4063_s17 + $0x20] sm:$0xff] }
 0x29b   : > { %v4859_v40 = vpop.xlane.xlu1 %2826 }
 0x29c   : > { %v3015_v27 = vsub.f32 0.0, %v4859_v40 }
 0x29e   : > { %2856 = vadd.xlane.f32.xlu0 %v2855_v25 }
 0x29f   : > { %v4864_v32 = vpop.xlane.xlu1 %2841 }
 0x2a0   : > { %v3020_v40 = vsub.f32 0.0, %v4864_v32  ;;  %v4928_v32 = vadd.f32 %v4741_v50, %v1920_v44 }
 0x2a2   : > { %2850 = vadd.xlane.f32.xlu0 %v2849_v26  ;;  %v5882_v26 = vld [vmem:[#allocation21_spill] sm:$0xff] }
 0x2a3   : > { %v4872_v62 = vpop.xlane.xlu1 %2835 }
 0x2a4   : > { %v3018_v22 = vsub.f32 0.0, %v4872_v62  ;;  %v2443_v62 = vsub.f32 0.0, %v4824_v52 }
 0x2a5   : > { %2206 = vrot.lane.b32.xlu1 %v4870_v12, %s3987_s18 }
 0x2a7   : > { %v2191_v49 = vpop.permute.xlu1 %2190 }
 0x2a8   : > { %v2375_v4 = vsub.f32 %v3915_v38, %v2191_v49  ;;  %v2870_v49 = vsel %vm568_vm2, %v4928_v32, 0.0  ;;  %v2518_v38 = vmul.f32 1.442695, %v2443_v62 }
 0x2a9   : > { %2202 = vrot.lane.b32.xlu1 %v4878_v37, %s3987_s18  ;;  %v2824_v48 = vpop.xlane.xlu0 %2823 }
 0x2aa   : > { %v2631_v47 = vmul.f32 %v3790_v3, %v2375_v4  ;;  %v3014_v15 = vsub.f32 0.0, %v2824_v48  ;;  %v2441_v4 = vsub.f32 0.0, %v4832_v31  ;;  %3799 = vpow2.f32 %v2518_v38 }
 0x2ab   : > { %v2187_v16 = vpop.permute.xlu1 %2186  ;;  %v2867_v48 = vsel %vm568_vm2, %v4870_v12, 0.0 }
 0x2ac   : > { %v2701_v10 = vmul.f32 %v4802_v58, %v2631_v47  ;;  %3143 = vst.msk [vmem:[%s4814_s23] sm:$0xff] %vm3142_vm5, %v3014_v15  ;;  %v2373_v33 = vsub.f32 %v3916_v35, %v2187_v16  ;;  %v2514_v3 = vmul.f32 1.442695, %v2441_v4  ;;  %v2861_v47 = vsel %vm568_vm2, %v4878_v37, 0.0  ;;  %v3688_v16 = vpop.f32.mrf.mxu0 }
 0x2ad   : > { %v2833_v60 = vpop.xlane.xlu0 %2832  ;;  %v2442_v15 = vsub.f32 0.0, %v4788_v43  ;;  %v4942_v52 = vadd.f32 %v3688_v16, %v4741_v50  ;;  %v2440_v35 = vsub.f32 0.0, %v4791_v18 }
 0x2ae   : > { %v2765_v8 = vadd.f32 %v2701_v10, %v5878_v28  ;;  %v2629_v34 = vmul.f32 %v3792_v0, %v2373_v33  ;;  %v3017_v20 = vsub.f32 0.0, %v2833_v60  ;;  %3801 = vpow2.f32 %v2514_v3  ;;  %v1923_v33 = vpop.f32.mrf.mxu0  ;;  %v3920_v28 = vld [vmem:[%s4063_s17 + $0x58] sm:$0xff] }
 0x2af   : > { %v2516_v10 = vmul.f32 1.442695, %v2442_v15  ;;  %v4948_v0 = vadd.f32 %v4741_v50, %v1923_v33  ;;  %v2879_v16 = vsel %vm568_vm2, %v4942_v52, 0.0 }
 0x2b0   : > { %3085 = vst.msk [vmem:[%s4814_s23 + $0x38] sm:$0xff] %vm568_vm2, %v2765_v8  ;;  %v2699_v24 = vmul.f32 %v4802_v58, %v2629_v34  ;;  %v2512_v34 = vmul.f32 1.442695, %v2440_v35  ;;  %v2446_v35 = vsub.f32 0.0, %v4848_v6 }
 0x2b1   : > { %3146 = vst.msk [vmem:[%s4814_s23 + $0x18] sm:$0xff] %vm3142_vm5, %v3017_v20  ;;  %v2179_v7 = vpop.permute.xlu0 %2178  ;;  %3803 = vpow2.f32 %v2516_v10  ;;  %v2873_v10 = vsel %vm568_vm2, %v4948_v0, 0.0 }
 0x2b2   : > { %v2763_v17 = vadd.f32 %v2699_v24, %v5879_v45  ;;  %v2369_v41 = vsub.f32 %v3917_v5, %v2179_v7  ;;  %v3921_v7 = vld [vmem:[%s4063_s17 + $0x48] sm:$0xff]  ;;  %3805 = vpow2.f32 %v2512_v34 }
 0x2b4   : > { %3083 = vst.msk [vmem:[%s4814_s23 + $0x28] sm:$0xff] %vm568_vm2, %v2763_v17  ;;  %v2625_v21 = vmul.f32 %v3794_v30, %v2369_v41  ;;  %v5883_v41 = vld [vmem:[#allocation32_spill] sm:$0xff] }
 0x2b5   : > { %v2189_v13 = vpop.permute.xlu0 %2188 }
 0x2b6   : > { %v2695_v57 = vmul.f32 %v4802_v58, %v2625_v21  ;;  %v2374_v55 = vsub.f32 %v3918_v23, %v2189_v13 }
 0x2b7   : > { %v3800_v8 = vpop.eup %3799 }
 0x2b8   : > { %v2759_v51 = vadd.f32 %v2695_v57, %v5880_v29  ;;  %v2630_v14 = vmul.f32 %v3796_v61, %v2374_v55  ;;  %2204 = vrot.lane.b32.xlu0 %v4848_v6, %s3987_s18  ;;  %v5884_v55 = vld [vmem:[#allocation26_spill] sm:$0xff] }
 0x2b9   : > { %v2185_v54 = vpop.permute.xlu0 %2184 }
 0x2ba   : > { %3079 = vst.msk [vmem:[%s4814_s23 + $0x8] sm:$0xff] %vm568_vm2, %v2759_v51  ;;  %v2700_v59 = vmul.f32 %v4802_v58, %v2630_v14  ;;  %v2372_v56 = vsub.f32 %v3919_v19, %v2185_v54  ;;  %v3922_v14 = vld [vmem:[%s4063_s17 + $0x50] sm:$0xff] }
 0x2bb   : > { %3144 = vst.msk [vmem:[%s4814_s23 + $0x8] sm:$0xff] %vm3142_vm5, %v3015_v27  ;;  %v3802_v17 = vpop.eup %3801 }
 0x2bc   : > { %v2764_v36 = vadd.f32 %v2700_v59, %v5881_v42  ;;  %v2628_v25 = vmul.f32 %v3798_v39, %v2372_v56  ;;  %2200 = vrot.lane.b32.xlu0 %v4851_v53, %s3987_s18  ;;  %v3923_v39 = vld [vmem:[%s4063_s17 + $0x40] sm:$0xff] }
 0x2be   : > { %3084 = vst.msk [vmem:[%s4814_s23 + $0x30] sm:$0xff] %vm568_vm2, %v2764_v36  ;;  %v2698_v1 = vmul.f32 %v4802_v58, %v2628_v25  ;;  %v3804_v54 = vpop.eup %3803  ;;  %v5885_v25 = vld [vmem:[#allocation31_spill] sm:$0xff] }
 0x2bf   : > { %3149 = vst.msk [vmem:[%s4814_s23 + $0x30] sm:$0xff] %vm3142_vm5, %v3020_v40  ;;  %v3806_v36 = vpop.eup %3805 }
 0x2c0   : > { %v2762_v63 = vadd.f32 %v2698_v1, %v5882_v26 }
 0x2c2   : > { %3082 = vst.msk [vmem:[%s4814_s23 + $0x20] sm:$0xff] %vm568_vm2, %v2762_v63 }
 0x2c3   : > { %3147 = vst.msk [vmem:[%s4814_s23 + $0x20] sm:$0xff] %vm3142_vm5, %v3018_v22  ;;  %v5886_v22 = vld [vmem:[#allocation25_spill] sm:$0xff] }
 0x2cd   : > { %2877 = vadd.xlane.f32.xlu1 %v2876_v11  ;;  %v3691_v11 = vpop.f32.mrf.mxu0 }
 0x2cf   : > { %v1936_v62 = vpop.f32.mrf.mxu0 }
 0x2d0   : > { %v4988_v38 = vadd.f32 %v4741_v50, %v1936_v62 }
 0x2d1   : > { %2871 = vadd.xlane.f32.xlu1 %v2870_v49  ;;  %v4985_v49 = vadd.f32 %v3691_v11, %v4741_v50  ;;  %v3692_v33 = vpop.f32.mrf.mxu0 }
 0x2d2   : > { %v2882_v3 = vsel %vm568_vm2, %v4988_v38, 0.0 }
 0x2d3   : > { %v2888_v4 = vsel %vm568_vm2, %v4985_v49, 0.0 }
 0x2db   : > { %2868 = vadd.xlane.f32.xlu0 %v2867_v48  ;;  %v2447_v48 = vsub.f32 0.0, %v4870_v12  ;;  %v5002_v12 = vadd.f32 %v3692_v33, %v4741_v50 }
 0x2dc   : > { %v2854_v9 = vpop.xlane.xlu1 %2853 }
 0x2dd   : > { %v3024_v26 = vsub.f32 0.0, %v2854_v9  ;;  %v2526_v9 = vmul.f32 1.442695, %v2447_v48  ;;  %v2891_v33 = vsel %vm568_vm2, %v5002_v12, 0.0 }
 0x2df   : > { %2862 = vadd.xlane.f32.xlu0 %v2861_v47  ;;  %v2445_v47 = vsub.f32 0.0, %v4878_v37  ;;  %3807 = vpow2.f32 %v2526_v9 }
 0x2e0   : > { %v2848_v31 = vpop.xlane.xlu1 %2847 }
 0x2e1   : > { %v3022_v44 = vsub.f32 0.0, %v2848_v31  ;;  %v2522_v15 = vmul.f32 1.442695, %v2445_v47 }
 0x2e2   : > { %2214 = vrot.lane.b32.xlu1 %v4942_v52, %s3987_s18 }
 0x2e3   : > { %3809 = vpow2.f32 %v2522_v15 }
 0x2e4   : > { %v2199_v60 = vpop.permute.xlu1 %2198 }
 0x2e5   : > { %v2379_v43 = vsub.f32 %v3920_v28, %v2199_v60  ;;  %v2524_v60 = vmul.f32 1.442695, %v2446_v35  ;;  %v2444_v28 = vsub.f32 0.0, %v4851_v53 }
 0x2e6   : > { %2210 = vrot.lane.b32.xlu1 %v4948_v0, %s3987_s18 }
 0x2e7   : > { %v2635_v20 = vmul.f32 %v3800_v8, %v2379_v43  ;;  %v1939_v43 = vpop.f32.mrf.mxu0  ;;  %3811 = vpow2.f32 %v2524_v60 }
 0x2e8   : > { %v2195_v24 = vpop.permute.xlu1 %2194  ;;  %v5008_v8 = vadd.f32 %v4741_v50, %v1939_v43 }
 0x2e9   : > { %v2705_v18 = vmul.f32 %v4802_v58, %v2635_v20  ;;  %v2377_v45 = vsub.f32 %v3921_v7, %v2195_v24  ;;  %v3924_v20 = vld [vmem:[%s4063_s17 + $0x78] sm:$0xff] }
 0x2ea   : > { %v2845_v5 = vpop.xlane.xlu0 %2844  ;;  %v2885_v60 = vsel %vm568_vm2, %v5008_v8, 0.0 }
 0x2eb   : > { %v2769_v30 = vadd.f32 %v2705_v18, %v5883_v41  ;;  %v2633_v21 = vmul.f32 %v3802_v17, %v2377_v45  ;;  %v3021_v13 = vsub.f32 0.0, %v2845_v5  ;;  %v2520_v18 = vmul.f32 1.442695, %v2444_v28  ;;  %v3925_v17 = vld [vmem:[%s4063_s17 + $0x68] sm:$0xff] }
 0x2ec   : > { %v3808_v24 = vpop.eup %3807  ;;  %v2450_v28 = vsub.f32 0.0, %v4925_v46 }
 0x2ed   : > { %3089 = vst.msk [vmem:[%s4814_s23 + $0x58] sm:$0xff] %vm568_vm2, %v2769_v30  ;;  %v2703_v57 = vmul.f32 %v4802_v58, %v2633_v21  ;;  %3813 = vpow2.f32 %v2520_v18  ;;  %v5887_v21 = vld [vmem:[#allocation40_spill] sm:$0xff] }
 0x2ee   : > { %3150 = vst.msk [vmem:[%s4814_s23 + $0x38] sm:$0xff] %vm3142_vm5, %v3021_v13  ;;  %v2839_v23 = vpop.xlane.xlu0 %2838 }
 0x2ef   : > { %v2767_v61 = vadd.f32 %v2703_v57, %v5884_v55  ;;  %v3019_v29 = vsub.f32 0.0, %v2839_v23 }
 0x2f0   : > { %v3810_v41 = vpop.eup %3809 }
 0x2f1   : > { %3087 = vst.msk [vmem:[%s4814_s23 + $0x48] sm:$0xff] %vm568_vm2, %v2767_v61 }
 0x2f2   : > { %3148 = vst.msk [vmem:[%s4814_s23 + $0x28] sm:$0xff] %vm3142_vm5, %v3019_v29  ;;  %v2197_v51 = vpop.permute.xlu0 %2196  ;;  %v5888_v29 = vld [vmem:[#allocation34_spill] sm:$0xff] }
 0x2f3   : > { %v2378_v27 = vsub.f32 %v3922_v14, %v2197_v51 }
 0x2f5   : > { %v2634_v59 = vmul.f32 %v3804_v54, %v2378_v27  ;;  %2212 = vrot.lane.b32.xlu0 %v4925_v46, %s3987_s18  ;;  %v3926_v54 = vld [vmem:[%s4063_s17 + $0x70] sm:$0xff] }
 0x2f6   : > { %v2193_v19 = vpop.permute.xlu0 %2192 }
 0x2f7   : > { %v2704_v56 = vmul.f32 %v4802_v58, %v2634_v59  ;;  %v2376_v42 = vsub.f32 %v3923_v39, %v2193_v19  ;;  %v3812_v19 = vpop.eup %3811 }
 0x2f9   : > { %v2768_v40 = vadd.f32 %v2704_v56, %v5885_v25  ;;  %v2632_v1 = vmul.f32 %v3806_v36, %v2376_v42  ;;  %2208 = vrot.lane.b32.xlu0 %v4928_v32, %s3987_s18  ;;  %v3927_v36 = vld [vmem:[%s4063_s17 + $0x60] sm:$0xff] }
 0x2fb   : > { %3088 = vst.msk [vmem:[%s4814_s23 + $0x50] sm:$0xff] %vm568_vm2, %v2768_v40  ;;  %v2702_v63 = vmul.f32 %v4802_v58, %v2632_v1  ;;  %v3814_v40 = vpop.eup %3813  ;;  %v5889_v1 = vld [vmem:[#allocation39_spill] sm:$0xff] }
 0x2fc   : > { %3153 = vst.msk [vmem:[%s4814_s23 + $0x50] sm:$0xff] %vm3142_vm5, %v3024_v26 }
 0x2fd   : > { %v2766_v2 = vadd.f32 %v2702_v63, %v5886_v22 }
 0x2ff   : > { %3086 = vst.msk [vmem:[%s4814_s23 + $0x40] sm:$0xff] %vm568_vm2, %v2766_v2 }
 0x300   : > { %3151 = vst.msk [vmem:[%s4814_s23 + $0x40] sm:$0xff] %vm3142_vm5, %v3022_v44  ;;  %v5890_v44 = vld [vmem:[#allocation33_spill] sm:$0xff] }
 0x30a   : > { %2889 = vadd.xlane.f32.xlu1 %v2888_v4  ;;  %v3695_v4 = vpop.f32.mrf.mxu0 }
 0x30c   : > { %v1952_v48 = vpop.f32.mrf.mxu0 }
 0x30d   : > { %v5048_v9 = vadd.f32 %v4741_v50, %v1952_v48 }
 0x30e   : > { %2883 = vadd.xlane.f32.xlu1 %v2882_v3  ;;  %v5045_v3 = vadd.f32 %v3695_v4, %v4741_v50  ;;  %v3696_v43 = vpop.f32.mrf.mxu0 }
 0x30f   : > { %v2894_v15 = vsel %vm568_vm2, %v5048_v9, 0.0 }
 0x310   : > { %v2900_v47 = vsel %vm568_vm2, %v5045_v3, 0.0 }
 0x318   : > { %2880 = vadd.xlane.f32.xlu0 %v2879_v16  ;;  %v2451_v16 = vsub.f32 0.0, %v4942_v52  ;;  %v5062_v52 = vadd.f32 %v3696_v43, %v4741_v50 }
 0x319   : > { %v2866_v31 = vpop.xlane.xlu1 %2865 }
 0x31a   : > { %v3028_v22 = vsub.f32 0.0, %v2866_v31  ;;  %v2534_v31 = vmul.f32 1.442695, %v2451_v16  ;;  %v2903_v43 = vsel %vm568_vm2, %v5062_v52, 0.0 }
 0x31c   : > { %2874 = vadd.xlane.f32.xlu0 %v2873_v10  ;;  %v2449_v10 = vsub.f32 0.0, %v4948_v0  ;;  %3815 = vpow2.f32 %v2534_v31 }
 0x31d   : > { %v2860_v37 = vpop.xlane.xlu1 %2859 }
 0x31e   : > { %v3026_v62 = vsub.f32 0.0, %v2860_v37  ;;  %v2530_v35 = vmul.f32 1.442695, %v2449_v10 }
 0x31f   : > { %2222 = vrot.lane.b32.xlu1 %v5002_v12, %s3987_s18 }
 0x320   : > { %3817 = vpow2.f32 %v2530_v35 }
 0x321   : > { %v2207_v34 = vpop.permute.xlu1 %2206 }
 0x322   : > { %v2383_v6 = vsub.f32 %v3924_v20, %v2207_v34  ;;  %v2532_v34 = vmul.f32 1.442695, %v2450_v28  ;;  %v2448_v20 = vsub.f32 0.0, %v4928_v32 }
 0x323   : > { %2218 = vrot.lane.b32.xlu1 %v5008_v8, %s3987_s18 }
 0x324   : > { %v2639_v7 = vmul.f32 %v3808_v24, %v2383_v6  ;;  %v1955_v6 = vpop.f32.mrf.mxu0  ;;  %3819 = vpow2.f32 %v2532_v34 }
 0x325   : > { %v2203_v45 = vpop.permute.xlu1 %2202  ;;  %v5068_v24 = vadd.f32 %v4741_v50, %v1955_v6 }
 0x326   : > { %v2709_v53 = vmul.f32 %v4802_v58, %v2639_v7  ;;  %v2381_v5 = vsub.f32 %v3925_v17, %v2203_v45  ;;  %v3928_v7 = vld [vmem:[%s4063_s17 + $0x98] sm:$0xff] }
 0x327   : > { %v2857_v30 = vpop.xlane.xlu0 %2856  ;;  %v2897_v34 = vsel %vm568_vm2, %v5068_v24, 0.0 }
 0x328   : > { %v2773_v13 = vadd.f32 %v2709_v53, %v5887_v21  ;;  %v2637_v57 = vmul.f32 %v3810_v41, %v2381_v5  ;;  %v3025_v23 = vsub.f32 0.0, %v2857_v30  ;;  %v2528_v53 = vmul.f32 1.442695, %v2448_v20  ;;  %v3929_v41 = vld [vmem:[%s4063_s17 + $0x88] sm:$0xff] }
 0x329   : > { %v3816_v45 = vpop.eup %3815  ;;  %v2454_v20 = vsub.f32 0.0, %v4985_v49 }
 0x32a   : > { %3093 = vst.msk [vmem:[%s4814_s23 + $0x78] sm:$0xff] %vm568_vm2, %v2773_v13  ;;  %v2707_v55 = vmul.f32 %v4802_v58, %v2637_v57  ;;  %3821 = vpow2.f32 %v2528_v53  ;;  %v5891_v57 = vld [vmem:[#allocation48_spill] sm:$0xff] }
 0x32b   : > { %3154 = vst.msk [vmem:[%s4814_s23 + $0x58] sm:$0xff] %vm3142_vm5, %v3025_v23  ;;  %v2851_v61 = vpop.xlane.xlu0 %2850 }
 0x32c   : > { %v2771_v51 = vadd.f32 %v2707_v55, %v5888_v29  ;;  %v3023_v14 = vsub.f32 0.0, %v2851_v61 }
 0x32d   : > { %v3818_v21 = vpop.eup %3817 }
 0x32e   : > { %3091 = vst.msk [vmem:[%s4814_s23 + $0x68] sm:$0xff] %vm568_vm2, %v2771_v51 }
 0x32f   : > { %3152 = vst.msk [vmem:[%s4814_s23 + $0x48] sm:$0xff] %vm3142_vm5, %v3023_v14  ;;  %v2205_v27 = vpop.permute.xlu0 %2204  ;;  %v5892_v14 = vld [vmem:[#allocation42_spill] sm:$0xff] }
 0x330   : > { %v2382_v59 = vsub.f32 %v3926_v54, %v2205_v27 }
 0x332   : > { %v2638_v56 = vmul.f32 %v3812_v19, %v2382_v59  ;;  %2220 = vrot.lane.b32.xlu0 %v4985_v49, %s3987_s18  ;;  %v3930_v19 = vld [vmem:[%s4063_s17 + $0x90] sm:$0xff] }
 0x333   : > { %v2201_v39 = vpop.permute.xlu0 %2200 }
 0x334   : > { %v2708_v42 = vmul.f32 %v4802_v58, %v2638_v56  ;;  %v2380_v25 = vsub.f32 %v3927_v36, %v2201_v39  ;;  %v3820_v39 = vpop.eup %3819 }
 0x336   : > { %v2772_v26 = vadd.f32 %v2708_v42, %v5889_v1  ;;  %v2636_v63 = vmul.f32 %v3814_v40, %v2380_v25  ;;  %2216 = vrot.lane.b32.xlu0 %v4988_v38, %s3987_s18  ;;  %v3931_v40 = vld [vmem:[%s4063_s17 + $0x80] sm:$0xff] }
 0x338   : > { %3092 = vst.msk [vmem:[%s4814_s23 + $0x70] sm:$0xff] %vm568_vm2, %v2772_v26  ;;  %v2706_v2 = vmul.f32 %v4802_v58, %v2636_v63  ;;  %v3822_v26 = vpop.eup %3821  ;;  %v5893_v63 = vld [vmem:[#allocation47_spill] sm:$0xff] }
 0x339   : > { %3157 = vst.msk [vmem:[%s4814_s23 + $0x70] sm:$0xff] %vm3142_vm5, %v3028_v22 }
 0x33a   : > { %v2770_v11 = vadd.f32 %v2706_v2, %v5890_v44 }
 0x33c   : > { %3090 = vst.msk [vmem:[%s4814_s23 + $0x60] sm:$0xff] %vm568_vm2, %v2770_v11 }
 0x33d   : > { %3155 = vst.msk [vmem:[%s4814_s23 + $0x60] sm:$0xff] %vm3142_vm5, %v3026_v62  ;;  %v5894_v62 = vld [vmem:[#allocation41_spill] sm:$0xff] }
 0x347   : > { %2901 = vadd.xlane.f32.xlu1 %v2900_v47  ;;  %v3699_v47 = vpop.f32.mrf.mxu0 }
 0x349   : > { %v1968_v16 = vpop.f32.mrf.mxu0 }
 0x34a   : > { %v5108_v31 = vadd.f32 %v4741_v50, %v1968_v16 }
 0x34b   : > { %2895 = vadd.xlane.f32.xlu1 %v2894_v15  ;;  %v5105_v15 = vadd.f32 %v3699_v47, %v4741_v50  ;;  %v3700_v6 = vpop.f32.mrf.mxu0 }
 0x34c   : > { %v2906_v35 = vsel %vm568_vm2, %v5108_v31, 0.0 }
 0x34d   : > { %v2912_v10 = vsel %vm568_vm2, %v5105_v15, 0.0 }
 0x355   : > { %2892 = vadd.xlane.f32.xlu0 %v2891_v33  ;;  %v2455_v33 = vsub.f32 0.0, %v5002_v12  ;;  %v5122_v12 = vadd.f32 %v3700_v6, %v4741_v50 }
 0x356   : > { %v2878_v37 = vpop.xlane.xlu1 %2877 }
 0x357   : > { %v3032_v44 = vsub.f32 0.0, %v2878_v37  ;;  %v2542_v37 = vmul.f32 1.442695, %v2455_v33  ;;  %v2915_v6 = vsel %vm568_vm2, %v5122_v12, 0.0 }
 0x359   : > { %2886 = vadd.xlane.f32.xlu0 %v2885_v60  ;;  %v2453_v60 = vsub.f32 0.0, %v5008_v8  ;;  %3823 = vpow2.f32 %v2542_v37 }
 0x35a   : > { %v2872_v0 = vpop.xlane.xlu1 %2871 }
 0x35b   : > { %v3030_v48 = vsub.f32 0.0, %v2872_v0  ;;  %v2538_v28 = vmul.f32 1.442695, %v2453_v60 }
 0x35c   : > { %2230 = vrot.lane.b32.xlu1 %v5062_v52, %s3987_s18 }
 0x35d   : > { %3825 = vpow2.f32 %v2538_v28 }
 0x35e   : > { %v2215_v18 = vpop.permute.xlu1 %2214 }
 0x35f   : > { %v2387_v46 = vsub.f32 %v3928_v7, %v2215_v18  ;;  %v2540_v18 = vmul.f32 1.442695, %v2454_v20  ;;  %v2452_v7 = vsub.f32 0.0, %v4988_v38 }
 0x360   : > { %2226 = vrot.lane.b32.xlu1 %v5068_v24, %s3987_s18 }
 0x361   : > { %v2643_v17 = vmul.f32 %v3816_v45, %v2387_v46  ;;  %v1971_v46 = vpop.f32.mrf.mxu0  ;;  %3827 = vpow2.f32 %v2540_v18 }
 0x362   : > { %v2211_v5 = vpop.permute.xlu1 %2210  ;;  %v5128_v45 = vadd.f32 %v4741_v50, %v1971_v46  ;;  %v2458_v46 = vsub.f32 0.0, %v5045_v3 }
 0x363   : > { %v2713_v32 = vmul.f32 %v4802_v58, %v2643_v17  ;;  %v2385_v30 = vsub.f32 %v3929_v41, %v2211_v5  ;;  %v3932_v17 = vld [vmem:[%s4063_s17 + $0xb8] sm:$0xff] }
 0x364   : > { %v2869_v13 = vpop.xlane.xlu0 %2868 }
 0x365   : > { %v2777_v23 = vadd.f32 %v2713_v32, %v5891_v57  ;;  %v2641_v55 = vmul.f32 %v3818_v21, %v2385_v30  ;;  %v3029_v61 = vsub.f32 0.0, %v2869_v13  ;;  %v2536_v32 = vmul.f32 1.442695, %v2452_v7  ;;  %v3933_v21 = vld [vmem:[%s4063_s17 + $0xa8] sm:$0xff] }
 0x366   : > { %v3824_v5 = vpop.eup %3823  ;;  %v2909_v7 = vsel %vm568_vm2, %v5128_v45, 0.0 }
 0x367   : > { %3097 = vst.msk [vmem:[%s4814_s23 + $0x98] sm:$0xff] %vm568_vm2, %v2777_v23  ;;  %v2711_v29 = vmul.f32 %v4802_v58, %v2641_v55  ;;  %3829 = vpow2.f32 %v2536_v32  ;;  %v5895_v55 = vld [vmem:[#allocation56_spill] sm:$0xff] }
 0x368   : > { %3158 = vst.msk [vmem:[%s4814_s23 + $0x78] sm:$0xff] %vm3142_vm5, %v3029_v61  ;;  %v2863_v51 = vpop.xlane.xlu0 %2862 }
 0x369   : > { %v2775_v27 = vadd.f32 %v2711_v29, %v5892_v14  ;;  %v3027_v54 = vsub.f32 0.0, %v2863_v51 }
 0x36a   : > { %v3826_v57 = vpop.eup %3825 }
 0x36b   : > { %3095 = vst.msk [vmem:[%s4814_s23 + $0x88] sm:$0xff] %vm568_vm2, %v2775_v27 }
 0x36c   : > { %3156 = vst.msk [vmem:[%s4814_s23 + $0x68] sm:$0xff] %vm3142_vm5, %v3027_v54  ;;  %v2213_v59 = vpop.permute.xlu0 %2212  ;;  %v5896_v54 = vld [vmem:[#allocation50_spill] sm:$0xff] }
 0x36d   : > { %v2386_v56 = vsub.f32 %v3930_v19, %v2213_v59 }
 0x36f   : > { %v2642_v42 = vmul.f32 %v3820_v39, %v2386_v56  ;;  %2228 = vrot.lane.b32.xlu0 %v5045_v3, %s3987_s18  ;;  %v3934_v39 = vld [vmem:[%s4063_s17 + $0xb0] sm:$0xff] }
 0x370   : > { %v2209_v36 = vpop.permute.xlu0 %2208 }
 0x371   : > { %v2712_v25 = vmul.f32 %v4802_v58, %v2642_v42  ;;  %v2384_v1 = vsub.f32 %v3931_v40, %v2209_v36  ;;  %v3828_v36 = vpop.eup %3827 }
 0x373   : > { %v2776_v22 = vadd.f32 %v2712_v25, %v5893_v63  ;;  %v2640_v2 = vmul.f32 %v3822_v26, %v2384_v1  ;;  %2224 = vrot.lane.b32.xlu0 %v5048_v9, %s3987_s18  ;;  %v3935_v26 = vld [vmem:[%s4063_s17 + $0xa0] sm:$0xff] }
 0x375   : > { %3096 = vst.msk [vmem:[%s4814_s23 + $0x90] sm:$0xff] %vm568_vm2, %v2776_v22  ;;  %v2710_v11 = vmul.f32 %v4802_v58, %v2640_v2  ;;  %v3830_v22 = vpop.eup %3829  ;;  %v5897_v2 = vld [vmem:[#allocation55_spill] sm:$0xff] }
 0x376   : > { %3161 = vst.msk [vmem:[%s4814_s23 + $0x90] sm:$0xff] %vm3142_vm5, %v3032_v44 }
 0x377   : > { %v2774_v4 = vadd.f32 %v2710_v11, %v5894_v62 }
 0x379   : > { %3094 = vst.msk [vmem:[%s4814_s23 + $0x80] sm:$0xff] %vm568_vm2, %v2774_v4 }
 0x37a   : > { %3159 = vst.msk [vmem:[%s4814_s23 + $0x80] sm:$0xff] %vm3142_vm5, %v3030_v48  ;;  %v5898_v48 = vld [vmem:[#allocation49_spill] sm:$0xff] }
 0x384   : > { %2913 = vadd.xlane.f32.xlu1 %v2912_v10  ;;  %v3703_v10 = vpop.f32.mrf.mxu0 }
 0x386   : > { %v1984_v33 = vpop.f32.mrf.mxu0 }
 0x387   : > { %v5168_v37 = vadd.f32 %v4741_v50, %v1984_v33 }
 0x388   : > { %2907 = vadd.xlane.f32.xlu1 %v2906_v35  ;;  %v5165_v35 = vadd.f32 %v3703_v10, %v4741_v50  ;;  %v3704_v18 = vpop.f32.mrf.mxu0 }
 0x389   : > { %v2918_v28 = vsel %vm568_vm2, %v5168_v37, 0.0 }
 0x38a   : > { %v2924_v60 = vsel %vm568_vm2, %v5165_v35, 0.0 }
 0x392   : > { %2904 = vadd.xlane.f32.xlu0 %v2903_v43  ;;  %v2459_v43 = vsub.f32 0.0, %v5062_v52  ;;  %v5182_v52 = vadd.f32 %v3704_v18, %v4741_v50  ;;  %v2461_v18 = vsub.f32 0.0, %v5128_v45 }
 0x393   : > { %v2890_v0 = vpop.xlane.xlu1 %2889 }
 0x394   : > { %v3036_v62 = vsub.f32 0.0, %v2890_v0  ;;  %v2550_v0 = vmul.f32 1.442695, %v2459_v43 }
 0x396   : > { %2898 = vadd.xlane.f32.xlu0 %v2897_v34  ;;  %v2457_v34 = vsub.f32 0.0, %v5068_v24  ;;  %3831 = vpow2.f32 %v2550_v0 }
 0x397   : > { %v2884_v8 = vpop.xlane.xlu1 %2883 }
 0x398   : > { %v3034_v16 = vsub.f32 0.0, %v2884_v8  ;;  %v2546_v20 = vmul.f32 1.442695, %v2457_v34 }
 0x399   : > { %2238 = vrot.lane.b32.xlu1 %v5122_v12, %s3987_s18 }
 0x39a   : > { %3833 = vpow2.f32 %v2546_v20 }
 0x39b   : > { %v2223_v53 = vpop.permute.xlu1 %2222 }
 0x39c   : > { %v2391_v49 = vsub.f32 %v3932_v17, %v2223_v53  ;;  %v1987_v53 = vpop.f32.mrf.mxu0  ;;  %v2548_v17 = vmul.f32 1.442695, %v2458_v46  ;;  %v2927_v46 = vsel %vm568_vm2, %v5182_v52, 0.0 }
 0x39d   : > { %2234 = vrot.lane.b32.xlu1 %v5128_v45, %s3987_s18 }
 0x39e   : > { %v2647_v41 = vmul.f32 %v3824_v5, %v2391_v49  ;;  %v2456_v49 = vsub.f32 0.0, %v5048_v9  ;;  %v5188_v5 = vadd.f32 %v4741_v50, %v1987_v53  ;;  %3835 = vpow2.f32 %v2548_v17  ;;  %v3937_v9 = vld [vmem:[%s4063_s17 + $0xc8] sm:$0xff]  ;;  %v3707_v33 = vpop.f32.mrf.mxu0 }
 0x39f   : > { %v2219_v30 = vpop.permute.xlu1 %2218 }
 0x3a0   : > { %v2717_v38 = vmul.f32 %v4802_v58, %v2647_v41  ;;  %v2389_v13 = vsub.f32 %v3933_v21, %v2219_v30  ;;  %v3936_v41 = vld [vmem:[%s4063_s17 + $0xd8] sm:$0xff]  ;;  %v2000_v43 = vpop.f32.mrf.mxu0  ;;  %v2921_v17 = vsel %vm568_vm2, %v5188_v5, 0.0 }
 0x3a1   : > { %v2881_v23 = vpop.xlane.xlu0 %2880 }
 0x3a2   : > { %v2781_v61 = vadd.f32 %v2717_v38, %v5895_v55  ;;  %v2645_v29 = vmul.f32 %v3826_v57, %v2389_v13  ;;  %v3033_v51 = vsub.f32 0.0, %v2881_v23  ;;  %v2544_v38 = vmul.f32 1.442695, %v2456_v49  ;;  %v3708_v53 = vpop.f32.mrf.mxu0 }
 0x3a3   : > { %v3832_v3 = vpop.eup %3831  ;;  %v2462_v49 = vsub.f32 0.0, %v5105_v15 }
 0x3a4   : > { %3101 = vst.msk [vmem:[%s4814_s23 + $0xb8] sm:$0xff] %vm568_vm2, %v2781_v61  ;;  %v2715_v14 = vmul.f32 %v4802_v58, %v2645_v29  ;;  %3837 = vpow2.f32 %v2544_v38  ;;  %v5899_v61 = vld [vmem:[#allocation62_spill] sm:$0xff] }
 0x3a5   : > { %3162 = vst.msk [vmem:[%s4814_s23 + $0x98] sm:$0xff] %vm3142_vm5, %v3033_v51  ;;  %v2875_v27 = vpop.xlane.xlu0 %2874 }
 0x3a6   : > { %v2779_v59 = vadd.f32 %v2715_v14, %v5896_v54  ;;  %v3031_v19 = vsub.f32 0.0, %v2875_v27 }
 0x3a7   : > { %v3834_v23 = vpop.eup %3833 }
 0x3a8   : > { %3099 = vst.msk [vmem:[%s4814_s23 + $0xa8] sm:$0xff] %vm568_vm2, %v2779_v59  ;;  %v5900_v59 = vld [vmem:[#allocation58_spill] sm:$0xff] }
 0x3a9   : > { %3160 = vst.msk [vmem:[%s4814_s23 + $0x88] sm:$0xff] %vm3142_vm5, %v3031_v19  ;;  %v2221_v56 = vpop.permute.xlu0 %2220 }
 0x3aa   : > { %v2390_v42 = vsub.f32 %v3934_v39, %v2221_v56 }
 0x3ac   : > { %v2646_v25 = vmul.f32 %v3828_v36, %v2390_v42  ;;  %2236 = vrot.lane.b32.xlu0 %v5105_v15, %s3987_s18  ;;  %v3938_v42 = vld [vmem:[%s4063_s17 + $0xd0] sm:$0xff] }
 0x3ad   : > { %v2217_v40 = vpop.permute.xlu0 %2216 }
 0x3ae   : > { %v2716_v1 = vmul.f32 %v4802_v58, %v2646_v25  ;;  %v2388_v63 = vsub.f32 %v3935_v26, %v2217_v40  ;;  %v3836_v25 = vpop.eup %3835 }
 0x3b0   : > { %v2780_v44 = vadd.f32 %v2716_v1, %v5897_v2  ;;  %v2644_v11 = vmul.f32 %v3830_v22, %v2388_v63  ;;  %2232 = vrot.lane.b32.xlu0 %v5108_v31, %s3987_s18  ;;  %v3939_v63 = vld [vmem:[%s4063_s17 + $0xc0] sm:$0xff] }
 0x3b1   : > { %v3838_v2 = vpop.eup %3837 }
 0x3b2   : > { %3100 = vst.msk [vmem:[%s4814_s23 + $0xb0] sm:$0xff] %vm568_vm2, %v2780_v44  ;;  %v2714_v4 = vmul.f32 %v4802_v58, %v2644_v11  ;;  %v5901_v44 = vld [vmem:[#allocation61_spill] sm:$0xff] }
 0x3b3   : > { %3165 = vst.msk [vmem:[%s4814_s23 + $0xb0] sm:$0xff] %vm3142_vm5, %v3036_v62 }
 0x3b4   : > { %v2778_v47 = vadd.f32 %v2714_v4, %v5898_v48 }
 0x3b6   : > { %3098 = vst.msk [vmem:[%s4814_s23 + $0xa0] sm:$0xff] %vm568_vm2, %v2778_v47  ;;  %v5902_v47 = vld [vmem:[#allocation57_spill] sm:$0xff] }
 0x3b7   : > { %3163 = vst.msk [vmem:[%s4814_s23 + $0xa0] sm:$0xff] %vm3142_vm5, %v3034_v16 }
 0x3c1   : > { %2925 = vadd.xlane.f32.xlu1 %v2924_v60  ;;  %v5227_v60 = vld [vmem:[%s5731_s7] ss:$0 sm:$0xff] }
 0x3c2   : > { %v5233_v0 = vadd.f32 %v5227_v60, %v2000_v43 }
 0x3c4   : > { %v2930_v20 = vsel %vm568_vm2, %v5233_v0, 0.0 }
 0x3c5   : > { %2919 = vadd.xlane.f32.xlu1 %v2918_v28  ;;  %v5230_v28 = vadd.f32 %v5227_v60, %v3707_v33 }
 0x3c7   : > { %v2936_v34 = vsel %vm568_vm2, %v5230_v28, 0.0 }
 0x3cf   : > { %2916 = vadd.xlane.f32.xlu0 %v2915_v6  ;;  %v2463_v6 = vsub.f32 0.0, %v5122_v12  ;;  %v5247_v12 = vadd.f32 %v5227_v60, %v3708_v53  ;;  %v2465_v53 = vsub.f32 0.0, %v5188_v5 }
 0x3d0   : > { %v2902_v8 = vpop.xlane.xlu1 %2901 }
 0x3d1   : > { %v3040_v4 = vsub.f32 0.0, %v2902_v8  ;;  %v2558_v8 = vmul.f32 1.442695, %v2463_v6 }
 0x3d3   : > { %2910 = vadd.xlane.f32.xlu0 %v2909_v7  ;;  %3839 = vpow2.f32 %v2558_v8  ;;  %v2554_v7 = vmul.f32 1.442695, %v2461_v18 }
 0x3d4   : > { %v2896_v24 = vpop.xlane.xlu1 %2895 }
 0x3d5   : > { %v3038_v10 = vsub.f32 0.0, %v2896_v24  ;;  %3841 = vpow2.f32 %v2554_v7 }
 0x3d6   : > { %2246 = vrot.lane.b32.xlu1 %v5182_v52, %s3987_s18 }
 0x3d8   : > { %v2231_v32 = vpop.permute.xlu1 %2230 }
 0x3d9   : > { %v2395_v30 = vsub.f32 %v3936_v41, %v2231_v32  ;;  %v2003_v32 = vpop.f32.mrf.mxu0  ;;  %v2556_v41 = vmul.f32 1.442695, %v2462_v49  ;;  %v2939_v49 = vsel %vm568_vm2, %v5247_v12, 0.0 }
 0x3da   : > { %2242 = vrot.lane.b32.xlu1 %v5188_v5, %s3987_s18 }
 0x3db   : > { %v2651_v21 = vmul.f32 %v3832_v3, %v2395_v30  ;;  %v2460_v30 = vsub.f32 0.0, %v5108_v31  ;;  %v5253_v3 = vadd.f32 %v5227_v60, %v2003_v32  ;;  %3843 = vpow2.f32 %v2556_v41  ;;  %v3942_v31 = vld [vmem:[%s4063_s17 + $0xe8] sm:$0xff] }
 0x3dc   : > { %v2227_v13 = vpop.permute.xlu1 %2226 }
 0x3dd   : > { %v2721_v57 = vmul.f32 %v4802_v58, %v2651_v21  ;;  %v2393_v50 = vsub.f32 %v3937_v9, %v2227_v13  ;;  %v3941_v21 = vld [vmem:[%s4063_s17 + $0xf8] sm:$0xff]  ;;  %v2933_v41 = vsel %vm568_vm2, %v5253_v3, 0.0 }
 0x3de   : > { %v2893_v55 = vpop.xlane.xlu0 %2892 }
 0x3df   : > { %v2785_v29 = vadd.f32 %v2721_v57, %v5899_v61  ;;  %v2649_v51 = vmul.f32 %v3834_v23, %v2393_v50  ;;  %v3037_v14 = vsub.f32 0.0, %v2893_v55  ;;  %v2552_v57 = vmul.f32 1.442695, %v2460_v30 }
 0x3e0   : > { %v3840_v15 = vpop.eup %3839  ;;  %v2466_v30 = vsub.f32 0.0, %v5165_v35 }
 0x3e1   : > { %3105 = vst.msk [vmem:[%s4814_s23 + $0xd8] sm:$0xff] %vm568_vm2, %v2785_v29  ;;  %v2719_v27 = vmul.f32 %v4802_v58, %v2649_v51  ;;  %3845 = vpow2.f32 %v2552_v57  ;;  %v5903_v51 = vld [vmem:[#allocation66_spill] sm:$0xff] }
 0x3e2   : > { %3166 = vst.msk [vmem:[%s4814_s23 + $0xb8] sm:$0xff] %vm3142_vm5, %v3037_v14  ;;  %v2887_v54 = vpop.xlane.xlu0 %2886  ;;  %v3842_v61 = vpop.eup %3841 }
 0x3e3   : > { %v2783_v19 = vadd.f32 %v2719_v27, %v5900_v59  ;;  %v3035_v56 = vsub.f32 0.0, %v2887_v54 }
 0x3e5   : > { %3103 = vst.msk [vmem:[%s4814_s23 + $0xc8] sm:$0xff] %vm568_vm2, %v2783_v19 }
 0x3e6   : > { %3164 = vst.msk [vmem:[%s4814_s23 + $0xa8] sm:$0xff] %vm3142_vm5, %v3035_v56  ;;  %v2229_v39 = vpop.permute.xlu0 %2228  ;;  %v5904_v56 = vld [vmem:[#allocation64_spill] sm:$0xff] }
 0x3e7   : > { %v2394_v36 = vsub.f32 %v3938_v42, %v2229_v39 }
 0x3e9   : > { %v2650_v40 = vmul.f32 %v3836_v25, %v2394_v36  ;;  %2244 = vrot.lane.b32.xlu0 %v5165_v35, %s3987_s18  ;;  %v3943_v25 = vld [vmem:[%s4063_s17 + $0xf0] sm:$0xff] }
 0x3ea   : > { %v2225_v1 = vpop.permute.xlu0 %2224 }
 0x3eb   : > { %v2720_v26 = vmul.f32 %v4802_v58, %v2650_v40  ;;  %v2392_v22 = vsub.f32 %v3939_v63, %v2225_v1  ;;  %v3844_v1 = vpop.eup %3843 }
 0x3ed   : > { %v2784_v11 = vadd.f32 %v2720_v26, %v5901_v44  ;;  %v2648_v62 = vmul.f32 %v3838_v2, %v2392_v22  ;;  %2240 = vrot.lane.b32.xlu0 %v5168_v37, %s3987_s18  ;;  %v3944_v2 = vld [vmem:[%s4063_s17 + $0xe0] sm:$0xff] }
 0x3ef   : > { %3104 = vst.msk [vmem:[%s4814_s23 + $0xd0] sm:$0xff] %vm568_vm2, %v2784_v11  ;;  %v2718_v48 = vmul.f32 %v4802_v58, %v2648_v62  ;;  %v3846_v11 = vpop.eup %3845  ;;  %v5905_v62 = vld [vmem:[#allocation65_spill] sm:$0xff] }
 0x3f0   : > { %3169 = vst.msk [vmem:[%s4814_s23 + $0xd0] sm:$0xff] %vm3142_vm5, %v3040_v4 }
 0x3f1   : > { %v2782_v16 = vadd.f32 %v2718_v48, %v5902_v47 }
 0x3f3   : > { %3102 = vst.msk [vmem:[%s4814_s23 + $0xc0] sm:$0xff] %vm568_vm2, %v2782_v16 }
 0x3f4   : > { %3167 = vst.msk [vmem:[%s4814_s23 + $0xc0] sm:$0xff] %vm3142_vm5, %v3038_v10  ;;  %v5906_v10 = vld [vmem:[#allocation63_spill] sm:$0xff] }
 0x3fe   : > { %2937 = vadd.xlane.f32.xlu1 %v2936_v34  ;;  %v3711_v34 = vpop.f32.mrf.mxu0 }
 0x400   : > { %v2016_v6 = vpop.f32.mrf.mxu0 }
 0x401   : > { %v5293_v8 = vadd.f32 %v5227_v60, %v2016_v6 }
 0x402   : > { %2931 = vadd.xlane.f32.xlu1 %v2930_v20  ;;  %v5290_v20 = vadd.f32 %v5227_v60, %v3711_v34  ;;  %v3712_v32 = vpop.f32.mrf.mxu0 }
 0x403   : > { %v2942_v7 = vsel %vm568_vm2, %v5293_v8, 0.0 }
 0x404   : > { %v2948_v18 = vsel %vm568_vm2, %v5290_v20, 0.0 }
 0x40c   : > { %2928 = vadd.xlane.f32.xlu0 %v2927_v46  ;;  %v2467_v46 = vsub.f32 0.0, %v5182_v52  ;;  %v5307_v52 = vadd.f32 %v5227_v60, %v3712_v32  ;;  %v2469_v32 = vsub.f32 0.0, %v5253_v3 }
 0x40d   : > { %v2914_v24 = vpop.xlane.xlu1 %2913 }
 0x40e   : > { %v3044_v47 = vsub.f32 0.0, %v2914_v24  ;;  %v2566_v24 = vmul.f32 1.442695, %v2467_v46 }
 0x410   : > { %2922 = vadd.xlane.f32.xlu0 %v2921_v17  ;;  %3847 = vpow2.f32 %v2566_v24  ;;  %v2562_v17 = vmul.f32 1.442695, %v2465_v53 }
 0x411   : > { %v2908_v45 = vpop.xlane.xlu1 %2907 }
 0x412   : > { %v3042_v43 = vsub.f32 0.0, %v2908_v45  ;;  %3849 = vpow2.f32 %v2562_v17 }
 0x413   : > { %2254 = vrot.lane.b32.xlu1 %v5247_v12, %s3987_s18 }
 0x415   : > { %v2239_v38 = vpop.permute.xlu1 %2238 }
 0x416   : > { %v2399_v13 = vsub.f32 %v3941_v21, %v2239_v38  ;;  %v2019_v38 = vpop.f32.mrf.mxu0  ;;  %v2564_v21 = vmul.f32 1.442695, %v2466_v30  ;;  %v2951_v30 = vsel %vm568_vm2, %v5307_v52, 0.0 }
 0x417   : > { %2250 = vrot.lane.b32.xlu1 %v5253_v3, %s3987_s18 }
 0x418   : > { %v2655_v9 = vmul.f32 %v3840_v15, %v2399_v13  ;;  %v2464_v13 = vsub.f32 0.0, %v5168_v37  ;;  %v5313_v15 = vadd.f32 %v5227_v60, %v2019_v38  ;;  %3851 = vpow2.f32 %v2564_v21  ;;  %v3946_v37 = vld [vmem:[%s4063_s17 + $0x108] sm:$0xff] }
 0x419   : > { %v2235_v50 = vpop.permute.xlu1 %2234 }
 0x41a   : > { %v2725_v23 = vmul.f32 %v4802_v58, %v2655_v9  ;;  %v2397_v55 = vsub.f32 %v3942_v31, %v2235_v50  ;;  %v3945_v9 = vld [vmem:[%s4063_s17 + $0x118] sm:$0xff]  ;;  %v2945_v21 = vsel %vm568_vm2, %v5313_v15, 0.0 }
 0x41b   : > { %v2905_v29 = vpop.xlane.xlu0 %2904 }
 0x41c   : > { %v2789_v14 = vadd.f32 %v2725_v23, %v5903_v51  ;;  %v2653_v27 = vmul.f32 %v3842_v61, %v2397_v55  ;;  %v3041_v54 = vsub.f32 0.0, %v2905_v29  ;;  %v2560_v23 = vmul.f32 1.442695, %v2464_v13 }
 0x41d   : > { %v3848_v35 = vpop.eup %3847  ;;  %v2470_v13 = vsub.f32 0.0, %v5230_v28 }
 0x41e   : > { %3109 = vst.msk [vmem:[%s4814_s23 + $0xf8] sm:$0xff] %vm568_vm2, %v2789_v14  ;;  %v2723_v59 = vmul.f32 %v4802_v58, %v2653_v27  ;;  %3853 = vpow2.f32 %v2560_v23  ;;  %v5907_v27 = vld [vmem:[#allocation6_spill] sm:$0xff] }
 0x41f   : > { %3170 = vst.msk [vmem:[%s4814_s23 + $0xd8] sm:$0xff] %vm3142_vm5, %v3041_v54  ;;  %v2899_v19 = vpop.xlane.xlu0 %2898  ;;  %v3850_v51 = vpop.eup %3849 }
 0x420   : > { %v2787_v39 = vadd.f32 %v2723_v59, %v5904_v56  ;;  %v3039_v42 = vsub.f32 0.0, %v2899_v19 }
 0x422   : > { %3107 = vst.msk [vmem:[%s4814_s23 + $0xe8] sm:$0xff] %vm568_vm2, %v2787_v39 }
 0x423   : > { %3168 = vst.msk [vmem:[%s4814_s23 + $0xc8] sm:$0xff] %vm3142_vm5, %v3039_v42  ;;  %v2237_v36 = vpop.permute.xlu0 %2236  ;;  %v5908_v42 = vld [vmem:[#allocation4_spill] sm:$0xff] }
 0x424   : > { %v2398_v40 = vsub.f32 %v3943_v25, %v2237_v36 }
 0x426   : > { %v2654_v26 = vmul.f32 %v3844_v1, %v2398_v40  ;;  %2252 = vrot.lane.b32.xlu0 %v5230_v28, %s3987_s18  ;;  %v3947_v1 = vld [vmem:[%s4063_s17 + $0x110] sm:$0xff] }
 0x427   : > { %v2233_v63 = vpop.permute.xlu0 %2232 }
 0x428   : > { %v2724_v22 = vmul.f32 %v4802_v58, %v2654_v26  ;;  %v2396_v44 = vsub.f32 %v3944_v2, %v2233_v63  ;;  %v3852_v63 = vpop.eup %3851 }
 0x42a   : > { %v2788_v4 = vadd.f32 %v2724_v22, %v5905_v62  ;;  %v2652_v48 = vmul.f32 %v3846_v11, %v2396_v44  ;;  %2248 = vrot.lane.b32.xlu0 %v5233_v0, %s3987_s18  ;;  %v3948_v11 = vld [vmem:[%s4063_s17 + $0x100] sm:$0xff] }
 0x42c   : > { %3108 = vst.msk [vmem:[%s4814_s23 + $0xf0] sm:$0xff] %vm568_vm2, %v2788_v4  ;;  %v2722_v16 = vmul.f32 %v4802_v58, %v2652_v48  ;;  %v3854_v4 = vpop.eup %3853  ;;  %v5909_v48 = vld [vmem:[#allocation5_spill] sm:$0xff] }
 0x42d   : > { %3173 = vst.msk [vmem:[%s4814_s23 + $0xf0] sm:$0xff] %vm3142_vm5, %v3044_v47 }
 0x42e   : > { %v2786_v33 = vadd.f32 %v2722_v16, %v5906_v10 }
 0x430   : > { %3106 = vst.msk [vmem:[%s4814_s23 + $0xe0] sm:$0xff] %vm568_vm2, %v2786_v33 }
 0x431   : > { %3171 = vst.msk [vmem:[%s4814_s23 + $0xe0] sm:$0xff] %vm3142_vm5, %v3042_v43  ;;  %v5910_v43 = vld [vmem:[#allocation3_spill] sm:$0xff] }
 0x43b   : > { %2949 = vadd.xlane.f32.xlu1 %v2948_v18  ;;  %v3715_v18 = vpop.f32.mrf.mxu0 }
 0x43d   : > { %v2032_v46 = vpop.f32.mrf.mxu0 }
 0x43e   : > { %v5353_v24 = vadd.f32 %v5227_v60, %v2032_v46 }
 0x43f   : > { %2943 = vadd.xlane.f32.xlu1 %v2942_v7  ;;  %v5350_v7 = vadd.f32 %v5227_v60, %v3715_v18  ;;  %v3716_v38 = vpop.f32.mrf.mxu0 }
 0x440   : > { %v2954_v17 = vsel %vm568_vm2, %v5353_v24, 0.0 }
 0x441   : > { %v2960_v53 = vsel %vm568_vm2, %v5350_v7, 0.0 }
 0x449   : > { %2940 = vadd.xlane.f32.xlu0 %v2939_v49  ;;  %v2471_v49 = vsub.f32 0.0, %v5247_v12  ;;  %v5367_v12 = vadd.f32 %v5227_v60, %v3716_v38  ;;  %v2473_v38 = vsub.f32 0.0, %v5313_v15 }
 0x44a   : > { %v2926_v45 = vpop.xlane.xlu1 %2925 }
 0x44b   : > { %v3048_v10 = vsub.f32 0.0, %v2926_v45  ;;  %v2574_v45 = vmul.f32 1.442695, %v2471_v49 }
 0x44d   : > { %2934 = vadd.xlane.f32.xlu0 %v2933_v41  ;;  %3855 = vpow2.f32 %v2574_v45  ;;  %v2570_v41 = vmul.f32 1.442695, %v2469_v32 }
 0x44e   : > { %v2920_v5 = vpop.xlane.xlu1 %2919 }
 0x44f   : > { %v3046_v6 = vsub.f32 0.0, %v2920_v5  ;;  %3857 = vpow2.f32 %v2570_v41 }
 0x450   : > { %2262 = vrot.lane.b32.xlu1 %v5307_v52, %s3987_s18 }
 0x452   : > { %v2247_v57 = vpop.permute.xlu1 %2246 }
 0x453   : > { %v2403_v50 = vsub.f32 %v3945_v9, %v2247_v57  ;;  %v2035_v57 = vpop.f32.mrf.mxu0  ;;  %v2572_v9 = vmul.f32 1.442695, %v2470_v13  ;;  %v2963_v13 = vsel %vm568_vm2, %v5367_v12, 0.0 }
 0x454   : > { %2258 = vrot.lane.b32.xlu1 %v5313_v15, %s3987_s18 }
 0x455   : > { %v2659_v31 = vmul.f32 %v3848_v35, %v2403_v50  ;;  %v2468_v50 = vsub.f32 0.0, %v5233_v0  ;;  %v5373_v35 = vadd.f32 %v5227_v60, %v2035_v57  ;;  %3859 = vpow2.f32 %v2572_v9  ;;  %v3950_v0 = vld [vmem:[%s4063_s17 + $0x128] sm:$0xff] }
 0x456   : > { %v2243_v55 = vpop.permute.xlu1 %2242 }
 0x457   : > { %v2729_v61 = vmul.f32 %v4802_v58, %v2659_v31  ;;  %v2401_v29 = vsub.f32 %v3946_v37, %v2243_v55  ;;  %v3949_v31 = vld [vmem:[%s4063_s17 + $0x138] sm:$0xff]  ;;  %v2957_v9 = vsel %vm568_vm2, %v5373_v35, 0.0 }
 0x458   : > { %v2917_v14 = vpop.xlane.xlu0 %2916 }
 0x459   : > { %v2793_v54 = vadd.f32 %v2729_v61, %v5907_v27  ;;  %v2657_v59 = vmul.f32 %v3850_v51, %v2401_v29  ;;  %v3045_v19 = vsub.f32 0.0, %v2917_v14  ;;  %v2568_v61 = vmul.f32 1.442695, %v2468_v50 }
 0x45a   : > { %v3856_v28 = vpop.eup %3855  ;;  %v2474_v50 = vsub.f32 0.0, %v5290_v20 }
 0x45b   : > { %3113 = vst.msk [vmem:[%s4814_s23 + $0x118] sm:$0xff] %vm568_vm2, %v2793_v54  ;;  %v2727_v56 = vmul.f32 %v4802_v58, %v2657_v59  ;;  %3861 = vpow2.f32 %v2568_v61  ;;  %v5911_v59 = vld [vmem:[#allocation10_spill] sm:$0xff] }
 0x45c   : > { %3174 = vst.msk [vmem:[%s4814_s23 + $0xf8] sm:$0xff] %vm3142_vm5, %v3045_v19  ;;  %v2911_v39 = vpop.xlane.xlu0 %2910  ;;  %v3858_v27 = vpop.eup %3857 }
 0x45d   : > { %v2791_v36 = vadd.f32 %v2727_v56, %v5908_v42  ;;  %v3043_v25 = vsub.f32 0.0, %v2911_v39 }
 0x45f   : > { %3111 = vst.msk [vmem:[%s4814_s23 + $0x108] sm:$0xff] %vm568_vm2, %v2791_v36 }
 0x460   : > { %3172 = vst.msk [vmem:[%s4814_s23 + $0xe8] sm:$0xff] %vm3142_vm5, %v3043_v25  ;;  %v2245_v40 = vpop.permute.xlu0 %2244  ;;  %v5912_v25 = vld [vmem:[#allocation8_spill] sm:$0xff] }
 0x461   : > { %v2402_v26 = vsub.f32 %v3947_v1, %v2245_v40 }
 0x463   : > { %v2658_v22 = vmul.f32 %v3852_v63, %v2402_v26  ;;  %2260 = vrot.lane.b32.xlu0 %v5290_v20, %s3987_s18  ;;  %v3951_v63 = vld [vmem:[%s4063_s17 + $0x130] sm:$0xff] }
 0x464   : > { %v2241_v2 = vpop.permute.xlu0 %2240 }
 0x465   : > { %v2728_v44 = vmul.f32 %v4802_v58, %v2658_v22  ;;  %v2400_v62 = vsub.f32 %v3948_v11, %v2241_v2  ;;  %v3860_v2 = vpop.eup %3859 }
 0x467   : > { %v2792_v47 = vadd.f32 %v2728_v44, %v5909_v48  ;;  %v2656_v16 = vmul.f32 %v3854_v4, %v2400_v62  ;;  %2256 = vrot.lane.b32.xlu0 %v5293_v8, %s3987_s18  ;;  %v3952_v4 = vld [vmem:[%s4063_s17 + $0x120] sm:$0xff] }
 0x469   : > { %3112 = vst.msk [vmem:[%s4814_s23 + $0x110] sm:$0xff] %vm568_vm2, %v2792_v47  ;;  %v2726_v33 = vmul.f32 %v4802_v58, %v2656_v16  ;;  %v3862_v47 = vpop.eup %3861  ;;  %v5913_v16 = vld [vmem:[#allocation9_spill] sm:$0xff] }
 0x46a   : > { %3177 = vst.msk [vmem:[%s4814_s23 + $0x110] sm:$0xff] %vm3142_vm5, %v3048_v10 }
 0x46b   : > { %v2790_v34 = vadd.f32 %v2726_v33, %v5910_v43 }
 0x46d   : > { %3110 = vst.msk [vmem:[%s4814_s23 + $0x100] sm:$0xff] %vm568_vm2, %v2790_v34 }
 0x46e   : > { %3175 = vst.msk [vmem:[%s4814_s23 + $0x100] sm:$0xff] %vm3142_vm5, %v3046_v6  ;;  %v5914_v6 = vld [vmem:[#allocation7_spill] sm:$0xff] }
 0x478   : > { %2961 = vadd.xlane.f32.xlu1 %v2960_v53  ;;  %v3719_v53 = vpop.f32.mrf.mxu0 }
 0x47a   : > { %v2048_v49 = vpop.f32.mrf.mxu0 }
 0x47b   : > { %v5413_v45 = vadd.f32 %v5227_v60, %v2048_v49 }
 0x47c   : > { %2955 = vadd.xlane.f32.xlu1 %v2954_v17  ;;  %v5410_v17 = vadd.f32 %v5227_v60, %v3719_v53  ;;  %v3720_v57 = vpop.f32.mrf.mxu0 }
 0x47d   : > { %v2966_v41 = vsel %vm568_vm2, %v5413_v45, 0.0 }
 0x47e   : > { %v2972_v32 = vsel %vm568_vm2, %v5410_v17, 0.0 }
 0x486   : > { %2952 = vadd.xlane.f32.xlu0 %v2951_v30  ;;  %v2475_v30 = vsub.f32 0.0, %v5307_v52  ;;  %v5427_v52 = vadd.f32 %v5227_v60, %v3720_v57  ;;  %v2477_v57 = vsub.f32 0.0, %v5373_v35 }
 0x487   : > { %v2938_v5 = vpop.xlane.xlu1 %2937 }
 0x488   : > { %v3052_v43 = vsub.f32 0.0, %v2938_v5  ;;  %v2582_v5 = vmul.f32 1.442695, %v2475_v30 }
 0x48a   : > { %2946 = vadd.xlane.f32.xlu0 %v2945_v21  ;;  %3863 = vpow2.f32 %v2582_v5  ;;  %v2578_v21 = vmul.f32 1.442695, %v2473_v38 }
 0x48b   : > { %v2932_v3 = vpop.xlane.xlu1 %2931 }
 0x48c   : > { %v3050_v46 = vsub.f32 0.0, %v2932_v3  ;;  %3865 = vpow2.f32 %v2578_v21 }
 0x48d   : > { %2270 = vrot.lane.b32.xlu1 %v5367_v12, %s3987_s18 }
 0x48f   : > { %v2255_v23 = vpop.permute.xlu1 %2254 }
 0x490   : > { %v2407_v55 = vsub.f32 %v3949_v31, %v2255_v23  ;;  %v2051_v23 = vpop.f32.mrf.mxu0  ;;  %v2580_v31 = vmul.f32 1.442695, %v2474_v50  ;;  %v2975_v50 = vsel %vm568_vm2, %v5427_v52, 0.0 }
 0x491   : > { %2266 = vrot.lane.b32.xlu1 %v5373_v35, %s3987_s18 }
 0x492   : > { %v2663_v37 = vmul.f32 %v3856_v28, %v2407_v55  ;;  %v2472_v55 = vsub.f32 0.0, %v5293_v8  ;;  %v5433_v28 = vadd.f32 %v5227_v60, %v2051_v23  ;;  %3867 = vpow2.f32 %v2580_v31  ;;  %v3954_v8 = vld [vmem:[%s4063_s17 + $0x148] sm:$0xff] }
 0x493   : > { %v2251_v29 = vpop.permute.xlu1 %2250 }
 0x494   : > { %v2733_v51 = vmul.f32 %v4802_v58, %v2663_v37  ;;  %v2405_v14 = vsub.f32 %v3950_v0, %v2251_v29  ;;  %v3953_v37 = vld [vmem:[%s4063_s17 + $0x158] sm:$0xff]  ;;  %v2969_v31 = vsel %vm568_vm2, %v5433_v28, 0.0 }
 0x495   : > { %v2929_v54 = vpop.xlane.xlu0 %2928 }
 0x496   : > { %v2797_v19 = vadd.f32 %v2733_v51, %v5911_v59  ;;  %v2661_v56 = vmul.f32 %v3858_v27, %v2405_v14  ;;  %v3049_v39 = vsub.f32 0.0, %v2929_v54  ;;  %v2576_v51 = vmul.f32 1.442695, %v2472_v55 }
 0x497   : > { %v3864_v20 = vpop.eup %3863  ;;  %v2478_v55 = vsub.f32 0.0, %v5350_v7 }
 0x498   : > { %3117 = vst.msk [vmem:[%s4814_s23 + $0x138] sm:$0xff] %vm568_vm2, %v2797_v19  ;;  %v2731_v42 = vmul.f32 %v4802_v58, %v2661_v56  ;;  %3869 = vpow2.f32 %v2576_v51  ;;  %v5915_v56 = vld [vmem:[#allocation17_spill] sm:$0xff] }
 0x499   : > { %3178 = vst.msk [vmem:[%s4814_s23 + $0x118] sm:$0xff] %vm3142_vm5, %v3049_v39  ;;  %v2923_v36 = vpop.xlane.xlu0 %2922  ;;  %v3866_v59 = vpop.eup %3865 }
 0x49a   : > { %v2795_v40 = vadd.f32 %v2731_v42, %v5912_v25  ;;  %v3047_v1 = vsub.f32 0.0, %v2923_v36 }
 0x49c   : > { %3115 = vst.msk [vmem:[%s4814_s23 + $0x128] sm:$0xff] %vm568_vm2, %v2795_v40 }
 0x49d   : > { %3176 = vst.msk [vmem:[%s4814_s23 + $0x108] sm:$0xff] %vm3142_vm5, %v3047_v1  ;;  %v2253_v26 = vpop.permute.xlu0 %2252  ;;  %v5916_v1 = vld [vmem:[#allocation12_spill] sm:$0xff] }
 0x49e   : > { %v2406_v22 = vsub.f32 %v3951_v63, %v2253_v26 }
 0x4a0   : > { %v2662_v44 = vmul.f32 %v3860_v2, %v2406_v22  ;;  %2268 = vrot.lane.b32.xlu0 %v5350_v7, %s3987_s18  ;;  %v3955_v2 = vld [vmem:[%s4063_s17 + $0x150] sm:$0xff] }
 0x4a1   : > { %v2249_v11 = vpop.permute.xlu0 %2248 }
 0x4a2   : > { %v2732_v62 = vmul.f32 %v4802_v58, %v2662_v44  ;;  %v2404_v48 = vsub.f32 %v3952_v4, %v2249_v11  ;;  %v3868_v11 = vpop.eup %3867 }
 0x4a4   : > { %v2796_v10 = vadd.f32 %v2732_v62, %v5913_v16  ;;  %v2660_v33 = vmul.f32 %v3862_v47, %v2404_v48  ;;  %2264 = vrot.lane.b32.xlu0 %v5353_v24, %s3987_s18  ;;  %v3956_v47 = vld [vmem:[%s4063_s17 + $0x140] sm:$0xff] }
 0x4a6   : > { %3116 = vst.msk [vmem:[%s4814_s23 + $0x130] sm:$0xff] %vm568_vm2, %v2796_v10  ;;  %v2730_v34 = vmul.f32 %v4802_v58, %v2660_v33  ;;  %v3870_v10 = vpop.eup %3869  ;;  %v5917_v33 = vld [vmem:[#allocation16_spill] sm:$0xff] }
 0x4a7   : > { %3181 = vst.msk [vmem:[%s4814_s23 + $0x130] sm:$0xff] %vm3142_vm5, %v3052_v43 }
 0x4a8   : > { %v2794_v18 = vadd.f32 %v2730_v34, %v5914_v6 }
 0x4aa   : > { %3114 = vst.msk [vmem:[%s4814_s23 + $0x120] sm:$0xff] %vm568_vm2, %v2794_v18 }
 0x4ab   : > { %3179 = vst.msk [vmem:[%s4814_s23 + $0x120] sm:$0xff] %vm3142_vm5, %v3050_v46  ;;  %v5918_v46 = vld [vmem:[#allocation11_spill] sm:$0xff] }
 0x4b5   : > { %2973 = vadd.xlane.f32.xlu1 %v2972_v32  ;;  %v3723_v32 = vpop.f32.mrf.mxu0 }
 0x4b7   : > { %v2064_v30 = vpop.f32.mrf.mxu0 }
 0x4b8   : > { %v5473_v5 = vadd.f32 %v5227_v60, %v2064_v30 }
 0x4b9   : > { %2967 = vadd.xlane.f32.xlu1 %v2966_v41  ;;  %v5470_v41 = vadd.f32 %v5227_v60, %v3723_v32  ;;  %v3724_v23 = vpop.f32.mrf.mxu0 }
 0x4ba   : > { %v2978_v21 = vsel %vm568_vm2, %v5473_v5, 0.0 }
 0x4bb   : > { %v2984_v38 = vsel %vm568_vm2, %v5470_v41, 0.0 }
 0x4c3   : > { %2964 = vadd.xlane.f32.xlu0 %v2963_v13  ;;  %v2479_v13 = vsub.f32 0.0, %v5367_v12  ;;  %v5487_v12 = vadd.f32 %v5227_v60, %v3724_v23  ;;  %v2481_v23 = vsub.f32 0.0, %v5433_v28 }
 0x4c4   : > { %v2950_v3 = vpop.xlane.xlu1 %2949 }
 0x4c5   : > { %v3056_v6 = vsub.f32 0.0, %v2950_v3  ;;  %v2590_v3 = vmul.f32 1.442695, %v2479_v13 }
 0x4c7   : > { %2958 = vadd.xlane.f32.xlu0 %v2957_v9  ;;  %3871 = vpow2.f32 %v2590_v3  ;;  %v2586_v9 = vmul.f32 1.442695, %v2477_v57 }
 0x4c8   : > { %v2944_v15 = vpop.xlane.xlu1 %2943 }
 0x4c9   : > { %v3054_v49 = vsub.f32 0.0, %v2944_v15  ;;  %3873 = vpow2.f32 %v2586_v9 }
 0x4ca   : > { %2278 = vrot.lane.b32.xlu1 %v5427_v52, %s3987_s18 }
 0x4cc   : > { %v2263_v61 = vpop.permute.xlu1 %2262 }
 0x4cd   : > { %v2411_v29 = vsub.f32 %v3953_v37, %v2263_v61  ;;  %v2067_v61 = vpop.f32.mrf.mxu0  ;;  %v2588_v37 = vmul.f32 1.442695, %v2478_v55  ;;  %v2987_v55 = vsel %vm568_vm2, %v5487_v12, 0.0 }
 0x4ce   : > { %2274 = vrot.lane.b32.xlu1 %v5433_v28, %s3987_s18 }
 0x4cf   : > { %v2667_v0 = vmul.f32 %v3864_v20, %v2411_v29  ;;  %v2476_v29 = vsub.f32 0.0, %v5353_v24  ;;  %v5493_v20 = vadd.f32 %v5227_v60, %v2067_v61  ;;  %3875 = vpow2.f32 %v2588_v37  ;;  %v3958_v24 = vld [vmem:[%s4063_s17 + $0x168] sm:$0xff] }
 0x4d0   : > { %v2259_v14 = vpop.permute.xlu1 %2258 }
 0x4d1   : > { %v2737_v27 = vmul.f32 %v4802_v58, %v2667_v0  ;;  %v2409_v54 = vsub.f32 %v3954_v8, %v2259_v14  ;;  %v3957_v0 = vld [vmem:[%s4063_s17 + $0x178] sm:$0xff]  ;;  %v2981_v37 = vsel %vm568_vm2, %v5493_v20, 0.0 }
 0x4d2   : > { %v2941_v19 = vpop.xlane.xlu0 %2940 }
 0x4d3   : > { %v2801_v39 = vadd.f32 %v2737_v27, %v5915_v56  ;;  %v2665_v42 = vmul.f32 %v3866_v59, %v2409_v54  ;;  %v3053_v36 = vsub.f32 0.0, %v2941_v19  ;;  %v2584_v27 = vmul.f32 1.442695, %v2476_v29 }
 0x4d4   : > { %v3872_v7 = vpop.eup %3871  ;;  %v2482_v29 = vsub.f32 0.0, %v5410_v17 }
 0x4d5   : > { %3121 = vst.msk [vmem:[%s4814_s23 + $0x158] sm:$0xff] %vm568_vm2, %v2801_v39  ;;  %v2735_v25 = vmul.f32 %v4802_v58, %v2665_v42  ;;  %3877 = vpow2.f32 %v2584_v27  ;;  %v5919_v42 = vld [vmem:[#allocation28_spill] sm:$0xff] }
 0x4d6   : > { %3182 = vst.msk [vmem:[%s4814_s23 + $0x138] sm:$0xff] %vm3142_vm5, %v3053_v36  ;;  %v2935_v40 = vpop.xlane.xlu0 %2934  ;;  %v3874_v56 = vpop.eup %3873 }
 0x4d7   : > { %v2799_v26 = vadd.f32 %v2735_v25, %v5916_v1  ;;  %v3051_v63 = vsub.f32 0.0, %v2935_v40 }
 0x4d9   : > { %3119 = vst.msk [vmem:[%s4814_s23 + $0x148] sm:$0xff] %vm568_vm2, %v2799_v26 }
 0x4da   : > { %3180 = vst.msk [vmem:[%s4814_s23 + $0x128] sm:$0xff] %vm3142_vm5, %v3051_v63  ;;  %v2261_v22 = vpop.permute.xlu0 %2260  ;;  %v5920_v63 = vld [vmem:[#allocation20_spill] sm:$0xff] }
 0x4db   : > { %v2410_v44 = vsub.f32 %v3955_v2, %v2261_v22 }
 0x4dd   : > { %v2666_v62 = vmul.f32 %v3868_v11, %v2410_v44  ;;  %2276 = vrot.lane.b32.xlu0 %v5410_v17, %s3987_s18  ;;  %v3959_v11 = vld [vmem:[%s4063_s17 + $0x170] sm:$0xff] }
 0x4de   : > { %v2257_v4 = vpop.permute.xlu0 %2256 }
 0x4df   : > { %v2736_v48 = vmul.f32 %v4802_v58, %v2666_v62  ;;  %v2408_v16 = vsub.f32 %v3956_v47, %v2257_v4  ;;  %v3876_v4 = vpop.eup %3875 }
 0x4e1   : > { %v2800_v43 = vadd.f32 %v2736_v48, %v5917_v33  ;;  %v2664_v34 = vmul.f32 %v3870_v10, %v2408_v16  ;;  %2272 = vrot.lane.b32.xlu0 %v5413_v45, %s3987_s18  ;;  %v3960_v10 = vld [vmem:[%s4063_s17 + $0x160] sm:$0xff] }
 0x4e3   : > { %3120 = vst.msk [vmem:[%s4814_s23 + $0x150] sm:$0xff] %vm568_vm2, %v2800_v43  ;;  %v2734_v18 = vmul.f32 %v4802_v58, %v2664_v34  ;;  %v3878_v43 = vpop.eup %3877  ;;  %v5921_v34 = vld [vmem:[#allocation27_spill] sm:$0xff] }
 0x4e4   : > { %3185 = vst.msk [vmem:[%s4814_s23 + $0x150] sm:$0xff] %vm3142_vm5, %v3056_v6 }
 0x4e5   : > { %v2798_v53 = vadd.f32 %v2734_v18, %v5918_v46 }
 0x4e7   : > { %3118 = vst.msk [vmem:[%s4814_s23 + $0x140] sm:$0xff] %vm568_vm2, %v2798_v53 }
 0x4e8   : > { %3183 = vst.msk [vmem:[%s4814_s23 + $0x140] sm:$0xff] %vm3142_vm5, %v3054_v49  ;;  %v5922_v49 = vld [vmem:[#allocation18_spill] sm:$0xff] }
 0x4f2   : > { %2985 = vadd.xlane.f32.xlu1 %v2984_v38  ;;  %v3727_v38 = vpop.f32.mrf.mxu0 }
 0x4f4   : > { %v2080_v13 = vpop.f32.mrf.mxu0 }
 0x4f5   : > { %v5533_v3 = vadd.f32 %v5227_v60, %v2080_v13 }
 0x4f6   : > { %2979 = vadd.xlane.f32.xlu1 %v2978_v21  ;;  %v5530_v21 = vadd.f32 %v5227_v60, %v3727_v38  ;;  %v3728_v61 = vpop.f32.mrf.mxu0 }
 0x4f7   : > { %v2990_v9 = vsel %vm568_vm2, %v5533_v3, 0.0 }
 0x4f8   : > { %v2996_v57 = vsel %vm568_vm2, %v5530_v21, 0.0 }
 0x500   : > { %2976 = vadd.xlane.f32.xlu0 %v2975_v50  ;;  %v2483_v50 = vsub.f32 0.0, %v5427_v52  ;;  %v5547_v52 = vadd.f32 %v5227_v60, %v3728_v61 }
 0x501   : > { %v2962_v15 = vpop.xlane.xlu1 %2961 }
 0x502   : > { %v3060_v46 = vsub.f32 0.0, %v2962_v15  ;;  %v2598_v15 = vmul.f32 1.442695, %v2483_v50 }
 0x504   : > { %2970 = vadd.xlane.f32.xlu0 %v2969_v31  ;;  %3879 = vpow2.f32 %v2598_v15  ;;  %v2594_v31 = vmul.f32 1.442695, %v2481_v23  ;;  %v2487_v23 = vsub.f32 0.0, %v5487_v12 }
 0x505   : > { %v2956_v35 = vpop.xlane.xlu1 %2955 }
 0x506   : > { %v3058_v30 = vsub.f32 0.0, %v2956_v35  ;;  %3881 = vpow2.f32 %v2594_v31  ;;  %v2606_v31 = vmul.f32 1.442695, %v2487_v23 }
 0x507   : > { %2286 = vrot.lane.b32.xlu1 %v5487_v12, %s3987_s18 }
 0x509   : > { %v2271_v51 = vpop.permute.xlu1 %2270 }
 0x50a   : > { %v2415_v14 = vsub.f32 %v3957_v0, %v2271_v51  ;;  %v2083_v51 = vpop.f32.mrf.mxu0  ;;  %v2596_v0 = vmul.f32 1.442695, %v2482_v29 }
 0x50b   : > { %2282 = vrot.lane.b32.xlu1 %v5493_v20, %s3987_s18 }
 0x50c   : > { %v2671_v8 = vmul.f32 %v3872_v7, %v2415_v14  ;;  %v2480_v14 = vsub.f32 0.0, %v5413_v45  ;;  %v5553_v7 = vadd.f32 %v5227_v60, %v2083_v51  ;;  %3883 = vpow2.f32 %v2596_v0  ;;  %v3962_v45 = vld [vmem:[%s4063_s17 + $0x188] sm:$0xff]  ;;  %v3731_v13 = vpop.f32.mrf.mxu0 }
 0x50d   : > { %v2267_v54 = vpop.permute.xlu1 %2266 }
 0x50e   : > { %v2741_v59 = vmul.f32 %v4802_v58, %v2671_v8  ;;  %v2413_v19 = vsub.f32 %v3958_v24, %v2267_v54  ;;  %v3961_v8 = vld [vmem:[%s4063_s17 + $0x198] sm:$0xff]  ;;  %v2993_v12 = vsel %vm568_vm2, %v5553_v7, 0.0  ;;  %v2489_v23 = vsub.f32 0.0, %v5553_v7 }
 0x50f   : > { %v2953_v39 = vpop.xlane.xlu0 %2952 }
 0x510   : > { %v2805_v36 = vadd.f32 %v2741_v59, %v5919_v42  ;;  %v2669_v25 = vmul.f32 %v3874_v56, %v2413_v19  ;;  %v3057_v40 = vsub.f32 0.0, %v2953_v39  ;;  %v2592_v59 = vmul.f32 1.442695, %v2480_v14 }
 0x511   : > { %v3880_v17 = vpop.eup %3879 }
 0x512   : > { %3125 = vst.msk [vmem:[%s4814_s23 + $0x178] sm:$0xff] %vm568_vm2, %v2805_v36  ;;  %v2739_v1 = vmul.f32 %v4802_v58, %v2669_v25  ;;  %3885 = vpow2.f32 %v2592_v59  ;;  %v5923_v25 = vld [vmem:[#allocation36_spill] sm:$0xff] }
 0x513   : > { %3186 = vst.msk [vmem:[%s4814_s23 + $0x158] sm:$0xff] %vm3142_vm5, %v3057_v40  ;;  %v2947_v26 = vpop.xlane.xlu0 %2946  ;;  %v3882_v42 = vpop.eup %3881  ;;  %3887 = vpow2.f32 %v2606_v31  ;;  %v2610_v31 = vmul.f32 1.442695, %v2489_v23 }
 0x514   : > { %v2803_v22 = vadd.f32 %v2739_v1, %v5920_v63  ;;  %v3055_v2 = vsub.f32 0.0, %v2947_v26 }
 0x516   : > { %3123 = vst.msk [vmem:[%s4814_s23 + $0x168] sm:$0xff] %vm568_vm2, %v2803_v22 }
 0x517   : > { %3184 = vst.msk [vmem:[%s4814_s23 + $0x148] sm:$0xff] %vm3142_vm5, %v3055_v2  ;;  %v2269_v44 = vpop.permute.xlu0 %2268  ;;  %v5924_v2 = vld [vmem:[#allocation30_spill] sm:$0xff] }
 0x518   : > { %v2414_v62 = vsub.f32 %v3959_v11, %v2269_v44 }
 0x51a   : > { %v2670_v48 = vmul.f32 %v3876_v4, %v2414_v62  ;;  %2284 = vrot.lane.b32.xlu0 %v5470_v41, %s3987_s18  ;;  %v3963_v4 = vld [vmem:[%s4063_s17 + $0x190] sm:$0xff] }
 0x51b   : > { %v2265_v47 = vpop.permute.xlu0 %2264 }
 0x51c   : > { %v2740_v16 = vmul.f32 %v4802_v58, %v2670_v48  ;;  %v2412_v33 = vsub.f32 %v3960_v10, %v2265_v47  ;;  %v3884_v47 = vpop.eup %3883 }
 0x51e   : > { %v2804_v6 = vadd.f32 %v2740_v16, %v5921_v34  ;;  %v2668_v18 = vmul.f32 %v3878_v43, %v2412_v33  ;;  %2280 = vrot.lane.b32.xlu0 %v5473_v5, %s3987_s18  ;;  %v3964_v43 = vld [vmem:[%s4063_s17 + $0x180] sm:$0xff] }
 0x520   : > { %3124 = vst.msk [vmem:[%s4814_s23 + $0x170] sm:$0xff] %vm568_vm2, %v2804_v6  ;;  %v2738_v53 = vmul.f32 %v4802_v58, %v2668_v18  ;;  %v3886_v6 = vpop.eup %3885  ;;  %v5925_v18 = vld [vmem:[#allocation35_spill] sm:$0xff] }
 0x521   : > { %3189 = vst.msk [vmem:[%s4814_s23 + $0x170] sm:$0xff] %vm3142_vm5, %v3060_v46 }
 0x522   : > { %v2802_v32 = vadd.f32 %v2738_v53, %v5922_v49 }
 0x524   : > { %3122 = vst.msk [vmem:[%s4814_s23 + $0x160] sm:$0xff] %vm568_vm2, %v2802_v32 }
 0x525   : > { %3187 = vst.msk [vmem:[%s4814_s23 + $0x160] sm:$0xff] %vm3142_vm5, %v3058_v30  ;;  %v5926_v30 = vld [vmem:[#allocation29_spill] sm:$0xff] }
 0x52f   : > { %2997 = vadd.xlane.f32.xlu1 %v2996_v57 }
 0x533   : > { %2991 = vadd.xlane.f32.xlu1 %v2990_v9  ;;  %v2096_v9 = vpop.f32.mrf.mxu0 }
 0x534   : > { %v5590_v50 = vadd.f32 %v5227_v60, %v2096_v9  ;;  %v2491_v9 = vsub.f32 0.0, %v5547_v52 }
 0x535   : > { %v3732_v61 = vpop.f32.mrf.mxu0 }
 0x536   : > { %v3002_v15 = vsel %vm568_vm2, %v5590_v50, 0.0  ;;  %v5599_v29 = vadd.f32 %v5227_v60, %v3732_v61  ;;  %v2492_v23 = vsub.f32 0.0, %v5590_v50 }
 0x537   : > { %v2099_v51 = vpop.f32.mrf.mxu0 }
 0x538   : > { %v5607_v0 = vadd.f32 %v5227_v60, %v2099_v51  ;;  %v3011_v61 = vsel %vm568_vm2, %v5599_v29, 0.0  ;;  %v2488_v51 = vsub.f32 0.0, %v5533_v3 }
 0x53d   : > { %2988 = vadd.xlane.f32.xlu0 %v2987_v55  ;;  %v2485_v55 = vsub.f32 0.0, %v5493_v20  ;;  %v2486_v20 = vsub.f32 0.0, %v5470_v41 }
 0x53e   : > { %v2974_v35 = vpop.xlane.xlu1 %2973 }
 0x53f   : > { %v3064_v49 = vsub.f32 0.0, %v2974_v35  ;;  %v2602_v35 = vmul.f32 1.442695, %v2485_v55  ;;  %v3005_v55 = vsel %vm568_vm2, %v5607_v0, 0.0 }
 0x541   : > { %2982 = vadd.xlane.f32.xlu0 %v2981_v37  ;;  %v2999_v37 = vsel %vm568_vm2, %v5547_v52, 0.0  ;;  %3889 = vpow2.f32 %v2602_v35 }
 0x542   : > { %v2968_v28 = vpop.xlane.xlu1 %2967 }
 0x543   : > { %v3062_v57 = vsub.f32 0.0, %v2968_v28 }
 0x544   : > { %2294 = vrot.lane.b32.xlu1 %v5547_v52, %s3987_s18 }
 0x546   : > { %v2279_v27 = vpop.permute.xlu1 %2278 }
 0x547   : > { %v2419_v54 = vsub.f32 %v3961_v8, %v2279_v27  ;;  %v2604_v27 = vmul.f32 1.442695, %v2486_v20  ;;  %v2484_v8 = vsub.f32 0.0, %v5473_v5  ;;  %v5927_v5 = vld [vmem:[#allocation44_spill] sm:$0xff] }
 0x548   : > { %2290 = vrot.lane.b32.xlu1 %v5553_v7, %s3987_s18 }
 0x549   : > { %v2675_v24 = vmul.f32 %v3880_v17, %v2419_v54  ;;  %v3965_v17 = vld [vmem:[%s4063_s17 + $0x1b8] sm:$0xff]  ;;  %3891 = vpow2.f32 %v2604_v27  ;;  %v2600_v41 = vmul.f32 1.442695, %v2484_v8  ;;  %v2608_v27 = vmul.f32 1.442695, %v2488_v51 }
 0x54a   : > { %v2275_v19 = vpop.permute.xlu1 %2274 }
 0x54b   : > { %v2745_v56 = vmul.f32 %v4802_v58, %v2675_v24  ;;  %v2417_v39 = vsub.f32 %v3962_v45, %v2275_v19  ;;  %v3888_v24 = vpop.eup %3887  ;;  %3893 = vpow2.f32 %v2600_v41 }
 0x54c   : > { %v2965_v36 = vpop.xlane.xlu0 %2964 }
 0x54d   : > { %v2809_v40 = vadd.f32 %v2745_v56, %v5923_v25  ;;  %v2673_v1 = vmul.f32 %v3882_v42, %v2417_v39  ;;  %v3061_v26 = vsub.f32 0.0, %v2965_v36  ;;  %v3966_v39 = vld [vmem:[%s4063_s17 + $0x1a8] sm:$0xff] }
 0x54e   : > { %v3890_v36 = vpop.eup %3889 }
 0x54f   : > { %3129 = vst.msk [vmem:[%s4814_s23 + $0x198] sm:$0xff] %vm568_vm2, %v2809_v40  ;;  %v2743_v63 = vmul.f32 %v4802_v58, %v2673_v1 }
 0x550   : > { %3190 = vst.msk [vmem:[%s4814_s23 + $0x178] sm:$0xff] %vm3142_vm5, %v3061_v26  ;;  %v2959_v22 = vpop.xlane.xlu0 %2958 }
 0x551   : > { %v2807_v44 = vadd.f32 %v2743_v63, %v5924_v2  ;;  %v3059_v11 = vsub.f32 0.0, %v2959_v22  ;;  %v5928_v2 = vld [vmem:[#allocation38_spill] sm:$0xff] }
 0x553   : > { %3127 = vst.msk [vmem:[%s4814_s23 + $0x188] sm:$0xff] %vm568_vm2, %v2807_v44 }
 0x554   : > { %3188 = vst.msk [vmem:[%s4814_s23 + $0x168] sm:$0xff] %vm3142_vm5, %v3059_v11  ;;  %v2277_v62 = vpop.permute.xlu0 %2276 }
 0x555   : > { %v2418_v48 = vsub.f32 %v3963_v4, %v2277_v62  ;;  %v5627_v4 = vadd.f32 %v5227_v60, %v3731_v13 }
 0x557   : > { %v2674_v16 = vmul.f32 %v3884_v47, %v2418_v48  ;;  %2292 = vrot.lane.b32.xlu0 %v5530_v21, %s3987_s18  ;;  %v3967_v48 = vld [vmem:[%s4063_s17 + $0x1b0] sm:$0xff] }
 0x558   : > { %v2273_v10 = vpop.permute.xlu0 %2272 }
 0x559   : > { %v2744_v33 = vmul.f32 %v4802_v58, %v2674_v16  ;;  %v2416_v34 = vsub.f32 %v3964_v43, %v2273_v10  ;;  %v3892_v16 = vpop.eup %3891 }
 0x55b   : > { %v2808_v46 = vadd.f32 %v2744_v33, %v5925_v18  ;;  %v2672_v53 = vmul.f32 %v3886_v6, %v2416_v34  ;;  %2288 = vrot.lane.b32.xlu0 %v5533_v3, %s3987_s18  ;;  %v3968_v34 = vld [vmem:[%s4063_s17 + $0x1a0] sm:$0xff]  ;;  %v3894_v18 = vpop.eup %3893  ;;  %v5931_v3 = vld [vmem:[#allocation52_spill] sm:$0xff] }
 0x55d   : > { %3128 = vst.msk [vmem:[%s4814_s23 + $0x190] sm:$0xff] %vm568_vm2, %v2808_v46  ;;  %v2742_v32 = vmul.f32 %v4802_v58, %v2672_v53  ;;  %v5929_v46 = vld [vmem:[#allocation43_spill] sm:$0xff] }
 0x55e   : > { %3193 = vst.msk [vmem:[%s4814_s23 + $0x190] sm:$0xff] %vm3142_vm5, %v3064_v49 }
 0x55f   : > { %v2806_v38 = vadd.f32 %v2742_v32, %v5926_v30  ;;  %v5930_v30 = vld [vmem:[#allocation37_spill] sm:$0xff] }
 0x561   : > { %3126 = vst.msk [vmem:[%s4814_s23 + $0x180] sm:$0xff] %vm568_vm2, %v2806_v38 }
 0x562   : > { %3191 = vst.msk [vmem:[%s4814_s23 + $0x180] sm:$0xff] %vm3142_vm5, %v3062_v57  ;;  %v3008_v57 = vsel %vm568_vm2, %v5627_v4, 0.0 }
 0x56c   : > { %3003 = vadd.xlane.f32.xlu1 %v3002_v15  ;;  %v2614_v15 = vmul.f32 1.442695, %v2491_v9 }
 0x56e   : > { %3895 = vpow2.f32 %v2614_v15 }
 0x56f   : > { %3897 = vpow2.f32 %v2610_v31 }
 0x57a   : > { %3000 = vadd.xlane.f32.xlu0 %v2999_v37  ;;  %v2490_v37 = vsub.f32 0.0, %v5530_v21  ;;  %v3970_v21 = vld [vmem:[%s4063_s17 + $0x1c8] sm:$0xff] }
 0x57b   : > { %v2986_v28 = vpop.xlane.xlu1 %2985 }
 0x57c   : > { %v3068_v49 = vsub.f32 0.0, %v2986_v28  ;;  %v2612_v28 = vmul.f32 1.442695, %v2490_v37  ;;  %v5935_v37 = vld [vmem:[#allocation60_spill] sm:$0xff] }
 0x57d   : > { %2302 = vrot.lane.b32.xlu1 %v5599_v29, %s3987_s18 }
 0x57e   : > { %2994 = vadd.xlane.f32.xlu0 %v2993_v12  ;;  %v3969_v12 = vld [vmem:[%s4063_s17 + $0x1d8] sm:$0xff]  ;;  %3899 = vpow2.f32 %v2612_v28 }
 0x57f   : > { %v2980_v14 = vpop.xlane.xlu1 %2979  ;;  %3901 = vpow2.f32 %v2608_v27 }
 0x580   : > { %v3066_v13 = vsub.f32 0.0, %v2980_v14  ;;  %v3896_v14 = vpop.eup %3895 }
 0x581   : > { %2298 = vrot.lane.b32.xlu1 %v5607_v0, %s3987_s18 }
 0x583   : > { %v2287_v54 = vpop.permute.xlu1 %2286 }
 0x584   : > { %v2423_v59 = vsub.f32 %v3965_v17, %v2287_v54 }
 0x586   : > { %v2679_v19 = vmul.f32 %v3888_v24, %v2423_v59  ;;  %v3898_v24 = vpop.eup %3897 }
 0x587   : > { %v2283_v56 = vpop.permute.xlu1 %2282 }
 0x588   : > { %v2749_v45 = vmul.f32 %v4802_v58, %v2679_v19  ;;  %v2421_v42 = vsub.f32 %v3966_v39, %v2283_v56 }
 0x589   : > { %v2977_v25 = vpop.xlane.xlu0 %2976 }
 0x58a   : > { %v2813_v40 = vadd.f32 %v2749_v45, %v5927_v5  ;;  %v2677_v1 = vmul.f32 %v3890_v36, %v2421_v42  ;;  %v3065_v26 = vsub.f32 0.0, %v2977_v25  ;;  %v5932_v36 = vld [vmem:[#allocation46_spill] sm:$0xff] }
 0x58c   : > { %3133 = vst.msk [vmem:[%s4814_s23 + $0x1b8] sm:$0xff] %vm568_vm2, %v2813_v40  ;;  %v2747_v63 = vmul.f32 %v4802_v58, %v2677_v1  ;;  %v3971_v1 = vld [vmem:[%s4063_s17 + $0x1d0] sm:$0xff] }
 0x58d   : > { %3194 = vst.msk [vmem:[%s4814_s23 + $0x198] sm:$0xff] %vm3142_vm5, %v3065_v26  ;;  %v2971_v22 = vpop.xlane.xlu0 %2970 }
 0x58e   : > { %v2811_v44 = vadd.f32 %v2747_v63, %v5928_v2  ;;  %v3063_v11 = vsub.f32 0.0, %v2971_v22  ;;  %v3900_v63 = vpop.eup %3899 }
 0x590   : > { %3131 = vst.msk [vmem:[%s4814_s23 + $0x1a8] sm:$0xff] %vm568_vm2, %v2811_v44 }
 0x591   : > { %3192 = vst.msk [vmem:[%s4814_s23 + $0x188] sm:$0xff] %vm3142_vm5, %v3063_v11  ;;  %v2285_v62 = vpop.permute.xlu0 %2284  ;;  %v3972_v11 = vld [vmem:[%s4063_s17 + $0x1c0] sm:$0xff] }
 0x592   : > { %v2422_v47 = vsub.f32 %v3967_v48, %v2285_v62  ;;  %v3902_v48 = vpop.eup %3901 }
 0x594   : > { %v2678_v10 = vmul.f32 %v3892_v16, %v2422_v47  ;;  %2300 = vrot.lane.b32.xlu0 %v5627_v4, %s3987_s18  ;;  %v5933_v47 = vld [vmem:[#allocation51_spill] sm:$0xff] }
 0x595   : > { %v2281_v33 = vpop.permute.xlu0 %2280 }
 0x596   : > { %v2748_v43 = vmul.f32 %v4802_v58, %v2678_v10  ;;  %v2420_v6 = vsub.f32 %v3968_v34, %v2281_v33  ;;  %v5934_v34 = vld [vmem:[#allocation45_spill] sm:$0xff] }
 0x598   : > { %v2812_v53 = vadd.f32 %v2748_v43, %v5929_v46  ;;  %v2676_v60 = vmul.f32 %v3894_v18, %v2420_v6  ;;  %2296 = vrot.lane.b32.xlu0 %v5590_v50, %s3987_s18  ;;  %v2495_v46 = vsub.f32 0.0, %v5599_v29 }
 0x59a   : > { %3132 = vst.msk [vmem:[%s4814_s23 + $0x1b0] sm:$0xff] %vm568_vm2, %v2812_v53  ;;  %v2746_v32 = vmul.f32 %v4802_v58, %v2676_v60  ;;  %v2622_v53 = vmul.f32 1.442695, %v2495_v46  ;;  %v2493_v60 = vsub.f32 0.0, %v5607_v0 }
 0x59b   : > { %3197 = vst.msk [vmem:[%s4814_s23 + $0x1b0] sm:$0xff] %vm3142_vm5, %v3068_v49 }
 0x59c   : > { %v2810_v38 = vadd.f32 %v2746_v32, %v5930_v30  ;;  %3903 = vpow2.f32 %v2622_v53  ;;  %v2618_v49 = vmul.f32 1.442695, %v2493_v60  ;;  %v2494_v30 = vsub.f32 0.0, %v5627_v4 }
 0x59d   : > { %v2616_v4 = vmul.f32 1.442695, %v2492_v23 }
 0x59e   : > { %3130 = vst.msk [vmem:[%s4814_s23 + $0x1a0] sm:$0xff] %vm568_vm2, %v2810_v38  ;;  %3905 = vpow2.f32 %v2618_v49  ;;  %v2620_v15 = vmul.f32 1.442695, %v2494_v30 }
 0x59f   : > { %3195 = vst.msk [vmem:[%s4814_s23 + $0x1a0] sm:$0xff] %vm3142_vm5, %v3066_v13  ;;  %v3973_v13 = vld [vmem:[%s4063_s17 + $0x1f8] sm:$0xff] }
 0x5a0   : > { %3907 = vpow2.f32 %v2620_v15 }
 0x5a1   : > { %3909 = vpow2.f32 %v2616_v4 }
 0x5a5   : > { %3009 = vadd.xlane.f32.xlu1 %v3008_v57 }
 0x5a9   : > { %v3904_v9 = vpop.eup %3903 }
 0x5b7   : > { %3006 = vadd.xlane.f32.xlu0 %v3005_v55  ;;  %v3974_v55 = vld [vmem:[%s4063_s17 + $0x1e8] sm:$0xff] }
 0x5b8   : > { %v2998_v35 = vpop.xlane.xlu1 %2997 }
 0x5b9   : > { %v3072_v33 = vsub.f32 0.0, %v2998_v35 }
 0x5bb   : > { %3012 = vadd.xlane.f32.xlu0 %v3011_v61  ;;  %v3906_v61 = vpop.eup %3905 }
 0x5bc   : > { %v2992_v52 = vpop.xlane.xlu1 %2991 }
 0x5bd   : > { %v3070_v18 = vsub.f32 0.0, %v2992_v52 }
 0x5c0   : > { %v2295_v7 = vpop.permute.xlu1 %2294 }
 0x5c1   : > { %v2427_v20 = vsub.f32 %v3969_v12, %v2295_v7  ;;  %v5936_v7 = vld [vmem:[#allocation54_spill] sm:$0xff] }
 0x5c3   : > { %v2683_v8 = vmul.f32 %v3896_v14, %v2427_v20 }
 0x5c4   : > { %v2291_v54 = vpop.permute.xlu1 %2290 }
 0x5c5   : > { %v2753_v17 = vmul.f32 %v4802_v58, %v2683_v8  ;;  %v2425_v59 = vsub.f32 %v3970_v21, %v2291_v54  ;;  %v3975_v54 = vld [vmem:[%s4063_s17 + $0x1f0] sm:$0xff]  ;;  %v3908_v21 = vpop.eup %3907 }
 0x5c6   : > { %v2989_v41 = vpop.xlane.xlu0 %2988 }
 0x5c7   : > { %v2817_v19 = vadd.f32 %v2753_v17, %v5931_v3  ;;  %v2681_v56 = vmul.f32 %v3898_v24, %v2425_v59  ;;  %v3069_v45 = vsub.f32 0.0, %v2989_v41  ;;  %v3976_v3 = vld [vmem:[%s4063_s17 + $0x1e0] sm:$0xff] }
 0x5c9   : > { %3137 = vst.msk [vmem:[%s4814_s23 + $0x1d8] sm:$0xff] %vm568_vm2, %v2817_v19  ;;  %v2751_v39 = vmul.f32 %v4802_v58, %v2681_v56  ;;  %v3910_v56 = vpop.eup %3909 }
 0x5ca   : > { %3198 = vst.msk [vmem:[%s4814_s23 + $0x1b8] sm:$0xff] %vm3142_vm5, %v3069_v45  ;;  %v2983_v42 = vpop.xlane.xlu0 %2982  ;;  %v5937_v45 = vld [vmem:[#allocation59_spill] sm:$0xff] }
 0x5cb   : > { %v2815_v25 = vadd.f32 %v2751_v39, %v5932_v36  ;;  %v3067_v5 = vsub.f32 0.0, %v2983_v42 }
 0x5cd   : > { %3135 = vst.msk [vmem:[%s4814_s23 + $0x1c8] sm:$0xff] %vm568_vm2, %v2815_v25  ;;  %v5938_v25 = vld [vmem:[#allocation53_spill] sm:$0xff] }
 0x5ce   : > { %3196 = vst.msk [vmem:[%s4814_s23 + $0x1a8] sm:$0xff] %vm3142_vm5, %v3067_v5  ;;  %v2293_v40 = vpop.permute.xlu0 %2292 }
 0x5cf   : > { %v2426_v26 = vsub.f32 %v3971_v1, %v2293_v40 }
 0x5d1   : > { %v2682_v22 = vmul.f32 %v3900_v63, %v2426_v26 }
 0x5d2   : > { %v2289_v2 = vpop.permute.xlu0 %2288 }
 0x5d3   : > { %v2752_v44 = vmul.f32 %v4802_v58, %v2682_v22  ;;  %v2424_v62 = vsub.f32 %v3972_v11, %v2289_v2 }
 0x5d5   : > { %v2816_v16 = vadd.f32 %v2752_v44, %v5933_v47  ;;  %v2680_v10 = vmul.f32 %v3902_v48, %v2424_v62 }
 0x5d7   : > { %3136 = vst.msk [vmem:[%s4814_s23 + $0x1d0] sm:$0xff] %vm568_vm2, %v2816_v16  ;;  %v2750_v43 = vmul.f32 %v4802_v58, %v2680_v10 }
 0x5d8   : > { %3201 = vst.msk [vmem:[%s4814_s23 + $0x1d0] sm:$0xff] %vm3142_vm5, %v3072_v33 }
 0x5d9   : > { %v2814_v6 = vadd.f32 %v2750_v43, %v5934_v34 }
 0x5db   : > { %3134 = vst.msk [vmem:[%s4814_s23 + $0x1c0] sm:$0xff] %vm568_vm2, %v2814_v6 }
 0x5dc   : > { %3199 = vst.msk [vmem:[%s4814_s23 + $0x1c0] sm:$0xff] %vm3142_vm5, %v3070_v18 }
 0x5f5   : > { %v3004_v32 = vpop.xlane.xlu1 %3003 }
 0x5f6   : > { %v3074_v40 = vsub.f32 0.0, %v3004_v32 }
 0x5f9   : > { %v2303_v38 = vpop.permute.xlu1 %2302 }
 0x5fa   : > { %v2431_v57 = vsub.f32 %v3973_v13, %v2303_v38 }
 0x5fc   : > { %v2687_v31 = vmul.f32 %v3904_v9, %v2431_v57 }
 0x5fd   : > { %v2299_v29 = vpop.permute.xlu1 %2298 }
 0x5fe   : > { %v2757_v0 = vmul.f32 %v4802_v58, %v2687_v31  ;;  %v2429_v35 = vsub.f32 %v3974_v55, %v2299_v29 }
 0x600   : > { %v2821_v52 = vadd.f32 %v2757_v0, %v5935_v37  ;;  %v2685_v28 = vmul.f32 %v3906_v61, %v2429_v35 }
 0x602   : > { %3141 = vst.msk [vmem:[%s4814_s23 + $0x1f8] sm:$0xff] %vm568_vm2, %v2821_v52  ;;  %v2755_v50 = vmul.f32 %v4802_v58, %v2685_v28 }
 0x603   : > { %v3001_v51 = vpop.xlane.xlu0 %3000 }
 0x604   : > { %v2819_v12 = vadd.f32 %v2755_v50, %v5936_v7  ;;  %v3073_v20 = vsub.f32 0.0, %v3001_v51 }
 0x606   : > { %3139 = vst.msk [vmem:[%s4814_s23 + $0x1e8] sm:$0xff] %vm568_vm2, %v2819_v12 }
 0x607   : > { %3202 = vst.msk [vmem:[%s4814_s23 + $0x1d8] sm:$0xff] %vm3142_vm5, %v3073_v20  ;;  %v2995_v14 = vpop.xlane.xlu0 %2994 }
 0x608   : > { %v3071_v27 = vsub.f32 0.0, %v2995_v14 }
 0x60a   : > { %3200 = vst.msk [vmem:[%s4814_s23 + $0x1c8] sm:$0xff] %vm3142_vm5, %v3071_v27 }
 0x60b   : > { %v2301_v8 = vpop.permute.xlu0 %2300 }
 0x60c   : > { %v2430_v17 = vsub.f32 %v3975_v54, %v2301_v8 }
 0x60e   : > { %v2686_v59 = vmul.f32 %v3908_v21, %v2430_v17 }
 0x60f   : > { %v2297_v24 = vpop.permute.xlu0 %2296 }
 0x610   : > { %v2756_v41 = vmul.f32 %v4802_v58, %v2686_v59  ;;  %v2428_v19 = vsub.f32 %v3976_v3, %v2297_v24 }
 0x612   : > { %v2820_v39 = vadd.f32 %v2756_v41, %v5937_v45  ;;  %v2684_v42 = vmul.f32 %v3910_v56, %v2428_v19 }
 0x614   : > { %3140 = vst.msk [vmem:[%s4814_s23 + $0x1f0] sm:$0xff] %vm568_vm2, %v2820_v39  ;;  %v2754_v36 = vmul.f32 %v4802_v58, %v2684_v42 }
 0x616   : > { %v2818_v5 = vadd.f32 %v2754_v36, %v5938_v25 }
 0x618   : > { %3138 = vst.msk [vmem:[%s4814_s23 + $0x1e0] sm:$0xff] %vm568_vm2, %v2818_v5 }
 0x619   : > { %3203 = vst.msk [vmem:[%s4814_s23 + $0x1e0] sm:$0xff] %vm3142_vm5, %v3074_v40 }
 0x62e   : > { %v3010_v1 = vpop.xlane.xlu1 %3009 }
 0x62f   : > { %v3076_v26 = vsub.f32 0.0, %v3010_v1 }
 0x631   : > { %3205 = vst.msk [vmem:[%s4814_s23 + $0x1f0] sm:$0xff] %vm3142_vm5, %v3076_v26 }
 0x640   : > { %v3007_v63 = vpop.xlane.xlu0 %3006 }
 0x641   : > { %v3075_v22 = vsub.f32 0.0, %v3007_v63 }
 0x643   : > { %3204 = vst.msk [vmem:[%s4814_s23 + $0x1e8] sm:$0xff] %vm3142_vm5, %v3075_v22 }
 0x644   : > { %v3013_v2 = vpop.xlane.xlu0 %3012 }
 0x645   : > { %v3077_v44 = vsub.f32 0.0, %v3013_v2 }
 0x647   : > { %3206 = vst.msk [vmem:[%s4814_s23 + $0x1f8] sm:$0xff] %vm3142_vm5, %v3077_v44 }
 0x648 PF: > { %s18_s27 = sadd.s32 1, %s3984_s27  }
 0x649   : > { %p15_p4 = scmp.ge.s32.totalorder %s18_s27, 6  }
 0x64b   :  { %17 = sbr.rel (!%p15_p4) target bundleno = 1 (0x1), region = 85 }

</bundles_post_ra>
